<compile_context>
chip_gen: v7x
topology: tpu7x:2x2x1
jax: 0.10.0
libtpu: 0.0.40
codegen_flags: <defaults>
</compile_context>

<pallas_src>
from functools import partial

import jax
import jax.numpy as jnp
from jax.experimental import pallas as pl
from jax.experimental.pallas import tpu as pltpu


# ---------------------------------------------------------------------------
# Pallas kernels: fused  out = A @ B + bias (+ add) (+ ReLU)
# A, B arrive in bf16; accumulation and epilogue in f32.
# ---------------------------------------------------------------------------
def _mm_kernel(a_ref, b_ref, bias_ref, o_ref, *, apply_relu):
    acc = jnp.dot(a_ref[...], b_ref[...], preferred_element_type=jnp.float32)
    acc = acc + bias_ref[...]
    if apply_relu:
        acc = jnp.maximum(acc, 0.0)
    o_ref[...] = acc.astype(o_ref.dtype)


def _mm_add_kernel(a_ref, b_ref, bias_ref, add_ref, o_ref, *, apply_relu):
    acc = jnp.dot(a_ref[...], b_ref[...], preferred_element_type=jnp.float32)
    acc = acc + bias_ref[...] + add_ref[...]
    if apply_relu:
        acc = jnp.maximum(acc, 0.0)
    o_ref[...] = acc.astype(o_ref.dtype)


def _pick_tm(mp):
    """Largest multiple-of-8 divisor of mp, capped at 256 (gives grid>=2 when M>=512
    so a 'parallel' axis exists for megacore / v7x's second TensorCore)."""
    best = 8
    t = 8
    cap = min(mp, 256)
    while t <= cap:
        if mp % t == 0:
            best = t
        t += 8
    return best


def matmul_bias_act(a, b, bias, add=None, apply_relu=False):
    """a:(M,K) @ b:(K,N) + bias:(N,) [+ add:(M,N)] via Pallas, tiled over M.

    K / N use full-extent blocks (no padding, no padded HBM copies); M is
    padded to a multiple of 8 only if necessary.  MXU inputs are bf16.
    """
    M, K = a.shape
    _, N = b.shape

    a = a.astype(jnp.bfloat16)
    b = b.astype(jnp.bfloat16)
    bias2 = bias.astype(jnp.float32).reshape(1, N)

    Mp = ((M + 7) // 8) * 8
    pad_rows = Mp - M
    if pad_rows:
        a = jnp.pad(a, ((0, pad_rows), (0, 0)))
        if add is not None:
            add = jnp.pad(add, ((0, pad_rows), (0, 0)))

    TM = _pick_tm(Mp)
    grid = (Mp // TM,)

    bytes_accessed = Mp * K * 2 + K * N * 2 + Mp * N * 4
    if add is not None:
        bytes_accessed += Mp * N * 4
    cost = pl.CostEstimate(flops=2 * Mp * K * N, transcendentals=0,
                           bytes_accessed=bytes_accessed)

    in_specs = [
        pl.BlockSpec((TM, K), lambda i: (i, 0)),
        pl.BlockSpec((K, N), lambda i: (0, 0)),
        pl.BlockSpec((1, N), lambda i: (0, 0)),
    ]
    args = [a, b, bias2]
    if add is not None:
        in_specs.append(pl.BlockSpec((TM, N), lambda i: (i, 0)))
        args.append(add.astype(jnp.float32))
        kern = partial(_mm_add_kernel, apply_relu=apply_relu)
    else:
        kern = partial(_mm_kernel, apply_relu=apply_relu)

    out = pl.pallas_call(
        kern,
        out_shape=jax.ShapeDtypeStruct((Mp, N), jnp.float32),
        grid=grid,
        in_specs=in_specs,
        out_specs=pl.BlockSpec((TM, N), lambda i: (i, 0)),
        compiler_params=pltpu.CompilerParams(dimension_semantics=("parallel",)),
        cost_estimate=cost,
    )(*args)
    if pad_rows:
        out = out[:M]
    return out


# ---------------------------------------------------------------------------
# Convolutions (channel-last) lowered to im2col + Pallas matmul
# ---------------------------------------------------------------------------
def conv2d_nhwc(x, w, b, stride=(1, 1), padding=(0, 0), add=None, apply_relu=False):
    """x: (N,H,W,Cin), w: (Cout,Cin,kh,kw) [PyTorch layout] -> (N,Ho,Wo,Cout)."""
    N, H, W, Cin = x.shape
    Cout, _, kh, kw = w.shape
    sh, sw = stride
    ph, pw = padding
    Ho = (H + 2 * ph - kh) // sh + 1
    Wo = (W + 2 * pw - kw) // sw + 1
    if ph or pw:
        x = jnp.pad(x, ((0, 0), (ph, ph), (pw, pw), (0, 0)))

    if kh == 1 and kw == 1:
        A = x[:, ::sh, ::sw, :][:, :Ho, :Wo, :].reshape(N * Ho * Wo, Cin)
    else:
        cols = []
        for i in range(kh):
            for j in range(kw):
                cols.append(x[:, i:i + sh * Ho:sh, j:j + sw * Wo:sw, :])
        A = jnp.concatenate(cols, axis=-1).reshape(N * Ho * Wo, kh * kw * Cin)

    Wm = w.transpose(2, 3, 1, 0).reshape(kh * kw * Cin, Cout)  # (i,j,ci) order
    if add is not None:
        add = add.reshape(N * Ho * Wo, Cout)
    out = matmul_bias_act(A, Wm, b, add=add, apply_relu=apply_relu)
    return out.reshape(N, Ho, Wo, Cout)


def conv_transpose2d_nhwc(x, w, b, stride=(2, 2), padding=(0, 0),
                          add=None, apply_relu=False):
    """PyTorch ConvTranspose2d semantics, sub-pixel lowering.

    x: (N,H,W,Cin), w: (Cin,Cout,kh,kw).  Lowered to ONE stride-1 conv producing
    sh*sw*Cout channels (union tap window, zero taps where a phase has no
    contribution) followed by a pixel shuffle — no zero-dilated tensor.
    """
    N, H, W, Cin = x.shape
    _, Cout, kh, kw = w.shape
    sh, sw = stride
    ph, pw = padding
    Ho = (H - 1) * sh - 2 * ph + kh
    Wo = (W - 1) * sw - 2 * pw + kw
    assert Ho % sh == 0 and Wo % sw == 0, "sub-pixel lowering expects s | output size"
    Hr, Wr = Ho // sh, Wo // sw

    # Per-output-phase taps: out[s*t+ry] += x[t+dy] * w[ky] with dy=(ry+p-ky)//s.
    taps = {}
    all_dy, all_dx = [], []
    for ry in range(sh):
        for rx in range(sw):
            lst = []
            for ky in range(kh):
                if (ry + ph - ky) % sh != 0:
                    continue
                dy = (ry + ph - ky) // sh
                for kx in range(kw):
                    if (rx + pw - kx) % sw != 0:
                        continue
                    dx = (rx + pw - kx) // sw
                    lst.append((dy, dx, ky, kx))
                    all_dy.append(dy)
                    all_dx.append(dx)
            taps[(ry, rx)] = lst
    dy0, dy1 = min(all_dy), max(all_dy)
    dx0, dx1 = min(all_dx), max(all_dx)
    Keh, Kew = dy1 - dy0 + 1, dx1 - dx0 + 1

    # Equivalent weight (Keh, Kew, Cin, sh*sw*Cout); zeros where a phase has no tap.
    We = jnp.zeros((Keh, Kew, Cin, sh * sw * Cout), jnp.float32)
    for (ry, rx), lst in taps.items():
        p = ry * sw + rx
        for (dy, dx, ky, kx) in lst:
            We = We.at[dy - dy0, dx - dx0, :, p * Cout:(p + 1) * Cout].set(w[:, :, ky, kx])
    Wm = We.reshape(Keh * Kew * Cin, sh * sw * Cout)
    be = jnp.tile(b, sh * sw)

    pad_t = max(0, -dy0)
    pad_b = max(0, (Hr - 1 + dy1) - (H - 1))
    pad_l = max(0, -dx0)
    pad_r = max(0, (Wr - 1 + dx1) - (W - 1))
    xp = jnp.pad(x, ((0, 0), (pad_t, pad_b), (pad_l, pad_r), (0, 0)))

    cols = []
    for e in range(Keh):
        for f in range(Kew):
            oy = dy0 + e + pad_t
            ox = dx0 + f + pad_l
            cols.append(xp[:, oy:oy + Hr, ox:ox + Wr, :])
    A = jnp.concatenate(cols, axis=-1).reshape(N * Hr * Wr, Keh * Kew * Cin)

    if add is not None:  # pixel-unshuffle the add tensor to match the matmul layout
        add = add.reshape(N, Hr, sh, Wr, sw, Cout).transpose(0, 1, 3, 2, 4, 5)
        add = add.reshape(N * Hr * Wr, sh * sw * Cout)

    out = matmul_bias_act(A, Wm, be, add=add, apply_relu=apply_relu)
    out = out.reshape(N, Hr, Wr, sh, sw, Cout).transpose(0, 1, 3, 2, 4, 5)
    return out.reshape(N, Ho, Wo, Cout)


# ---------------------------------------------------------------------------
# Small channel-last ops (mem-bound glue, left to XLA fusion)
# ---------------------------------------------------------------------------
def group_norm_nhwc(x, gamma, beta, groups=4, eps=1e-5):
    N, H, W, C = x.shape
    xg = x.reshape(N, H * W, groups, C // groups)
    mean = xg.mean(axis=(1, 3), keepdims=True)
    var = ((xg - mean) ** 2).mean(axis=(1, 3), keepdims=True)
    xn = ((xg - mean) * jax.lax.rsqrt(var + eps)).reshape(N, H, W, C)
    return xn * gamma + beta


def eca_attention_nhwc(x, w3):
    """Efficient channel attention: GAP -> conv1d(k=3) over C -> sigmoid -> scale."""
    y = x.mean(axis=(1, 2))                          # (N, C)
    yp = jnp.pad(y, ((0, 0), (1, 1)))
    z = w3[0] * yp[:, :-2] + w3[1] * yp[:, 1:-1] + w3[2] * yp[:, 2:]
    return x * jax.nn.sigmoid(z)[:, None, None, :]


# ---------------------------------------------------------------------------
# Residual blocks (channel-last); residual add + ReLU fused into shortcut conv
# ---------------------------------------------------------------------------
def residual_down(x, p, groups=4):
    h = conv2d_nhwc(x, p["w1"], p["b1"], stride=(2, 2), padding=(1, 1))
    h = jax.nn.relu(group_norm_nhwc(h, p["g1"], p["be1"], groups))
    # dropout: identity (eval mode)
    h = conv2d_nhwc(h, p["w2"], p["b2"], stride=(1, 1), padding=(1, 1))
    h = group_norm_nhwc(h, p["g2"], p["be2"], groups)
    # shortcut 1x1 strided conv; relu(main + shortcut) fused in the kernel epilogue
    return conv2d_nhwc(x, p["ws"], p["bs"], stride=(2, 2), padding=(0, 0),
                       add=h, apply_relu=True)


def residual_up(x, p, groups=4):
    h = conv_transpose2d_nhwc(x, p["w1"], p["b1"], stride=(2, 2), padding=(1, 1))
    h = jax.nn.relu(group_norm_nhwc(h, p["g1"], p["be1"], groups))
    h = conv2d_nhwc(h, p["w2"], p["b2"], stride=(1, 1), padding=(1, 1))
    h = group_norm_nhwc(h, p["g2"], p["be2"], groups)
    return conv_transpose2d_nhwc(x, p["ws"], p["bs"], stride=(2, 2), padding=(0, 0),
                                 add=h, apply_relu=True)


# ---------------------------------------------------------------------------
# Parameter init (deterministic, Kaiming-like, PyTorch weight layouts)
# ---------------------------------------------------------------------------
def _init_conv(key, cout, cin, kh, kw):
    k1, k2 = jax.random.split(key)
    std = (2.0 / (cin * kh * kw)) ** 0.5
    w = jax.random.normal(k1, (cout, cin, kh, kw), jnp.float32) * std
    b = jax.random.normal(k2, (cout,), jnp.float32) * 0.01
    return w, b


def _init_convT(key, cin, cout, kh, kw):
    k1, k2 = jax.random.split(key)
    std = (2.0 / (cin * kh * kw)) ** 0.5
    w = jax.random.normal(k1, (cin, cout, kh, kw), jnp.float32) * std
    b = jax.random.normal(k2, (cout,), jnp.float32) * 0.01
    return w, b


def _init_gn(key, c):
    k1, k2 = jax.random.split(key)
    g = 1.0 + 0.02 * jax.random.normal(k1, (c,), jnp.float32)
    be = 0.02 * jax.random.normal(k2, (c,), jnp.float32)
    return g, be


def _init_res_down(key, cin, cout, k):
    ks = jax.random.split(key, 5)
    w1, b1 = _init_conv(ks[0], cout, cin, k, k)
    g1, be1 = _init_gn(ks[1], cout)
    w2, b2 = _init_conv(ks[2], cout, cout, 3, 3)
    g2, be2 = _init_gn(ks[3], cout)
    ws, bs = _init_conv(ks[4], cout, cin, 1, 1)
    return dict(w1=w1, b1=b1, g1=g1, be1=be1, w2=w2, b2=b2, g2=g2, be2=be2, ws=ws, bs=bs)


def _init_res_up(key, cin, cout, k, s):
    ks = jax.random.split(key, 5)
    w1, b1 = _init_convT(ks[0], cin, cout, k, k)
    g1, be1 = _init_gn(ks[1], cout)
    w2, b2 = _init_conv(ks[2], cout, cout, 3, 3)
    g2, be2 = _init_gn(ks[3], cout)
    ws, bs = _init_convT(ks[4], cin, cout, s, s)
    return dict(w1=w1, b1=b1, g1=g1, be1=be1, w2=w2, b2=b2, g2=g2, be2=be2, ws=ws, bs=bs)


def init_resunet_params(key, in_channels=3, out_channels=3, channels=(8, 16, 16),
                        kernel_size=4, stride=2):
    depth = len(channels)
    keys = jax.random.split(key, 8 + 4 * depth)
    ki = iter(keys)
    params = {}
    params["expand_w"], params["expand_b"] = _init_conv(next(ki), channels[0], in_channels, 1, 1)
    params["collapse_w"], params["collapse_b"] = _init_conv(next(ki), out_channels, channels[0], 1, 1)

    params["down"] = []
    for i in range(depth):
        cin = channels[i - 1] if i > 0 else channels[0]
        cout = channels[i]
        params["down"].append(dict(
            res=_init_res_down(next(ki), cin, cout, kernel_size),
            att=0.1 * jax.random.normal(next(ki), (3,), jnp.float32),
        ))

    params["up"] = []
    for i in reversed(range(1, depth)):
        cin, cout = channels[i], channels[i - 1]
        cw, cb = _init_conv(next(ki), cout, cout * 2, 1, 1)
        params["up"].append(dict(
            res=_init_res_up(next(ki), cin, cout, kernel_size, stride),
            att=0.1 * jax.random.normal(next(ki), (3,), jnp.float32),
            comb_w=cw, comb_b=cb,
        ))

    params["final_up"] = dict(
        res=_init_res_up(next(ki), channels[0], channels[0], kernel_size, stride),
        att=0.1 * jax.random.normal(next(ki), (3,), jnp.float32),
    )
    params["final_comb_w"], params["final_comb_b"] = _init_conv(
        next(ki), channels[0], channels[0] * 2, 1, 1)
    return params


# ---------------------------------------------------------------------------
# Full ResidualUnet forward (NCHW in/out; channel-last internally)
# ---------------------------------------------------------------------------
def resunet_forward(params, x_nchw):
    x = jnp.transpose(x_nchw, (0, 2, 3, 1))                        # NCHW -> NHWC (once)
    e = conv2d_nhwc(x, params["expand_w"], params["expand_b"])     # 1x1 expand
    h = e
    encodings = []
    for p in params["down"]:
        h = residual_down(h, p["res"])
        h = eca_attention_nhwc(h, p["att"])
        encodings.append(h)
    h = encodings[-1]
    skips = encodings[:-1][::-1]
    for p, skip in zip(params["up"], skips):
        h = residual_up(h, p["res"])
        h = eca_attention_nhwc(h, p["att"])
        h = jnp.concatenate([h, skip], axis=-1)                    # ConcatTensors(1)
        h = conv2d_nhwc(h, p["comb_w"], p["comb_b"])               # 1x1 fuse
    h = residual_up(h, params["final_up"]["res"])
    h = eca_attention_nhwc(h, params["final_up"]["att"])
    h = jnp.concatenate([h, e], axis=-1)
    h = conv2d_nhwc(h, params["final_comb_w"], params["final_comb_b"])
    y = conv2d_nhwc(h, params["collapse_w"], params["collapse_b"])  # 1x1 collapse
    return jnp.transpose(y, (0, 3, 1, 2))                          # NHWC -> NCHW (once)


if __name__ == "__main__":
    key = jax.random.PRNGKey(0)
    kp, kx = jax.random.split(key)

    # small config: in=3, out=3, channels=[8,16,16], kernel=4, stride=2, 2D
    params = init_resunet_params(kp, in_channels=3, out_channels=3,
                                 channels=(8, 16, 16), kernel_size=4, stride=2)
    x = jax.random.normal(kx, (2, 3, 16, 16), jnp.float32)          # NCHW

    y = jax.jit(resunet_forward)(params, x)
    y = jax.block_until_ready(y)

    assert y.shape == (2, 3, 16, 16), y.shape
    assert jnp.all(jnp.isfinite(y))
    print("KERNEL_OK")
</pallas_src>

<mosaic_0001>
module attributes {stable_mosaic.version = 11 : i64} {
  func.func @_mm_kernel(%arg0: i32, %arg1: memref<256x3xbf16, #tpu.memory_space<vmem>>, %arg2: memref<3x8xbf16, #tpu.memory_space<vmem>>, %arg3: memref<1x8xf32, #tpu.memory_space<vmem>>, %arg4: memref<256x8xf32, #tpu.memory_space<vmem>>) attributes {dimension_semantics = [#tpu.dimension_semantics<parallel>], iteration_bounds = array<i64: 2>, scalar_prefetch = 0 : i64, scratch_operands = 0 : i64, tpu.core_type = #tpu.core_type<tc>, window_params = [{transform_indices = @transform_0, window_bounds = array<i64: 256, 3>}, {pipeline_mode = #tpu.pipeline_mode<synchronous>, transform_indices = @transform_1, window_bounds = array<i64: 3, 8>}, {pipeline_mode = #tpu.pipeline_mode<synchronous>, transform_indices = @transform_2, window_bounds = array<i64: 1, 8>}, {transform_indices = @transform_3, window_bounds = array<i64: 256, 8>}]} {
    %c0 = arith.constant 0 : index
    %c0_0 = arith.constant 0 : index
    %0 = vector.load %arg1[%c0, %c0_0] : memref<256x3xbf16, #tpu.memory_space<vmem>>, vector<256x3xbf16>
    %c0_1 = arith.constant 0 : index
    %c0_2 = arith.constant 0 : index
    %1 = vector.load %arg2[%c0_1, %c0_2] : memref<3x8xbf16, #tpu.memory_space<vmem>>, vector<3x8xbf16>
    %cst = arith.constant dense<0.000000e+00> : vector<256x8xf32>
    %2 = tpu.matmul %0, %1, %cst {dimension_numbers = #tpu.dot_dimension_numbers<[1], [0], [0], [1], [0, 0, 1, 1], [], []>} : vector<256x3xbf16>, vector<3x8xbf16>, vector<256x8xf32> -> vector<256x8xf32>
    %c0_3 = arith.constant 0 : index
    %c0_4 = arith.constant 0 : index
    %3 = vector.load %arg3[%c0_3, %c0_4] : memref<1x8xf32, #tpu.memory_space<vmem>>, vector<1x8xf32>
    %4 = vector.broadcast %3 : vector<1x8xf32> to vector<256x8xf32>
    %5 = arith.addf %2, %4 : vector<256x8xf32>
    %c0_5 = arith.constant 0 : index
    %c0_6 = arith.constant 0 : index
    %6 = vector.load %arg4[%c0_5, %c0_6] : memref<256x8xf32, #tpu.memory_space<vmem>>, vector<256x8xf32>
    tpu.vector_store %arg4[%c0_5, %c0_6], %5 {strides = array<i32>} : memref<256x8xf32, #tpu.memory_space<vmem>>, vector<256x8xf32>,
    return
  }
  func.func @transform_0(%arg0: i32) -> (i32, i32) {
    %c0_i32 = arith.constant 0 : i32
    %c0_i32_0 = arith.constant 0 : i32
    return %arg0, %c0_i32 : i32, i32
  }
  func.func @transform_1(%arg0: i32) -> (i32, i32) {
    %c0_i32 = arith.constant 0 : i32
    %c0_i32_0 = arith.constant 0 : i32
    %c0_i32_1 = arith.constant 0 : i32
    return %c0_i32, %c0_i32_0 : i32, i32
  }
  func.func @transform_2(%arg0: i32) -> (i32, i32) {
    %c0_i32 = arith.constant 0 : i32
    %c0_i32_0 = arith.constant 0 : i32
    %c0_i32_1 = arith.constant 0 : i32
    return %c0_i32, %c0_i32_0 : i32, i32
  }
  func.func @transform_3(%arg0: i32) -> (i32, i32) {
    %c0_i32 = arith.constant 0 : i32
    %c0_i32_0 = arith.constant 0 : i32
    return %arg0, %c0_i32 : i32, i32
  }
}

module attributes {stable_mosaic.version = 11 : i64} {
  func.func @_mm_kernel(%arg0: i32, %arg1: memref<128x128xbf16, #tpu.memory_space<vmem>>, %arg2: memref<128x8xbf16, #tpu.memory_space<vmem>>, %arg3: memref<1x8xf32, #tpu.memory_space<vmem>>, %arg4: memref<128x8xf32, #tpu.memory_space<vmem>>) attributes {dimension_semantics = [#tpu.dimension_semantics<parallel>], iteration_bounds = array<i64: 1>, scalar_prefetch = 0 : i64, scratch_operands = 0 : i64, tpu.core_type = #tpu.core_type<tc>, window_params = [{transform_indices = @transform_0, window_bounds = array<i64: 128, 128>}, {pipeline_mode = #tpu.pipeline_mode<synchronous>, transform_indices = @transform_1, window_bounds = array<i64: 128, 8>}, {pipeline_mode = #tpu.pipeline_mode<synchronous>, transform_indices = @transform_2, window_bounds = array<i64: 1, 8>}, {transform_indices = @transform_3, window_bounds = array<i64: 128, 8>}]} {
    %c0 = arith.constant 0 : index
    %c0_0 = arith.constant 0 : index
    %0 = vector.load %arg1[%c0, %c0_0] : memref<128x128xbf16, #tpu.memory_space<vmem>>, vector<128x128xbf16>
    %c0_1 = arith.constant 0 : index
    %c0_2 = arith.constant 0 : index
    %1 = vector.load %arg2[%c0_1, %c0_2] : memref<128x8xbf16, #tpu.memory_space<vmem>>, vector<128x8xbf16>
    %cst = arith.constant dense<0.000000e+00> : vector<128x8xf32>
    %2 = tpu.matmul %0, %1, %cst {dimension_numbers = #tpu.dot_dimension_numbers<[1], [0], [0], [1], [0, 0, 1, 1], [], []>} : vector<128x128xbf16>, vector<128x8xbf16>, vector<128x8xf32> -> vector<128x8xf32>
    %c0_3 = arith.constant 0 : index
    %c0_4 = arith.constant 0 : index
    %3 = vector.load %arg3[%c0_3, %c0_4] : memref<1x8xf32, #tpu.memory_space<vmem>>, vector<1x8xf32>
    %4 = vector.broadcast %3 : vector<1x8xf32> to vector<128x8xf32>
    %5 = arith.addf %2, %4 : vector<128x8xf32>
    %c0_5 = arith.constant 0 : index
    %c0_6 = arith.constant 0 : index
    %6 = vector.load %arg4[%c0_5, %c0_6] : memref<128x8xf32, #tpu.memory_space<vmem>>, vector<128x8xf32>
    tpu.vector_store %arg4[%c0_5, %c0_6], %5 {strides = array<i32>} : memref<128x8xf32, #tpu.memory_space<vmem>>, vector<128x8xf32>,
    return
  }
  func.func @transform_0(%arg0: i32) -> (i32, i32) {
    %c0_i32 = arith.constant 0 : i32
    %c0_i32_0 = arith.constant 0 : i32
    return %arg0, %c0_i32 : i32, i32
  }
  func.func @transform_1(%arg0: i32) -> (i32, i32) {
    %c0_i32 = arith.constant 0 : i32
    %c0_i32_0 = arith.constant 0 : i32
    %c0_i32_1 = arith.constant 0 : i32
    return %c0_i32, %c0_i32_0 : i32, i32
  }
  func.func @transform_2(%arg0: i32) -> (i32, i32) {
    %c0_i32 = arith.constant 0 : i32
    %c0_i32_0 = arith.constant 0 : i32
    %c0_i32_1 = arith.constant 0 : i32
    return %c0_i32, %c0_i32_0 : i32, i32
  }
  func.func @transform_3(%arg0: i32) -> (i32, i32) {
    %c0_i32 = arith.constant 0 : i32
    %c0_i32_0 = arith.constant 0 : i32
    return %arg0, %c0_i32 : i32, i32
  }
}

module attributes {stable_mosaic.version = 11 : i64} {
  func.func @_mm_kernel(%arg0: i32, %arg1: memref<128x72xbf16, #tpu.memory_space<vmem>>, %arg2: memref<72x8xbf16, #tpu.memory_space<vmem>>, %arg3: memref<1x8xf32, #tpu.memory_space<vmem>>, %arg4: memref<128x8xf32, #tpu.memory_space<vmem>>) attributes {dimension_semantics = [#tpu.dimension_semantics<parallel>], iteration_bounds = array<i64: 1>, scalar_prefetch = 0 : i64, scratch_operands = 0 : i64, tpu.core_type = #tpu.core_type<tc>, window_params = [{transform_indices = @transform_0, window_bounds = array<i64: 128, 72>}, {pipeline_mode = #tpu.pipeline_mode<synchronous>, transform_indices = @transform_1, window_bounds = array<i64: 72, 8>}, {pipeline_mode = #tpu.pipeline_mode<synchronous>, transform_indices = @transform_2, window_bounds = array<i64: 1, 8>}, {transform_indices = @transform_3, window_bounds = array<i64: 128, 8>}]} {
    %c0 = arith.constant 0 : index
    %c0_0 = arith.constant 0 : index
    %0 = vector.load %arg1[%c0, %c0_0] : memref<128x72xbf16, #tpu.memory_space<vmem>>, vector<128x72xbf16>
    %c0_1 = arith.constant 0 : index
    %c0_2 = arith.constant 0 : index
    %1 = vector.load %arg2[%c0_1, %c0_2] : memref<72x8xbf16, #tpu.memory_space<vmem>>, vector<72x8xbf16>
    %cst = arith.constant dense<0.000000e+00> : vector<128x8xf32>
    %2 = tpu.matmul %0, %1, %cst {dimension_numbers = #tpu.dot_dimension_numbers<[1], [0], [0], [1], [0, 0, 1, 1], [], []>} : vector<128x72xbf16>, vector<72x8xbf16>, vector<128x8xf32> -> vector<128x8xf32>
    %c0_3 = arith.constant 0 : index
    %c0_4 = arith.constant 0 : index
    %3 = vector.load %arg3[%c0_3, %c0_4] : memref<1x8xf32, #tpu.memory_space<vmem>>, vector<1x8xf32>
    %4 = vector.broadcast %3 : vector<1x8xf32> to vector<128x8xf32>
    %5 = arith.addf %2, %4 : vector<128x8xf32>
    %c0_5 = arith.constant 0 : index
    %c0_6 = arith.constant 0 : index
    %6 = vector.load %arg4[%c0_5, %c0_6] : memref<128x8xf32, #tpu.memory_space<vmem>>, vector<128x8xf32>
    tpu.vector_store %arg4[%c0_5, %c0_6], %5 {strides = array<i32>} : memref<128x8xf32, #tpu.memory_space<vmem>>, vector<128x8xf32>,
    return
  }
  func.func @transform_0(%arg0: i32) -> (i32, i32) {
    %c0_i32 = arith.constant 0 : i32
    %c0_i32_0 = arith.constant 0 : i32
    return %arg0, %c0_i32 : i32, i32
  }
  func.func @transform_1(%arg0: i32) -> (i32, i32) {
    %c0_i32 = arith.constant 0 : i32
    %c0_i32_0 = arith.constant 0 : i32
    %c0_i32_1 = arith.constant 0 : i32
    return %c0_i32, %c0_i32_0 : i32, i32
  }
  func.func @transform_2(%arg0: i32) -> (i32, i32) {
    %c0_i32 = arith.constant 0 : i32
    %c0_i32_0 = arith.constant 0 : i32
    %c0_i32_1 = arith.constant 0 : i32
    return %c0_i32, %c0_i32_0 : i32, i32
  }
  func.func @transform_3(%arg0: i32) -> (i32, i32) {
    %c0_i32 = arith.constant 0 : i32
    %c0_i32_0 = arith.constant 0 : i32
    return %arg0, %c0_i32 : i32, i32
  }
}

module attributes {stable_mosaic.version = 11 : i64} {
  func.func @_mm_add_kernel(%arg0: i32, %arg1: memref<128x8xbf16, #tpu.memory_space<vmem>>, %arg2: memref<8x8xbf16, #tpu.memory_space<vmem>>, %arg3: memref<1x8xf32, #tpu.memory_space<vmem>>, %arg4: memref<128x8xf32, #tpu.memory_space<vmem>>, %arg5: memref<128x8xf32, #tpu.memory_space<vmem>>) attributes {dimension_semantics = [#tpu.dimension_semantics<parallel>], iteration_bounds = array<i64: 1>, scalar_prefetch = 0 : i64, scratch_operands = 0 : i64, tpu.core_type = #tpu.core_type<tc>, window_params = [{transform_indices = @transform_0, window_bounds = array<i64: 128, 8>}, {pipeline_mode = #tpu.pipeline_mode<synchronous>, transform_indices = @transform_1, window_bounds = array<i64: 8, 8>}, {pipeline_mode = #tpu.pipeline_mode<synchronous>, transform_indices = @transform_2, window_bounds = array<i64: 1, 8>}, {transform_indices = @transform_3, window_bounds = array<i64: 128, 8>}, {transform_indices = @transform_4, window_bounds = array<i64: 128, 8>}]} {
    %c0 = arith.constant 0 : index
    %c0_0 = arith.constant 0 : index
    %0 = vector.load %arg1[%c0, %c0_0] : memref<128x8xbf16, #tpu.memory_space<vmem>>, vector<128x8xbf16>
    %c0_1 = arith.constant 0 : index
    %c0_2 = arith.constant 0 : index
    %1 = vector.load %arg2[%c0_1, %c0_2] : memref<8x8xbf16, #tpu.memory_space<vmem>>, vector<8x8xbf16>
    %cst = arith.constant dense<0.000000e+00> : vector<128x8xf32>
    %2 = tpu.matmul %0, %1, %cst {dimension_numbers = #tpu.dot_dimension_numbers<[1], [0], [0], [1], [0, 0, 1, 1], [], []>} : vector<128x8xbf16>, vector<8x8xbf16>, vector<128x8xf32> -> vector<128x8xf32>
    %c0_3 = arith.constant 0 : index
    %c0_4 = arith.constant 0 : index
    %3 = vector.load %arg3[%c0_3, %c0_4] : memref<1x8xf32, #tpu.memory_space<vmem>>, vector<1x8xf32>
    %4 = vector.broadcast %3 : vector<1x8xf32> to vector<128x8xf32>
    %5 = arith.addf %2, %4 : vector<128x8xf32>
    %c0_5 = arith.constant 0 : index
    %c0_6 = arith.constant 0 : index
    %6 = vector.load %arg4[%c0_5, %c0_6] : memref<128x8xf32, #tpu.memory_space<vmem>>, vector<128x8xf32>
    %7 = arith.addf %5, %6 : vector<128x8xf32>
    %cst_7 = arith.constant 0.000000e+00 : f32
    %8 = vector.broadcast %cst_7 : f32 to vector<128x8xf32>
    %9 = arith.maximumf %7, %8 : vector<128x8xf32>
    %c0_8 = arith.constant 0 : index
    %c0_9 = arith.constant 0 : index
    %10 = vector.load %arg5[%c0_8, %c0_9] : memref<128x8xf32, #tpu.memory_space<vmem>>, vector<128x8xf32>
    tpu.vector_store %arg5[%c0_8, %c0_9], %9 {strides = array<i32>} : memref<128x8xf32, #tpu.memory_space<vmem>>, vector<128x8xf32>,
    return
  }
  func.func @transform_0(%arg0: i32) -> (i32, i32) {
    %c0_i32 = arith.constant 0 : i32
    %c0_i32_0 = arith.constant 0 : i32
    return %arg0, %c0_i32 : i32, i32
  }
  func.func @transform_1(%arg0: i32) -> (i32, i32) {
    %c0_i32 = arith.constant 0 : i32
    %c0_i32_0 = arith.constant 0 : i32
    %c0_i32_1 = arith.constant 0 : i32
    return %c0_i32, %c0_i32_0 : i32, i32
  }
  func.func @transform_2(%arg0: i32) -> (i32, i32) {
    %c0_i32 = arith.constant 0 : i32
    %c0_i32_0 = arith.constant 0 : i32
    %c0_i32_1 = arith.constant 0 : i32
    return %c0_i32, %c0_i32_0 : i32, i32
  }
  func.func @transform_3(%arg0: i32) -> (i32, i32) {
    %c0_i32 = arith.constant 0 : i32
    %c0_i32_0 = arith.constant 0 : i32
    return %arg0, %c0_i32 : i32, i32
  }
  func.func @transform_4(%arg0: i32) -> (i32, i32) {
    %c0_i32 = arith.constant 0 : i32
    %c0_i32_0 = arith.constant 0 : i32
    return %arg0, %c0_i32 : i32, i32
  }
}

module attributes {stable_mosaic.version = 11 : i64} {
  func.func @_mm_kernel(%arg0: i32, %arg1: memref<32x128xbf16, #tpu.memory_space<vmem>>, %arg2: memref<128x16xbf16, #tpu.memory_space<vmem>>, %arg3: memref<1x16xf32, #tpu.memory_space<vmem>>, %arg4: memref<32x16xf32, #tpu.memory_space<vmem>>) attributes {dimension_semantics = [#tpu.dimension_semantics<parallel>], iteration_bounds = array<i64: 1>, scalar_prefetch = 0 : i64, scratch_operands = 0 : i64, tpu.core_type = #tpu.core_type<tc>, window_params = [{transform_indices = @transform_0, window_bounds = array<i64: 32, 128>}, {pipeline_mode = #tpu.pipeline_mode<synchronous>, transform_indices = @transform_1, window_bounds = array<i64: 128, 16>}, {pipeline_mode = #tpu.pipeline_mode<synchronous>, transform_indices = @transform_2, window_bounds = array<i64: 1, 16>}, {transform_indices = @transform_3, window_bounds = array<i64: 32, 16>}]} {
    %c0 = arith.constant 0 : index
    %c0_0 = arith.constant 0 : index
    %0 = vector.load %arg1[%c0, %c0_0] : memref<32x128xbf16, #tpu.memory_space<vmem>>, vector<32x128xbf16>
    %c0_1 = arith.constant 0 : index
    %c0_2 = arith.constant 0 : index
    %1 = vector.load %arg2[%c0_1, %c0_2] : memref<128x16xbf16, #tpu.memory_space<vmem>>, vector<128x16xbf16>
    %cst = arith.constant dense<0.000000e+00> : vector<32x16xf32>
    %2 = tpu.matmul %0, %1, %cst {dimension_numbers = #tpu.dot_dimension_numbers<[1], [0], [0], [1], [0, 0, 1, 1], [], []>} : vector<32x128xbf16>, vector<128x16xbf16>, vector<32x16xf32> -> vector<32x16xf32>
    %c0_3 = arith.constant 0 : index
    %c0_4 = arith.constant 0 : index
    %3 = vector.load %arg3[%c0_3, %c0_4] : memref<1x16xf32, #tpu.memory_space<vmem>>, vector<1x16xf32>
    %4 = vector.broadcast %3 : vector<1x16xf32> to vector<32x16xf32>
    %5 = arith.addf %2, %4 : vector<32x16xf32>
    %c0_5 = arith.constant 0 : index
    %c0_6 = arith.constant 0 : index
    %6 = vector.load %arg4[%c0_5, %c0_6] : memref<32x16xf32, #tpu.memory_space<vmem>>, vector<32x16xf32>
    tpu.vector_store %arg4[%c0_5, %c0_6], %5 {strides = array<i32>} : memref<32x16xf32, #tpu.memory_space<vmem>>, vector<32x16xf32>,
    return
  }
  func.func @transform_0(%arg0: i32) -> (i32, i32) {
    %c0_i32 = arith.constant 0 : i32
    %c0_i32_0 = arith.constant 0 : i32
    return %arg0, %c0_i32 : i32, i32
  }
  func.func @transform_1(%arg0: i32) -> (i32, i32) {
    %c0_i32 = arith.constant 0 : i32
    %c0_i32_0 = arith.constant 0 : i32
    %c0_i32_1 = arith.constant 0 : i32
    return %c0_i32, %c0_i32_0 : i32, i32
  }
  func.func @transform_2(%arg0: i32) -> (i32, i32) {
    %c0_i32 = arith.constant 0 : i32
    %c0_i32_0 = arith.constant 0 : i32
    %c0_i32_1 = arith.constant 0 : i32
    return %c0_i32, %c0_i32_0 : i32, i32
  }
  func.func @transform_3(%arg0: i32) -> (i32, i32) {
    %c0_i32 = arith.constant 0 : i32
    %c0_i32_0 = arith.constant 0 : i32
    return %arg0, %c0_i32 : i32, i32
  }
}

module attributes {stable_mosaic.version = 11 : i64} {
  func.func @_mm_kernel(%arg0: i32, %arg1: memref<32x144xbf16, #tpu.memory_space<vmem>>, %arg2: memref<144x16xbf16, #tpu.memory_space<vmem>>, %arg3: memref<1x16xf32, #tpu.memory_space<vmem>>, %arg4: memref<32x16xf32, #tpu.memory_space<vmem>>) attributes {dimension_semantics = [#tpu.dimension_semantics<parallel>], iteration_bounds = array<i64: 1>, scalar_prefetch = 0 : i64, scratch_operands = 0 : i64, tpu.core_type = #tpu.core_type<tc>, window_params = [{transform_indices = @transform_0, window_bounds = array<i64: 32, 144>}, {pipeline_mode = #tpu.pipeline_mode<synchronous>, transform_indices = @transform_1, window_bounds = array<i64: 144, 16>}, {pipeline_mode = #tpu.pipeline_mode<synchronous>, transform_indices = @transform_2, window_bounds = array<i64: 1, 16>}, {transform_indices = @transform_3, window_bounds = array<i64: 32, 16>}]} {
    %c0 = arith.constant 0 : index
    %c0_0 = arith.constant 0 : index
    %0 = vector.load %arg1[%c0, %c0_0] : memref<32x144xbf16, #tpu.memory_space<vmem>>, vector<32x144xbf16>
    %c0_1 = arith.constant 0 : index
    %c0_2 = arith.constant 0 : index
    %1 = vector.load %arg2[%c0_1, %c0_2] : memref<144x16xbf16, #tpu.memory_space<vmem>>, vector<144x16xbf16>
    %cst = arith.constant dense<0.000000e+00> : vector<32x16xf32>
    %2 = tpu.matmul %0, %1, %cst {dimension_numbers = #tpu.dot_dimension_numbers<[1], [0], [0], [1], [0, 0, 1, 1], [], []>} : vector<32x144xbf16>, vector<144x16xbf16>, vector<32x16xf32> -> vector<32x16xf32>
    %c0_3 = arith.constant 0 : index
    %c0_4 = arith.constant 0 : index
    %3 = vector.load %arg3[%c0_3, %c0_4] : memref<1x16xf32, #tpu.memory_space<vmem>>, vector<1x16xf32>
    %4 = vector.broadcast %3 : vector<1x16xf32> to vector<32x16xf32>
    %5 = arith.addf %2, %4 : vector<32x16xf32>
    %c0_5 = arith.constant 0 : index
    %c0_6 = arith.constant 0 : index
    %6 = vector.load %arg4[%c0_5, %c0_6] : memref<32x16xf32, #tpu.memory_space<vmem>>, vector<32x16xf32>
    tpu.vector_store %arg4[%c0_5, %c0_6], %5 {strides = array<i32>} : memref<32x16xf32, #tpu.memory_space<vmem>>, vector<32x16xf32>,
    return
  }
  func.func @transform_0(%arg0: i32) -> (i32, i32) {
    %c0_i32 = arith.constant 0 : i32
    %c0_i32_0 = arith.constant 0 : i32
    return %arg0, %c0_i32 : i32, i32
  }
  func.func @transform_1(%arg0: i32) -> (i32, i32) {
    %c0_i32 = arith.constant 0 : i32
    %c0_i32_0 = arith.constant 0 : i32
    %c0_i32_1 = arith.constant 0 : i32
    return %c0_i32, %c0_i32_0 : i32, i32
  }
  func.func @transform_2(%arg0: i32) -> (i32, i32) {
    %c0_i32 = arith.constant 0 : i32
    %c0_i32_0 = arith.constant 0 : i32
    %c0_i32_1 = arith.constant 0 : i32
    return %c0_i32, %c0_i32_0 : i32, i32
  }
  func.func @transform_3(%arg0: i32) -> (i32, i32) {
    %c0_i32 = arith.constant 0 : i32
    %c0_i32_0 = arith.constant 0 : i32
    return %arg0, %c0_i32 : i32, i32
  }
}

module attributes {stable_mosaic.version = 11 : i64} {
  func.func @_mm_add_kernel(%arg0: i32, %arg1: memref<32x8xbf16, #tpu.memory_space<vmem>>, %arg2: memref<8x16xbf16, #tpu.memory_space<vmem>>, %arg3: memref<1x16xf32, #tpu.memory_space<vmem>>, %arg4: memref<32x16xf32, #tpu.memory_space<vmem>>, %arg5: memref<32x16xf32, #tpu.memory_space<vmem>>) attributes {dimension_semantics = [#tpu.dimension_semantics<parallel>], iteration_bounds = array<i64: 1>, scalar_prefetch = 0 : i64, scratch_operands = 0 : i64, tpu.core_type = #tpu.core_type<tc>, window_params = [{transform_indices = @transform_0, window_bounds = array<i64: 32, 8>}, {pipeline_mode = #tpu.pipeline_mode<synchronous>, transform_indices = @transform_1, window_bounds = array<i64: 8, 16>}, {pipeline_mode = #tpu.pipeline_mode<synchronous>, transform_indices = @transform_2, window_bounds = array<i64: 1, 16>}, {transform_indices = @transform_3, window_bounds = array<i64: 32, 16>}, {transform_indices = @transform_4, window_bounds = array<i64: 32, 16>}]} {
    %c0 = arith.constant 0 : index
    %c0_0 = arith.constant 0 : index
    %0 = vector.load %arg1[%c0, %c0_0] : memref<32x8xbf16, #tpu.memory_space<vmem>>, vector<32x8xbf16>
    %c0_1 = arith.constant 0 : index
    %c0_2 = arith.constant 0 : index
    %1 = vector.load %arg2[%c0_1, %c0_2] : memref<8x16xbf16, #tpu.memory_space<vmem>>, vector<8x16xbf16>
    %cst = arith.constant dense<0.000000e+00> : vector<32x16xf32>
    %2 = tpu.matmul %0, %1, %cst {dimension_numbers = #tpu.dot_dimension_numbers<[1], [0], [0], [1], [0, 0, 1, 1], [], []>} : vector<32x8xbf16>, vector<8x16xbf16>, vector<32x16xf32> -> vector<32x16xf32>
    %c0_3 = arith.constant 0 : index
    %c0_4 = arith.constant 0 : index
    %3 = vector.load %arg3[%c0_3, %c0_4] : memref<1x16xf32, #tpu.memory_space<vmem>>, vector<1x16xf32>
    %4 = vector.broadcast %3 : vector<1x16xf32> to vector<32x16xf32>
    %5 = arith.addf %2, %4 : vector<32x16xf32>
    %c0_5 = arith.constant 0 : index
    %c0_6 = arith.constant 0 : index
    %6 = vector.load %arg4[%c0_5, %c0_6] : memref<32x16xf32, #tpu.memory_space<vmem>>, vector<32x16xf32>
    %7 = arith.addf %5, %6 : vector<32x16xf32>
    %cst_7 = arith.constant 0.000000e+00 : f32
    %8 = vector.broadcast %cst_7 : f32 to vector<32x16xf32>
    %9 = arith.maximumf %7, %8 : vector<32x16xf32>
    %c0_8 = arith.constant 0 : index
    %c0_9 = arith.constant 0 : index
    %10 = vector.load %arg5[%c0_8, %c0_9] : memref<32x16xf32, #tpu.memory_space<vmem>>, vector<32x16xf32>
    tpu.vector_store %arg5[%c0_8, %c0_9], %9 {strides = array<i32>} : memref<32x16xf32, #tpu.memory_space<vmem>>, vector<32x16xf32>,
    return
  }
  func.func @transform_0(%arg0: i32) -> (i32, i32) {
    %c0_i32 = arith.constant 0 : i32
    %c0_i32_0 = arith.constant 0 : i32
    return %arg0, %c0_i32 : i32, i32
  }
  func.func @transform_1(%arg0: i32) -> (i32, i32) {
    %c0_i32 = arith.constant 0 : i32
    %c0_i32_0 = arith.constant 0 : i32
    %c0_i32_1 = arith.constant 0 : i32
    return %c0_i32, %c0_i32_0 : i32, i32
  }
  func.func @transform_2(%arg0: i32) -> (i32, i32) {
    %c0_i32 = arith.constant 0 : i32
    %c0_i32_0 = arith.constant 0 : i32
    %c0_i32_1 = arith.constant 0 : i32
    return %c0_i32, %c0_i32_0 : i32, i32
  }
  func.func @transform_3(%arg0: i32) -> (i32, i32) {
    %c0_i32 = arith.constant 0 : i32
    %c0_i32_0 = arith.constant 0 : i32
    return %arg0, %c0_i32 : i32, i32
  }
  func.func @transform_4(%arg0: i32) -> (i32, i32) {
    %c0_i32 = arith.constant 0 : i32
    %c0_i32_0 = arith.constant 0 : i32
    return %arg0, %c0_i32 : i32, i32
  }
}

module attributes {stable_mosaic.version = 11 : i64} {
  func.func @_mm_kernel(%arg0: i32, %arg1: memref<8x256xbf16, #tpu.memory_space<vmem>>, %arg2: memref<256x16xbf16, #tpu.memory_space<vmem>>, %arg3: memref<1x16xf32, #tpu.memory_space<vmem>>, %arg4: memref<8x16xf32, #tpu.memory_space<vmem>>) attributes {dimension_semantics = [#tpu.dimension_semantics<parallel>], iteration_bounds = array<i64: 1>, scalar_prefetch = 0 : i64, scratch_operands = 0 : i64, tpu.core_type = #tpu.core_type<tc>, window_params = [{transform_indices = @transform_0, window_bounds = array<i64: 8, 256>}, {pipeline_mode = #tpu.pipeline_mode<synchronous>, transform_indices = @transform_1, window_bounds = array<i64: 256, 16>}, {pipeline_mode = #tpu.pipeline_mode<synchronous>, transform_indices = @transform_2, window_bounds = array<i64: 1, 16>}, {transform_indices = @transform_3, window_bounds = array<i64: 8, 16>}]} {
    %c0 = arith.constant 0 : index
    %c0_0 = arith.constant 0 : index
    %0 = vector.load %arg1[%c0, %c0_0] : memref<8x256xbf16, #tpu.memory_space<vmem>>, vector<8x256xbf16>
    %c0_1 = arith.constant 0 : index
    %c0_2 = arith.constant 0 : index
    %1 = vector.load %arg2[%c0_1, %c0_2] : memref<256x16xbf16, #tpu.memory_space<vmem>>, vector<256x16xbf16>
    %cst = arith.constant dense<0.000000e+00> : vector<8x16xf32>
    %2 = tpu.matmul %0, %1, %cst {dimension_numbers = #tpu.dot_dimension_numbers<[1], [0], [0], [1], [0, 0, 1, 1], [], []>} : vector<8x256xbf16>, vector<256x16xbf16>, vector<8x16xf32> -> vector<8x16xf32>
    %c0_3 = arith.constant 0 : index
    %c0_4 = arith.constant 0 : index
    %3 = vector.load %arg3[%c0_3, %c0_4] : memref<1x16xf32, #tpu.memory_space<vmem>>, vector<1x16xf32>
    %4 = vector.broadcast %3 : vector<1x16xf32> to vector<8x16xf32>
    %5 = arith.addf %2, %4 : vector<8x16xf32>
    %c0_5 = arith.constant 0 : index
    %c0_6 = arith.constant 0 : index
    %6 = vector.load %arg4[%c0_5, %c0_6] : memref<8x16xf32, #tpu.memory_space<vmem>>, vector<8x16xf32>
    tpu.vector_store %arg4[%c0_5, %c0_6], %5 {strides = array<i32>} : memref<8x16xf32, #tpu.memory_space<vmem>>, vector<8x16xf32>,
    return
  }
  func.func @transform_0(%arg0: i32) -> (i32, i32) {
    %c0_i32 = arith.constant 0 : i32
    %c0_i32_0 = arith.constant 0 : i32
    return %arg0, %c0_i32 : i32, i32
  }
  func.func @transform_1(%arg0: i32) -> (i32, i32) {
    %c0_i32 = arith.constant 0 : i32
    %c0_i32_0 = arith.constant 0 : i32
    %c0_i32_1 = arith.constant 0 : i32
    return %c0_i32, %c0_i32_0 : i32, i32
  }
  func.func @transform_2(%arg0: i32) -> (i32, i32) {
    %c0_i32 = arith.constant 0 : i32
    %c0_i32_0 = arith.constant 0 : i32
    %c0_i32_1 = arith.constant 0 : i32
    return %c0_i32, %c0_i32_0 : i32, i32
  }
  func.func @transform_3(%arg0: i32) -> (i32, i32) {
    %c0_i32 = arith.constant 0 : i32
    %c0_i32_0 = arith.constant 0 : i32
    return %arg0, %c0_i32 : i32, i32
  }
}

module attributes {stable_mosaic.version = 11 : i64} {
  func.func @_mm_kernel(%arg0: i32, %arg1: memref<8x144xbf16, #tpu.memory_space<vmem>>, %arg2: memref<144x16xbf16, #tpu.memory_space<vmem>>, %arg3: memref<1x16xf32, #tpu.memory_space<vmem>>, %arg4: memref<8x16xf32, #tpu.memory_space<vmem>>) attributes {dimension_semantics = [#tpu.dimension_semantics<parallel>], iteration_bounds = array<i64: 1>, scalar_prefetch = 0 : i64, scratch_operands = 0 : i64, tpu.core_type = #tpu.core_type<tc>, window_params = [{transform_indices = @transform_0, window_bounds = array<i64: 8, 144>}, {pipeline_mode = #tpu.pipeline_mode<synchronous>, transform_indices = @transform_1, window_bounds = array<i64: 144, 16>}, {pipeline_mode = #tpu.pipeline_mode<synchronous>, transform_indices = @transform_2, window_bounds = array<i64: 1, 16>}, {transform_indices = @transform_3, window_bounds = array<i64: 8, 16>}]} {
    %c0 = arith.constant 0 : index
    %c0_0 = arith.constant 0 : index
    %0 = vector.load %arg1[%c0, %c0_0] : memref<8x144xbf16, #tpu.memory_space<vmem>>, vector<8x144xbf16>
    %c0_1 = arith.constant 0 : index
    %c0_2 = arith.constant 0 : index
    %1 = vector.load %arg2[%c0_1, %c0_2] : memref<144x16xbf16, #tpu.memory_space<vmem>>, vector<144x16xbf16>
    %cst = arith.constant dense<0.000000e+00> : vector<8x16xf32>
    %2 = tpu.matmul %0, %1, %cst {dimension_numbers = #tpu.dot_dimension_numbers<[1], [0], [0], [1], [0, 0, 1, 1], [], []>} : vector<8x144xbf16>, vector<144x16xbf16>, vector<8x16xf32> -> vector<8x16xf32>
    %c0_3 = arith.constant 0 : index
    %c0_4 = arith.constant 0 : index
    %3 = vector.load %arg3[%c0_3, %c0_4] : memref<1x16xf32, #tpu.memory_space<vmem>>, vector<1x16xf32>
    %4 = vector.broadcast %3 : vector<1x16xf32> to vector<8x16xf32>
    %5 = arith.addf %2, %4 : vector<8x16xf32>
    %c0_5 = arith.constant 0 : index
    %c0_6 = arith.constant 0 : index
    %6 = vector.load %arg4[%c0_5, %c0_6] : memref<8x16xf32, #tpu.memory_space<vmem>>, vector<8x16xf32>
    tpu.vector_store %arg4[%c0_5, %c0_6], %5 {strides = array<i32>} : memref<8x16xf32, #tpu.memory_space<vmem>>, vector<8x16xf32>,
    return
  }
  func.func @transform_0(%arg0: i32) -> (i32, i32) {
    %c0_i32 = arith.constant 0 : i32
    %c0_i32_0 = arith.constant 0 : i32
    return %arg0, %c0_i32 : i32, i32
  }
  func.func @transform_1(%arg0: i32) -> (i32, i32) {
    %c0_i32 = arith.constant 0 : i32
    %c0_i32_0 = arith.constant 0 : i32
    %c0_i32_1 = arith.constant 0 : i32
    return %c0_i32, %c0_i32_0 : i32, i32
  }
  func.func @transform_2(%arg0: i32) -> (i32, i32) {
    %c0_i32 = arith.constant 0 : i32
    %c0_i32_0 = arith.constant 0 : i32
    %c0_i32_1 = arith.constant 0 : i32
    return %c0_i32, %c0_i32_0 : i32, i32
  }
  func.func @transform_3(%arg0: i32) -> (i32, i32) {
    %c0_i32 = arith.constant 0 : i32
    %c0_i32_0 = arith.constant 0 : i32
    return %arg0, %c0_i32 : i32, i32
  }
}

module attributes {stable_mosaic.version = 11 : i64} {
  func.func @_mm_add_kernel(%arg0: i32, %arg1: memref<8x16xbf16, #tpu.memory_space<vmem>>, %arg2: memref<16x16xbf16, #tpu.memory_space<vmem>>, %arg3: memref<1x16xf32, #tpu.memory_space<vmem>>, %arg4: memref<8x16xf32, #tpu.memory_space<vmem>>, %arg5: memref<8x16xf32, #tpu.memory_space<vmem>>) attributes {dimension_semantics = [#tpu.dimension_semantics<parallel>], iteration_bounds = array<i64: 1>, scalar_prefetch = 0 : i64, scratch_operands = 0 : i64, tpu.core_type = #tpu.core_type<tc>, window_params = [{transform_indices = @transform_0, window_bounds = array<i64: 8, 16>}, {pipeline_mode = #tpu.pipeline_mode<synchronous>, transform_indices = @transform_1, window_bounds = array<i64: 16, 16>}, {pipeline_mode = #tpu.pipeline_mode<synchronous>, transform_indices = @transform_2, window_bounds = array<i64: 1, 16>}, {transform_indices = @transform_3, window_bounds = array<i64: 8, 16>}, {transform_indices = @transform_4, window_bounds = array<i64: 8, 16>}]} {
    %c0 = arith.constant 0 : index
    %c0_0 = arith.constant 0 : index
    %0 = vector.load %arg1[%c0, %c0_0] : memref<8x16xbf16, #tpu.memory_space<vmem>>, vector<8x16xbf16>
    %c0_1 = arith.constant 0 : index
    %c0_2 = arith.constant 0 : index
    %1 = vector.load %arg2[%c0_1, %c0_2] : memref<16x16xbf16, #tpu.memory_space<vmem>>, vector<16x16xbf16>
    %cst = arith.constant dense<0.000000e+00> : vector<8x16xf32>
    %2 = tpu.matmul %0, %1, %cst {dimension_numbers = #tpu.dot_dimension_numbers<[1], [0], [0], [1], [0, 0, 1, 1], [], []>} : vector<8x16xbf16>, vector<16x16xbf16>, vector<8x16xf32> -> vector<8x16xf32>
    %c0_3 = arith.constant 0 : index
    %c0_4 = arith.constant 0 : index
    %3 = vector.load %arg3[%c0_3, %c0_4] : memref<1x16xf32, #tpu.memory_space<vmem>>, vector<1x16xf32>
    %4 = vector.broadcast %3 : vector<1x16xf32> to vector<8x16xf32>
    %5 = arith.addf %2, %4 : vector<8x16xf32>
    %c0_5 = arith.constant 0 : index
    %c0_6 = arith.constant 0 : index
    %6 = vector.load %arg4[%c0_5, %c0_6] : memref<8x16xf32, #tpu.memory_space<vmem>>, vector<8x16xf32>
    %7 = arith.addf %5, %6 : vector<8x16xf32>
    %cst_7 = arith.constant 0.000000e+00 : f32
    %8 = vector.broadcast %cst_7 : f32 to vector<8x16xf32>
    %9 = arith.maximumf %7, %8 : vector<8x16xf32>
    %c0_8 = arith.constant 0 : index
    %c0_9 = arith.constant 0 : index
    %10 = vector.load %arg5[%c0_8, %c0_9] : memref<8x16xf32, #tpu.memory_space<vmem>>, vector<8x16xf32>
    tpu.vector_store %arg5[%c0_8, %c0_9], %9 {strides = array<i32>} : memref<8x16xf32, #tpu.memory_space<vmem>>, vector<8x16xf32>,
    return
  }
  func.func @transform_0(%arg0: i32) -> (i32, i32) {
    %c0_i32 = arith.constant 0 : i32
    %c0_i32_0 = arith.constant 0 : i32
    return %arg0, %c0_i32 : i32, i32
  }
  func.func @transform_1(%arg0: i32) -> (i32, i32) {
    %c0_i32 = arith.constant 0 : i32
    %c0_i32_0 = arith.constant 0 : i32
    %c0_i32_1 = arith.constant 0 : i32
    return %c0_i32, %c0_i32_0 : i32, i32
  }
  func.func @transform_2(%arg0: i32) -> (i32, i32) {
    %c0_i32 = arith.constant 0 : i32
    %c0_i32_0 = arith.constant 0 : i32
    %c0_i32_1 = arith.constant 0 : i32
    return %c0_i32, %c0_i32_0 : i32, i32
  }
  func.func @transform_3(%arg0: i32) -> (i32, i32) {
    %c0_i32 = arith.constant 0 : i32
    %c0_i32_0 = arith.constant 0 : i32
    return %arg0, %c0_i32 : i32, i32
  }
  func.func @transform_4(%arg0: i32) -> (i32, i32) {
    %c0_i32 = arith.constant 0 : i32
    %c0_i32_0 = arith.constant 0 : i32
    return %arg0, %c0_i32 : i32, i32
  }
}

module attributes {stable_mosaic.version = 11 : i64} {
  func.func @_mm_kernel(%arg0: i32, %arg1: memref<8x144xbf16, #tpu.memory_space<vmem>>, %arg2: memref<144x64xbf16, #tpu.memory_space<vmem>>, %arg3: memref<1x64xf32, #tpu.memory_space<vmem>>, %arg4: memref<8x64xf32, #tpu.memory_space<vmem>>) attributes {dimension_semantics = [#tpu.dimension_semantics<parallel>], iteration_bounds = array<i64: 1>, scalar_prefetch = 0 : i64, scratch_operands = 0 : i64, tpu.core_type = #tpu.core_type<tc>, window_params = [{transform_indices = @transform_0, window_bounds = array<i64: 8, 144>}, {pipeline_mode = #tpu.pipeline_mode<synchronous>, transform_indices = @transform_1, window_bounds = array<i64: 144, 64>}, {pipeline_mode = #tpu.pipeline_mode<synchronous>, transform_indices = @transform_2, window_bounds = array<i64: 1, 64>}, {transform_indices = @transform_3, window_bounds = array<i64: 8, 64>}]} {
    %c0 = arith.constant 0 : index
    %c0_0 = arith.constant 0 : index
    %0 = vector.load %arg1[%c0, %c0_0] : memref<8x144xbf16, #tpu.memory_space<vmem>>, vector<8x144xbf16>
    %c0_1 = arith.constant 0 : index
    %c0_2 = arith.constant 0 : index
    %1 = vector.load %arg2[%c0_1, %c0_2] : memref<144x64xbf16, #tpu.memory_space<vmem>>, vector<144x64xbf16>
    %cst = arith.constant dense<0.000000e+00> : vector<8x64xf32>
    %2 = tpu.matmul %0, %1, %cst {dimension_numbers = #tpu.dot_dimension_numbers<[1], [0], [0], [1], [0, 0, 1, 1], [], []>} : vector<8x144xbf16>, vector<144x64xbf16>, vector<8x64xf32> -> vector<8x64xf32>
    %c0_3 = arith.constant 0 : index
    %c0_4 = arith.constant 0 : index
    %3 = vector.load %arg3[%c0_3, %c0_4] : memref<1x64xf32, #tpu.memory_space<vmem>>, vector<1x64xf32>
    %4 = vector.broadcast %3 : vector<1x64xf32> to vector<8x64xf32>
    %5 = arith.addf %2, %4 : vector<8x64xf32>
    %c0_5 = arith.constant 0 : index
    %c0_6 = arith.constant 0 : index
    %6 = vector.load %arg4[%c0_5, %c0_6] : memref<8x64xf32, #tpu.memory_space<vmem>>, vector<8x64xf32>
    tpu.vector_store %arg4[%c0_5, %c0_6], %5 {strides = array<i32>} : memref<8x64xf32, #tpu.memory_space<vmem>>, vector<8x64xf32>,
    return
  }
  func.func @transform_0(%arg0: i32) -> (i32, i32) {
    %c0_i32 = arith.constant 0 : i32
    %c0_i32_0 = arith.constant 0 : i32
    return %arg0, %c0_i32 : i32, i32
  }
  func.func @transform_1(%arg0: i32) -> (i32, i32) {
    %c0_i32 = arith.constant 0 : i32
    %c0_i32_0 = arith.constant 0 : i32
    %c0_i32_1 = arith.constant 0 : i32
    return %c0_i32, %c0_i32_0 : i32, i32
  }
  func.func @transform_2(%arg0: i32) -> (i32, i32) {
    %c0_i32 = arith.constant 0 : i32
    %c0_i32_0 = arith.constant 0 : i32
    %c0_i32_1 = arith.constant 0 : i32
    return %c0_i32, %c0_i32_0 : i32, i32
  }
  func.func @transform_3(%arg0: i32) -> (i32, i32) {
    %c0_i32 = arith.constant 0 : i32
    %c0_i32_0 = arith.constant 0 : i32
    return %arg0, %c0_i32 : i32, i32
  }
}

module attributes {stable_mosaic.version = 11 : i64} {
  func.func @_mm_add_kernel(%arg0: i32, %arg1: memref<8x16xbf16, #tpu.memory_space<vmem>>, %arg2: memref<16x64xbf16, #tpu.memory_space<vmem>>, %arg3: memref<1x64xf32, #tpu.memory_space<vmem>>, %arg4: memref<8x64xf32, #tpu.memory_space<vmem>>, %arg5: memref<8x64xf32, #tpu.memory_space<vmem>>) attributes {dimension_semantics = [#tpu.dimension_semantics<parallel>], iteration_bounds = array<i64: 1>, scalar_prefetch = 0 : i64, scratch_operands = 0 : i64, tpu.core_type = #tpu.core_type<tc>, window_params = [{transform_indices = @transform_0, window_bounds = array<i64: 8, 16>}, {pipeline_mode = #tpu.pipeline_mode<synchronous>, transform_indices = @transform_1, window_bounds = array<i64: 16, 64>}, {pipeline_mode = #tpu.pipeline_mode<synchronous>, transform_indices = @transform_2, window_bounds = array<i64: 1, 64>}, {transform_indices = @transform_3, window_bounds = array<i64: 8, 64>}, {transform_indices = @transform_4, window_bounds = array<i64: 8, 64>}]} {
    %c0 = arith.constant 0 : index
    %c0_0 = arith.constant 0 : index
    %0 = vector.load %arg1[%c0, %c0_0] : memref<8x16xbf16, #tpu.memory_space<vmem>>, vector<8x16xbf16>
    %c0_1 = arith.constant 0 : index
    %c0_2 = arith.constant 0 : index
    %1 = vector.load %arg2[%c0_1, %c0_2] : memref<16x64xbf16, #tpu.memory_space<vmem>>, vector<16x64xbf16>
    %cst = arith.constant dense<0.000000e+00> : vector<8x64xf32>
    %2 = tpu.matmul %0, %1, %cst {dimension_numbers = #tpu.dot_dimension_numbers<[1], [0], [0], [1], [0, 0, 1, 1], [], []>} : vector<8x16xbf16>, vector<16x64xbf16>, vector<8x64xf32> -> vector<8x64xf32>
    %c0_3 = arith.constant 0 : index
    %c0_4 = arith.constant 0 : index
    %3 = vector.load %arg3[%c0_3, %c0_4] : memref<1x64xf32, #tpu.memory_space<vmem>>, vector<1x64xf32>
    %4 = vector.broadcast %3 : vector<1x64xf32> to vector<8x64xf32>
    %5 = arith.addf %2, %4 : vector<8x64xf32>
    %c0_5 = arith.constant 0 : index
    %c0_6 = arith.constant 0 : index
    %6 = vector.load %arg4[%c0_5, %c0_6] : memref<8x64xf32, #tpu.memory_space<vmem>>, vector<8x64xf32>
    %7 = arith.addf %5, %6 : vector<8x64xf32>
    %cst_7 = arith.constant 0.000000e+00 : f32
    %8 = vector.broadcast %cst_7 : f32 to vector<8x64xf32>
    %9 = arith.maximumf %7, %8 : vector<8x64xf32>
    %c0_8 = arith.constant 0 : index
    %c0_9 = arith.constant 0 : index
    %10 = vector.load %arg5[%c0_8, %c0_9] : memref<8x64xf32, #tpu.memory_space<vmem>>, vector<8x64xf32>
    tpu.vector_store %arg5[%c0_8, %c0_9], %9 {strides = array<i32>} : memref<8x64xf32, #tpu.memory_space<vmem>>, vector<8x64xf32>,
    return
  }
  func.func @transform_0(%arg0: i32) -> (i32, i32) {
    %c0_i32 = arith.constant 0 : i32
    %c0_i32_0 = arith.constant 0 : i32
    return %arg0, %c0_i32 : i32, i32
  }
  func.func @transform_1(%arg0: i32) -> (i32, i32) {
    %c0_i32 = arith.constant 0 : i32
    %c0_i32_0 = arith.constant 0 : i32
    %c0_i32_1 = arith.constant 0 : i32
    return %c0_i32, %c0_i32_0 : i32, i32
  }
  func.func @transform_2(%arg0: i32) -> (i32, i32) {
    %c0_i32 = arith.constant 0 : i32
    %c0_i32_0 = arith.constant 0 : i32
    %c0_i32_1 = arith.constant 0 : i32
    return %c0_i32, %c0_i32_0 : i32, i32
  }
  func.func @transform_3(%arg0: i32) -> (i32, i32) {
    %c0_i32 = arith.constant 0 : i32
    %c0_i32_0 = arith.constant 0 : i32
    return %arg0, %c0_i32 : i32, i32
  }
  func.func @transform_4(%arg0: i32) -> (i32, i32) {
    %c0_i32 = arith.constant 0 : i32
    %c0_i32_0 = arith.constant 0 : i32
    return %arg0, %c0_i32 : i32, i32
  }
}

module attributes {stable_mosaic.version = 11 : i64} {
  func.func @_mm_kernel(%arg0: i32, %arg1: memref<32x32xbf16, #tpu.memory_space<vmem>>, %arg2: memref<32x16xbf16, #tpu.memory_space<vmem>>, %arg3: memref<1x16xf32, #tpu.memory_space<vmem>>, %arg4: memref<32x16xf32, #tpu.memory_space<vmem>>) attributes {dimension_semantics = [#tpu.dimension_semantics<parallel>], iteration_bounds = array<i64: 1>, scalar_prefetch = 0 : i64, scratch_operands = 0 : i64, tpu.core_type = #tpu.core_type<tc>, window_params = [{transform_indices = @transform_0, window_bounds = array<i64: 32, 32>}, {pipeline_mode = #tpu.pipeline_mode<synchronous>, transform_indices = @transform_1, window_bounds = array<i64: 32, 16>}, {pipeline_mode = #tpu.pipeline_mode<synchronous>, transform_indices = @transform_2, window_bounds = array<i64: 1, 16>}, {transform_indices = @transform_3, window_bounds = array<i64: 32, 16>}]} {
    %c0 = arith.constant 0 : index
    %c0_0 = arith.constant 0 : index
    %0 = vector.load %arg1[%c0, %c0_0] : memref<32x32xbf16, #tpu.memory_space<vmem>>, vector<32x32xbf16>
    %c0_1 = arith.constant 0 : index
    %c0_2 = arith.constant 0 : index
    %1 = vector.load %arg2[%c0_1, %c0_2] : memref<32x16xbf16, #tpu.memory_space<vmem>>, vector<32x16xbf16>
    %cst = arith.constant dense<0.000000e+00> : vector<32x16xf32>
    %2 = tpu.matmul %0, %1, %cst {dimension_numbers = #tpu.dot_dimension_numbers<[1], [0], [0], [1], [0, 0, 1, 1], [], []>} : vector<32x32xbf16>, vector<32x16xbf16>, vector<32x16xf32> -> vector<32x16xf32>
    %c0_3 = arith.constant 0 : index
    %c0_4 = arith.constant 0 : index
    %3 = vector.load %arg3[%c0_3, %c0_4] : memref<1x16xf32, #tpu.memory_space<vmem>>, vector<1x16xf32>
    %4 = vector.broadcast %3 : vector<1x16xf32> to vector<32x16xf32>
    %5 = arith.addf %2, %4 : vector<32x16xf32>
    %c0_5 = arith.constant 0 : index
    %c0_6 = arith.constant 0 : index
    %6 = vector.load %arg4[%c0_5, %c0_6] : memref<32x16xf32, #tpu.memory_space<vmem>>, vector<32x16xf32>
    tpu.vector_store %arg4[%c0_5, %c0_6], %5 {strides = array<i32>} : memref<32x16xf32, #tpu.memory_space<vmem>>, vector<32x16xf32>,
    return
  }
  func.func @transform_0(%arg0: i32) -> (i32, i32) {
    %c0_i32 = arith.constant 0 : i32
    %c0_i32_0 = arith.constant 0 : i32
    return %arg0, %c0_i32 : i32, i32
  }
  func.func @transform_1(%arg0: i32) -> (i32, i32) {
    %c0_i32 = arith.constant 0 : i32
    %c0_i32_0 = arith.constant 0 : i32
    %c0_i32_1 = arith.constant 0 : i32
    return %c0_i32, %c0_i32_0 : i32, i32
  }
  func.func @transform_2(%arg0: i32) -> (i32, i32) {
    %c0_i32 = arith.constant 0 : i32
    %c0_i32_0 = arith.constant 0 : i32
    %c0_i32_1 = arith.constant 0 : i32
    return %c0_i32, %c0_i32_0 : i32, i32
  }
  func.func @transform_3(%arg0: i32) -> (i32, i32) {
    %c0_i32 = arith.constant 0 : i32
    %c0_i32_0 = arith.constant 0 : i32
    return %arg0, %c0_i32 : i32, i32
  }
}

module attributes {stable_mosaic.version = 11 : i64} {
  func.func @_mm_kernel(%arg0: i32, %arg1: memref<32x144xbf16, #tpu.memory_space<vmem>>, %arg2: memref<144x32xbf16, #tpu.memory_space<vmem>>, %arg3: memref<1x32xf32, #tpu.memory_space<vmem>>, %arg4: memref<32x32xf32, #tpu.memory_space<vmem>>) attributes {dimension_semantics = [#tpu.dimension_semantics<parallel>], iteration_bounds = array<i64: 1>, scalar_prefetch = 0 : i64, scratch_operands = 0 : i64, tpu.core_type = #tpu.core_type<tc>, window_params = [{transform_indices = @transform_0, window_bounds = array<i64: 32, 144>}, {pipeline_mode = #tpu.pipeline_mode<synchronous>, transform_indices = @transform_1, window_bounds = array<i64: 144, 32>}, {pipeline_mode = #tpu.pipeline_mode<synchronous>, transform_indices = @transform_2, window_bounds = array<i64: 1, 32>}, {transform_indices = @transform_3, window_bounds = array<i64: 32, 32>}]} {
    %c0 = arith.constant 0 : index
    %c0_0 = arith.constant 0 : index
    %0 = vector.load %arg1[%c0, %c0_0] : memref<32x144xbf16, #tpu.memory_space<vmem>>, vector<32x144xbf16>
    %c0_1 = arith.constant 0 : index
    %c0_2 = arith.constant 0 : index
    %1 = vector.load %arg2[%c0_1, %c0_2] : memref<144x32xbf16, #tpu.memory_space<vmem>>, vector<144x32xbf16>
    %cst = arith.constant dense<0.000000e+00> : vector<32x32xf32>
    %2 = tpu.matmul %0, %1, %cst {dimension_numbers = #tpu.dot_dimension_numbers<[1], [0], [0], [1], [0, 0, 1, 1], [], []>} : vector<32x144xbf16>, vector<144x32xbf16>, vector<32x32xf32> -> vector<32x32xf32>
    %c0_3 = arith.constant 0 : index
    %c0_4 = arith.constant 0 : index
    %3 = vector.load %arg3[%c0_3, %c0_4] : memref<1x32xf32, #tpu.memory_space<vmem>>, vector<1x32xf32>
    %4 = vector.broadcast %3 : vector<1x32xf32> to vector<32x32xf32>
    %5 = arith.addf %2, %4 : vector<32x32xf32>
    %c0_5 = arith.constant 0 : index
    %c0_6 = arith.constant 0 : index
    %6 = vector.load %arg4[%c0_5, %c0_6] : memref<32x32xf32, #tpu.memory_space<vmem>>, vector<32x32xf32>
    tpu.vector_store %arg4[%c0_5, %c0_6], %5 {strides = array<i32>} : memref<32x32xf32, #tpu.memory_space<vmem>>, vector<32x32xf32>,
    return
  }
  func.func @transform_0(%arg0: i32) -> (i32, i32) {
    %c0_i32 = arith.constant 0 : i32
    %c0_i32_0 = arith.constant 0 : i32
    return %arg0, %c0_i32 : i32, i32
  }
  func.func @transform_1(%arg0: i32) -> (i32, i32) {
    %c0_i32 = arith.constant 0 : i32
    %c0_i32_0 = arith.constant 0 : i32
    %c0_i32_1 = arith.constant 0 : i32
    return %c0_i32, %c0_i32_0 : i32, i32
  }
  func.func @transform_2(%arg0: i32) -> (i32, i32) {
    %c0_i32 = arith.constant 0 : i32
    %c0_i32_0 = arith.constant 0 : i32
    %c0_i32_1 = arith.constant 0 : i32
    return %c0_i32, %c0_i32_0 : i32, i32
  }
  func.func @transform_3(%arg0: i32) -> (i32, i32) {
    %c0_i32 = arith.constant 0 : i32
    %c0_i32_0 = arith.constant 0 : i32
    return %arg0, %c0_i32 : i32, i32
  }
}

module attributes {stable_mosaic.version = 11 : i64} {
  func.func @_mm_add_kernel(%arg0: i32, %arg1: memref<32x16xbf16, #tpu.memory_space<vmem>>, %arg2: memref<16x32xbf16, #tpu.memory_space<vmem>>, %arg3: memref<1x32xf32, #tpu.memory_space<vmem>>, %arg4: memref<32x32xf32, #tpu.memory_space<vmem>>, %arg5: memref<32x32xf32, #tpu.memory_space<vmem>>) attributes {dimension_semantics = [#tpu.dimension_semantics<parallel>], iteration_bounds = array<i64: 1>, scalar_prefetch = 0 : i64, scratch_operands = 0 : i64, tpu.core_type = #tpu.core_type<tc>, window_params = [{transform_indices = @transform_0, window_bounds = array<i64: 32, 16>}, {pipeline_mode = #tpu.pipeline_mode<synchronous>, transform_indices = @transform_1, window_bounds = array<i64: 16, 32>}, {pipeline_mode = #tpu.pipeline_mode<synchronous>, transform_indices = @transform_2, window_bounds = array<i64: 1, 32>}, {transform_indices = @transform_3, window_bounds = array<i64: 32, 32>}, {transform_indices = @transform_4, window_bounds = array<i64: 32, 32>}]} {
    %c0 = arith.constant 0 : index
    %c0_0 = arith.constant 0 : index
    %0 = vector.load %arg1[%c0, %c0_0] : memref<32x16xbf16, #tpu.memory_space<vmem>>, vector<32x16xbf16>
    %c0_1 = arith.constant 0 : index
    %c0_2 = arith.constant 0 : index
    %1 = vector.load %arg2[%c0_1, %c0_2] : memref<16x32xbf16, #tpu.memory_space<vmem>>, vector<16x32xbf16>
    %cst = arith.constant dense<0.000000e+00> : vector<32x32xf32>
    %2 = tpu.matmul %0, %1, %cst {dimension_numbers = #tpu.dot_dimension_numbers<[1], [0], [0], [1], [0, 0, 1, 1], [], []>} : vector<32x16xbf16>, vector<16x32xbf16>, vector<32x32xf32> -> vector<32x32xf32>
    %c0_3 = arith.constant 0 : index
    %c0_4 = arith.constant 0 : index
    %3 = vector.load %arg3[%c0_3, %c0_4] : memref<1x32xf32, #tpu.memory_space<vmem>>, vector<1x32xf32>
    %4 = vector.broadcast %3 : vector<1x32xf32> to vector<32x32xf32>
    %5 = arith.addf %2, %4 : vector<32x32xf32>
    %c0_5 = arith.constant 0 : index
    %c0_6 = arith.constant 0 : index
    %6 = vector.load %arg4[%c0_5, %c0_6] : memref<32x32xf32, #tpu.memory_space<vmem>>, vector<32x32xf32>
    %7 = arith.addf %5, %6 : vector<32x32xf32>
    %cst_7 = arith.constant 0.000000e+00 : f32
    %8 = vector.broadcast %cst_7 : f32 to vector<32x32xf32>
    %9 = arith.maximumf %7, %8 : vector<32x32xf32>
    %c0_8 = arith.constant 0 : index
    %c0_9 = arith.constant 0 : index
    %10 = vector.load %arg5[%c0_8, %c0_9] : memref<32x32xf32, #tpu.memory_space<vmem>>, vector<32x32xf32>
    tpu.vector_store %arg5[%c0_8, %c0_9], %9 {strides = array<i32>} : memref<32x32xf32, #tpu.memory_space<vmem>>, vector<32x32xf32>,
    return
  }
  func.func @transform_0(%arg0: i32) -> (i32, i32) {
    %c0_i32 = arith.constant 0 : i32
    %c0_i32_0 = arith.constant 0 : i32
    return %arg0, %c0_i32 : i32, i32
  }
  func.func @transform_1(%arg0: i32) -> (i32, i32) {
    %c0_i32 = arith.constant 0 : i32
    %c0_i32_0 = arith.constant 0 : i32
    %c0_i32_1 = arith.constant 0 : i32
    return %c0_i32, %c0_i32_0 : i32, i32
  }
  func.func @transform_2(%arg0: i32) -> (i32, i32) {
    %c0_i32 = arith.constant 0 : i32
    %c0_i32_0 = arith.constant 0 : i32
    %c0_i32_1 = arith.constant 0 : i32
    return %c0_i32, %c0_i32_0 : i32, i32
  }
  func.func @transform_3(%arg0: i32) -> (i32, i32) {
    %c0_i32 = arith.constant 0 : i32
    %c0_i32_0 = arith.constant 0 : i32
    return %arg0, %c0_i32 : i32, i32
  }
  func.func @transform_4(%arg0: i32) -> (i32, i32) {
    %c0_i32 = arith.constant 0 : i32
    %c0_i32_0 = arith.constant 0 : i32
    return %arg0, %c0_i32 : i32, i32
  }
}

module attributes {stable_mosaic.version = 11 : i64} {
  func.func @_mm_kernel(%arg0: i32, %arg1: memref<128x16xbf16, #tpu.memory_space<vmem>>, %arg2: memref<16x8xbf16, #tpu.memory_space<vmem>>, %arg3: memref<1x8xf32, #tpu.memory_space<vmem>>, %arg4: memref<128x8xf32, #tpu.memory_space<vmem>>) attributes {dimension_semantics = [#tpu.dimension_semantics<parallel>], iteration_bounds = array<i64: 1>, scalar_prefetch = 0 : i64, scratch_operands = 0 : i64, tpu.core_type = #tpu.core_type<tc>, window_params = [{transform_indices = @transform_0, window_bounds = array<i64: 128, 16>}, {pipeline_mode = #tpu.pipeline_mode<synchronous>, transform_indices = @transform_1, window_bounds = array<i64: 16, 8>}, {pipeline_mode = #tpu.pipeline_mode<synchronous>, transform_indices = @transform_2, window_bounds = array<i64: 1, 8>}, {transform_indices = @transform_3, window_bounds = array<i64: 128, 8>}]} {
    %c0 = arith.constant 0 : index
    %c0_0 = arith.constant 0 : index
    %0 = vector.load %arg1[%c0, %c0_0] : memref<128x16xbf16, #tpu.memory_space<vmem>>, vector<128x16xbf16>
    %c0_1 = arith.constant 0 : index
    %c0_2 = arith.constant 0 : index
    %1 = vector.load %arg2[%c0_1, %c0_2] : memref<16x8xbf16, #tpu.memory_space<vmem>>, vector<16x8xbf16>
    %cst = arith.constant dense<0.000000e+00> : vector<128x8xf32>
    %2 = tpu.matmul %0, %1, %cst {dimension_numbers = #tpu.dot_dimension_numbers<[1], [0], [0], [1], [0, 0, 1, 1], [], []>} : vector<128x16xbf16>, vector<16x8xbf16>, vector<128x8xf32> -> vector<128x8xf32>
    %c0_3 = arith.constant 0 : index
    %c0_4 = arith.constant 0 : index
    %3 = vector.load %arg3[%c0_3, %c0_4] : memref<1x8xf32, #tpu.memory_space<vmem>>, vector<1x8xf32>
    %4 = vector.broadcast %3 : vector<1x8xf32> to vector<128x8xf32>
    %5 = arith.addf %2, %4 : vector<128x8xf32>
    %c0_5 = arith.constant 0 : index
    %c0_6 = arith.constant 0 : index
    %6 = vector.load %arg4[%c0_5, %c0_6] : memref<128x8xf32, #tpu.memory_space<vmem>>, vector<128x8xf32>
    tpu.vector_store %arg4[%c0_5, %c0_6], %5 {strides = array<i32>} : memref<128x8xf32, #tpu.memory_space<vmem>>, vector<128x8xf32>,
    return
  }
  func.func @transform_0(%arg0: i32) -> (i32, i32) {
    %c0_i32 = arith.constant 0 : i32
    %c0_i32_0 = arith.constant 0 : i32
    return %arg0, %c0_i32 : i32, i32
  }
  func.func @transform_1(%arg0: i32) -> (i32, i32) {
    %c0_i32 = arith.constant 0 : i32
    %c0_i32_0 = arith.constant 0 : i32
    %c0_i32_1 = arith.constant 0 : i32
    return %c0_i32, %c0_i32_0 : i32, i32
  }
  func.func @transform_2(%arg0: i32) -> (i32, i32) {
    %c0_i32 = arith.constant 0 : i32
    %c0_i32_0 = arith.constant 0 : i32
    %c0_i32_1 = arith.constant 0 : i32
    return %c0_i32, %c0_i32_0 : i32, i32
  }
  func.func @transform_3(%arg0: i32) -> (i32, i32) {
    %c0_i32 = arith.constant 0 : i32
    %c0_i32_0 = arith.constant 0 : i32
    return %arg0, %c0_i32 : i32, i32
  }
}

module attributes {stable_mosaic.version = 11 : i64} {
  func.func @_mm_kernel(%arg0: i32, %arg1: memref<128x72xbf16, #tpu.memory_space<vmem>>, %arg2: memref<72x32xbf16, #tpu.memory_space<vmem>>, %arg3: memref<1x32xf32, #tpu.memory_space<vmem>>, %arg4: memref<128x32xf32, #tpu.memory_space<vmem>>) attributes {dimension_semantics = [#tpu.dimension_semantics<parallel>], iteration_bounds = array<i64: 1>, scalar_prefetch = 0 : i64, scratch_operands = 0 : i64, tpu.core_type = #tpu.core_type<tc>, window_params = [{transform_indices = @transform_0, window_bounds = array<i64: 128, 72>}, {pipeline_mode = #tpu.pipeline_mode<synchronous>, transform_indices = @transform_1, window_bounds = array<i64: 72, 32>}, {pipeline_mode = #tpu.pipeline_mode<synchronous>, transform_indices = @transform_2, window_bounds = array<i64: 1, 32>}, {transform_indices = @transform_3, window_bounds = array<i64: 128, 32>}]} {
    %c0 = arith.constant 0 : index
    %c0_0 = arith.constant 0 : index
    %0 = vector.load %arg1[%c0, %c0_0] : memref<128x72xbf16, #tpu.memory_space<vmem>>, vector<128x72xbf16>
    %c0_1 = arith.constant 0 : index
    %c0_2 = arith.constant 0 : index
    %1 = vector.load %arg2[%c0_1, %c0_2] : memref<72x32xbf16, #tpu.memory_space<vmem>>, vector<72x32xbf16>
    %cst = arith.constant dense<0.000000e+00> : vector<128x32xf32>
    %2 = tpu.matmul %0, %1, %cst {dimension_numbers = #tpu.dot_dimension_numbers<[1], [0], [0], [1], [0, 0, 1, 1], [], []>} : vector<128x72xbf16>, vector<72x32xbf16>, vector<128x32xf32> -> vector<128x32xf32>
    %c0_3 = arith.constant 0 : index
    %c0_4 = arith.constant 0 : index
    %3 = vector.load %arg3[%c0_3, %c0_4] : memref<1x32xf32, #tpu.memory_space<vmem>>, vector<1x32xf32>
    %4 = vector.broadcast %3 : vector<1x32xf32> to vector<128x32xf32>
    %5 = arith.addf %2, %4 : vector<128x32xf32>
    %c0_5 = arith.constant 0 : index
    %c0_6 = arith.constant 0 : index
    %6 = vector.load %arg4[%c0_5, %c0_6] : memref<128x32xf32, #tpu.memory_space<vmem>>, vector<128x32xf32>
    tpu.vector_store %arg4[%c0_5, %c0_6], %5 {strides = array<i32>} : memref<128x32xf32, #tpu.memory_space<vmem>>, vector<128x32xf32>,
    return
  }
  func.func @transform_0(%arg0: i32) -> (i32, i32) {
    %c0_i32 = arith.constant 0 : i32
    %c0_i32_0 = arith.constant 0 : i32
    return %arg0, %c0_i32 : i32, i32
  }
  func.func @transform_1(%arg0: i32) -> (i32, i32) {
    %c0_i32 = arith.constant 0 : i32
    %c0_i32_0 = arith.constant 0 : i32
    %c0_i32_1 = arith.constant 0 : i32
    return %c0_i32, %c0_i32_0 : i32, i32
  }
  func.func @transform_2(%arg0: i32) -> (i32, i32) {
    %c0_i32 = arith.constant 0 : i32
    %c0_i32_0 = arith.constant 0 : i32
    %c0_i32_1 = arith.constant 0 : i32
    return %c0_i32, %c0_i32_0 : i32, i32
  }
  func.func @transform_3(%arg0: i32) -> (i32, i32) {
    %c0_i32 = arith.constant 0 : i32
    %c0_i32_0 = arith.constant 0 : i32
    return %arg0, %c0_i32 : i32, i32
  }
}

module attributes {stable_mosaic.version = 11 : i64} {
  func.func @_mm_kernel(%arg0: i32, %arg1: memref<256x72xbf16, #tpu.memory_space<vmem>>, %arg2: memref<72x8xbf16, #tpu.memory_space<vmem>>, %arg3: memref<1x8xf32, #tpu.memory_space<vmem>>, %arg4: memref<256x8xf32, #tpu.memory_space<vmem>>) attributes {dimension_semantics = [#tpu.dimension_semantics<parallel>], iteration_bounds = array<i64: 2>, scalar_prefetch = 0 : i64, scratch_operands = 0 : i64, tpu.core_type = #tpu.core_type<tc>, window_params = [{transform_indices = @transform_0, window_bounds = array<i64: 256, 72>}, {pipeline_mode = #tpu.pipeline_mode<synchronous>, transform_indices = @transform_1, window_bounds = array<i64: 72, 8>}, {pipeline_mode = #tpu.pipeline_mode<synchronous>, transform_indices = @transform_2, window_bounds = array<i64: 1, 8>}, {transform_indices = @transform_3, window_bounds = array<i64: 256, 8>}]} {
    %c0 = arith.constant 0 : index
    %c0_0 = arith.constant 0 : index
    %0 = vector.load %arg1[%c0, %c0_0] : memref<256x72xbf16, #tpu.memory_space<vmem>>, vector<256x72xbf16>
    %c0_1 = arith.constant 0 : index
    %c0_2 = arith.constant 0 : index
    %1 = vector.load %arg2[%c0_1, %c0_2] : memref<72x8xbf16, #tpu.memory_space<vmem>>, vector<72x8xbf16>
    %cst = arith.constant dense<0.000000e+00> : vector<256x8xf32>
    %2 = tpu.matmul %0, %1, %cst {dimension_numbers = #tpu.dot_dimension_numbers<[1], [0], [0], [1], [0, 0, 1, 1], [], []>} : vector<256x72xbf16>, vector<72x8xbf16>, vector<256x8xf32> -> vector<256x8xf32>
    %c0_3 = arith.constant 0 : index
    %c0_4 = arith.constant 0 : index
    %3 = vector.load %arg3[%c0_3, %c0_4] : memref<1x8xf32, #tpu.memory_space<vmem>>, vector<1x8xf32>
    %4 = vector.broadcast %3 : vector<1x8xf32> to vector<256x8xf32>
    %5 = arith.addf %2, %4 : vector<256x8xf32>
    %c0_5 = arith.constant 0 : index
    %c0_6 = arith.constant 0 : index
    %6 = vector.load %arg4[%c0_5, %c0_6] : memref<256x8xf32, #tpu.memory_space<vmem>>, vector<256x8xf32>
    tpu.vector_store %arg4[%c0_5, %c0_6], %5 {strides = array<i32>} : memref<256x8xf32, #tpu.memory_space<vmem>>, vector<256x8xf32>,
    return
  }
  func.func @transform_0(%arg0: i32) -> (i32, i32) {
    %c0_i32 = arith.constant 0 : i32
    %c0_i32_0 = arith.constant 0 : i32
    return %arg0, %c0_i32 : i32, i32
  }
  func.func @transform_1(%arg0: i32) -> (i32, i32) {
    %c0_i32 = arith.constant 0 : i32
    %c0_i32_0 = arith.constant 0 : i32
    %c0_i32_1 = arith.constant 0 : i32
    return %c0_i32, %c0_i32_0 : i32, i32
  }
  func.func @transform_2(%arg0: i32) -> (i32, i32) {
    %c0_i32 = arith.constant 0 : i32
    %c0_i32_0 = arith.constant 0 : i32
    %c0_i32_1 = arith.constant 0 : i32
    return %c0_i32, %c0_i32_0 : i32, i32
  }
  func.func @transform_3(%arg0: i32) -> (i32, i32) {
    %c0_i32 = arith.constant 0 : i32
    %c0_i32_0 = arith.constant 0 : i32
    return %arg0, %c0_i32 : i32, i32
  }
}

module attributes {stable_mosaic.version = 11 : i64} {
  func.func @_mm_add_kernel(%arg0: i32, %arg1: memref<128x8xbf16, #tpu.memory_space<vmem>>, %arg2: memref<8x32xbf16, #tpu.memory_space<vmem>>, %arg3: memref<1x32xf32, #tpu.memory_space<vmem>>, %arg4: memref<128x32xf32, #tpu.memory_space<vmem>>, %arg5: memref<128x32xf32, #tpu.memory_space<vmem>>) attributes {dimension_semantics = [#tpu.dimension_semantics<parallel>], iteration_bounds = array<i64: 1>, scalar_prefetch = 0 : i64, scratch_operands = 0 : i64, tpu.core_type = #tpu.core_type<tc>, window_params = [{transform_indices = @transform_0, window_bounds = array<i64: 128, 8>}, {pipeline_mode = #tpu.pipeline_mode<synchronous>, transform_indices = @transform_1, window_bounds = array<i64: 8, 32>}, {pipeline_mode = #tpu.pipeline_mode<synchronous>, transform_indices = @transform_2, window_bounds = array<i64: 1, 32>}, {transform_indices = @transform_3, window_bounds = array<i64: 128, 32>}, {transform_indices = @transform_4, window_bounds = array<i64: 128, 32>}]} {
    %c0 = arith.constant 0 : index
    %c0_0 = arith.constant 0 : index
    %0 = vector.load %arg1[%c0, %c0_0] : memref<128x8xbf16, #tpu.memory_space<vmem>>, vector<128x8xbf16>
    %c0_1 = arith.constant 0 : index
    %c0_2 = arith.constant 0 : index
    %1 = vector.load %arg2[%c0_1, %c0_2] : memref<8x32xbf16, #tpu.memory_space<vmem>>, vector<8x32xbf16>
    %cst = arith.constant dense<0.000000e+00> : vector<128x32xf32>
    %2 = tpu.matmul %0, %1, %cst {dimension_numbers = #tpu.dot_dimension_numbers<[1], [0], [0], [1], [0, 0, 1, 1], [], []>} : vector<128x8xbf16>, vector<8x32xbf16>, vector<128x32xf32> -> vector<128x32xf32>
    %c0_3 = arith.constant 0 : index
    %c0_4 = arith.constant 0 : index
    %3 = vector.load %arg3[%c0_3, %c0_4] : memref<1x32xf32, #tpu.memory_space<vmem>>, vector<1x32xf32>
    %4 = vector.broadcast %3 : vector<1x32xf32> to vector<128x32xf32>
    %5 = arith.addf %2, %4 : vector<128x32xf32>
    %c0_5 = arith.constant 0 : index
    %c0_6 = arith.constant 0 : index
    %6 = vector.load %arg4[%c0_5, %c0_6] : memref<128x32xf32, #tpu.memory_space<vmem>>, vector<128x32xf32>
    %7 = arith.addf %5, %6 : vector<128x32xf32>
    %cst_7 = arith.constant 0.000000e+00 : f32
    %8 = vector.broadcast %cst_7 : f32 to vector<128x32xf32>
    %9 = arith.maximumf %7, %8 : vector<128x32xf32>
    %c0_8 = arith.constant 0 : index
    %c0_9 = arith.constant 0 : index
    %10 = vector.load %arg5[%c0_8, %c0_9] : memref<128x32xf32, #tpu.memory_space<vmem>>, vector<128x32xf32>
    tpu.vector_store %arg5[%c0_8, %c0_9], %9 {strides = array<i32>} : memref<128x32xf32, #tpu.memory_space<vmem>>, vector<128x32xf32>,
    return
  }
  func.func @transform_0(%arg0: i32) -> (i32, i32) {
    %c0_i32 = arith.constant 0 : i32
    %c0_i32_0 = arith.constant 0 : i32
    return %arg0, %c0_i32 : i32, i32
  }
  func.func @transform_1(%arg0: i32) -> (i32, i32) {
    %c0_i32 = arith.constant 0 : i32
    %c0_i32_0 = arith.constant 0 : i32
    %c0_i32_1 = arith.constant 0 : i32
    return %c0_i32, %c0_i32_0 : i32, i32
  }
  func.func @transform_2(%arg0: i32) -> (i32, i32) {
    %c0_i32 = arith.constant 0 : i32
    %c0_i32_0 = arith.constant 0 : i32
    %c0_i32_1 = arith.constant 0 : i32
    return %c0_i32, %c0_i32_0 : i32, i32
  }
  func.func @transform_3(%arg0: i32) -> (i32, i32) {
    %c0_i32 = arith.constant 0 : i32
    %c0_i32_0 = arith.constant 0 : i32
    return %arg0, %c0_i32 : i32, i32
  }
  func.func @transform_4(%arg0: i32) -> (i32, i32) {
    %c0_i32 = arith.constant 0 : i32
    %c0_i32_0 = arith.constant 0 : i32
    return %arg0, %c0_i32 : i32, i32
  }
}

module attributes {stable_mosaic.version = 11 : i64} {
  func.func @_mm_kernel(%arg0: i32, %arg1: memref<256x8xbf16, #tpu.memory_space<vmem>>, %arg2: memref<8x3xbf16, #tpu.memory_space<vmem>>, %arg3: memref<1x3xf32, #tpu.memory_space<vmem>>, %arg4: memref<256x3xf32, #tpu.memory_space<vmem>>) attributes {dimension_semantics = [#tpu.dimension_semantics<parallel>], iteration_bounds = array<i64: 2>, scalar_prefetch = 0 : i64, scratch_operands = 0 : i64, tpu.core_type = #tpu.core_type<tc>, window_params = [{transform_indices = @transform_0, window_bounds = array<i64: 256, 8>}, {pipeline_mode = #tpu.pipeline_mode<synchronous>, transform_indices = @transform_1, window_bounds = array<i64: 8, 3>}, {pipeline_mode = #tpu.pipeline_mode<synchronous>, transform_indices = @transform_2, window_bounds = array<i64: 1, 3>}, {transform_indices = @transform_3, window_bounds = array<i64: 256, 3>}]} {
    %c0 = arith.constant 0 : index
    %c0_0 = arith.constant 0 : index
    %0 = vector.load %arg1[%c0, %c0_0] : memref<256x8xbf16, #tpu.memory_space<vmem>>, vector<256x8xbf16>
    %c0_1 = arith.constant 0 : index
    %c0_2 = arith.constant 0 : index
    %1 = vector.load %arg2[%c0_1, %c0_2] : memref<8x3xbf16, #tpu.memory_space<vmem>>, vector<8x3xbf16>
    %cst = arith.constant dense<0.000000e+00> : vector<256x3xf32>
    %2 = tpu.matmul %0, %1, %cst {dimension_numbers = #tpu.dot_dimension_numbers<[1], [0], [0], [1], [0, 0, 1, 1], [], []>} : vector<256x8xbf16>, vector<8x3xbf16>, vector<256x3xf32> -> vector<256x3xf32>
    %c0_3 = arith.constant 0 : index
    %c0_4 = arith.constant 0 : index
    %3 = vector.load %arg3[%c0_3, %c0_4] : memref<1x3xf32, #tpu.memory_space<vmem>>, vector<1x3xf32>
    %4 = vector.broadcast %3 : vector<1x3xf32> to vector<256x3xf32>
    %5 = arith.addf %2, %4 : vector<256x3xf32>
    %c0_5 = arith.constant 0 : index
    %c0_6 = arith.constant 0 : index
    %6 = vector.load %arg4[%c0_5, %c0_6] : memref<256x3xf32, #tpu.memory_space<vmem>>, vector<256x3xf32>
    tpu.vector_store %arg4[%c0_5, %c0_6], %5 {strides = array<i32>} : memref<256x3xf32, #tpu.memory_space<vmem>>, vector<256x3xf32>,
    return
  }
  func.func @transform_0(%arg0: i32) -> (i32, i32) {
    %c0_i32 = arith.constant 0 : i32
    %c0_i32_0 = arith.constant 0 : i32
    return %arg0, %c0_i32 : i32, i32
  }
  func.func @transform_1(%arg0: i32) -> (i32, i32) {
    %c0_i32 = arith.constant 0 : i32
    %c0_i32_0 = arith.constant 0 : i32
    %c0_i32_1 = arith.constant 0 : i32
    return %c0_i32, %c0_i32_0 : i32, i32
  }
  func.func @transform_2(%arg0: i32) -> (i32, i32) {
    %c0_i32 = arith.constant 0 : i32
    %c0_i32_0 = arith.constant 0 : i32
    %c0_i32_1 = arith.constant 0 : i32
    return %c0_i32, %c0_i32_0 : i32, i32
  }
  func.func @transform_3(%arg0: i32) -> (i32, i32) {
    %c0_i32 = arith.constant 0 : i32
    %c0_i32_0 = arith.constant 0 : i32
    return %arg0, %c0_i32 : i32, i32
  }
}

module attributes {stable_mosaic.version = 11 : i64} {
  func.func @_mm_kernel(%arg0: i32, %arg1: memref<256x16xbf16, #tpu.memory_space<vmem>>, %arg2: memref<16x8xbf16, #tpu.memory_space<vmem>>, %arg3: memref<1x8xf32, #tpu.memory_space<vmem>>, %arg4: memref<256x8xf32, #tpu.memory_space<vmem>>) attributes {dimension_semantics = [#tpu.dimension_semantics<parallel>], iteration_bounds = array<i64: 2>, scalar_prefetch = 0 : i64, scratch_operands = 0 : i64, tpu.core_type = #tpu.core_type<tc>, window_params = [{transform_indices = @transform_0, window_bounds = array<i64: 256, 16>}, {pipeline_mode = #tpu.pipeline_mode<synchronous>, transform_indices = @transform_1, window_bounds = array<i64: 16, 8>}, {pipeline_mode = #tpu.pipeline_mode<synchronous>, transform_indices = @transform_2, window_bounds = array<i64: 1, 8>}, {transform_indices = @transform_3, window_bounds = array<i64: 256, 8>}]} {
    %c0 = arith.constant 0 : index
    %c0_0 = arith.constant 0 : index
    %0 = vector.load %arg1[%c0, %c0_0] : memref<256x16xbf16, #tpu.memory_space<vmem>>, vector<256x16xbf16>
    %c0_1 = arith.constant 0 : index
    %c0_2 = arith.constant 0 : index
    %1 = vector.load %arg2[%c0_1, %c0_2] : memref<16x8xbf16, #tpu.memory_space<vmem>>, vector<16x8xbf16>
    %cst = arith.constant dense<0.000000e+00> : vector<256x8xf32>
    %2 = tpu.matmul %0, %1, %cst {dimension_numbers = #tpu.dot_dimension_numbers<[1], [0], [0], [1], [0, 0, 1, 1], [], []>} : vector<256x16xbf16>, vector<16x8xbf16>, vector<256x8xf32> -> vector<256x8xf32>
    %c0_3 = arith.constant 0 : index
    %c0_4 = arith.constant 0 : index
    %3 = vector.load %arg3[%c0_3, %c0_4] : memref<1x8xf32, #tpu.memory_space<vmem>>, vector<1x8xf32>
    %4 = vector.broadcast %3 : vector<1x8xf32> to vector<256x8xf32>
    %5 = arith.addf %2, %4 : vector<256x8xf32>
    %c0_5 = arith.constant 0 : index
    %c0_6 = arith.constant 0 : index
    %6 = vector.load %arg4[%c0_5, %c0_6] : memref<256x8xf32, #tpu.memory_space<vmem>>, vector<256x8xf32>
    tpu.vector_store %arg4[%c0_5, %c0_6], %5 {strides = array<i32>} : memref<256x8xf32, #tpu.memory_space<vmem>>, vector<256x8xf32>,
    return
  }
  func.func @transform_0(%arg0: i32) -> (i32, i32) {
    %c0_i32 = arith.constant 0 : i32
    %c0_i32_0 = arith.constant 0 : i32
    return %arg0, %c0_i32 : i32, i32
  }
  func.func @transform_1(%arg0: i32) -> (i32, i32) {
    %c0_i32 = arith.constant 0 : i32
    %c0_i32_0 = arith.constant 0 : i32
    %c0_i32_1 = arith.constant 0 : i32
    return %c0_i32, %c0_i32_0 : i32, i32
  }
  func.func @transform_2(%arg0: i32) -> (i32, i32) {
    %c0_i32 = arith.constant 0 : i32
    %c0_i32_0 = arith.constant 0 : i32
    %c0_i32_1 = arith.constant 0 : i32
    return %c0_i32, %c0_i32_0 : i32, i32
  }
  func.func @transform_3(%arg0: i32) -> (i32, i32) {
    %c0_i32 = arith.constant 0 : i32
    %c0_i32_0 = arith.constant 0 : i32
    return %arg0, %c0_i32 : i32, i32
  }
}

</mosaic_0001>

<bundles_post_ra>
// kernel: resunet_forward.23
= control target key start
LH: loop header
LB: loop body
LE: loop exit
PB: predicated region body
PF: predicated region fallthrough
CT: control target
= control target key end

     0   :  { %s752_s12 = smov 0   ;;  %s913_s0 = inlined_call_operand.vmem [shape: bf16[512,3], index: 0, kind: input, shape index: {}]   ;;  %s914_s1 = inlined_call_operand.vmem [shape: bf16[3,8], index: 1, kind: input, shape index: {}]   ;;  %s915_s2 = inlined_call_operand.vmem [shape: f32[1,8], index: 2, kind: input, shape index: {}]   ;;  %s916_s3 = inlined_call_operand.vmem [shape: f32[512,8], index: 3, kind: output, shape index: {}]  }
   0x1 LB: > { %s601_s13 = sadd.s32 4294967295, %s729_s12   ;;  %p605_p0 = scmp.ge.s32.totalorder %s729_s12, 1  ;;  %s729_s12 = sphi %s752_s12, %s13_s12  }
   0x2   : > { %p138_p1 = scmp.lt.s32.totalorder %s729_s12, 3 }
   0x4   : > { %p139_p2 = pnand %p605_p0, %p138_p1 }
   0x5   : > { %v207_v0 = vld [vmem:[%s914_s1] sm:$0x3] (!%p139_p2)  ;;  %vm344_vm0 = vcmask (!%p139_p2), 1040384   ;;  %vm345_vm1 = vcmask (!%p139_p2), 1041408   ;;  %s606_s16 = sshll.u32 (!%p139_p2), %s601_s13, 5  ;;  %v731_v1 = vmov (!%p139_p2), 65535  }
   0x6   : > { %142 = sbr.rel (%p139_p2) target bundleno = 261 (0x105), region = 32  ;;  %v346_v2 = vsel (!%p139_p2), %vm344_vm0, 4294967295, %v731_v1  ;;  %p163_p3 = scmp.lt.s32.totalorder (!%p139_p2), %s606_s16, 63  ;;  %vm295_vm2 = vcmask (!%p139_p2), 23552   ;;  %v807_v21 = vld [vmem:[%s915_s2] ss:$0 sm:$0xff] (!%p139_p2) }
   0x7   : > { %v347_v3 = vsel (!%p139_p2), %vm345_vm1, %v346_v2, 0  ;;  %vm512_vm3 = vcmask (!%p139_p2), 64512  }
   0x8   : > { %v349_v4 = vand.u32 (!%p139_p2), %v347_v3, %v207_v0 }
   0xa   : > { %662 = vmatprep.subr.bf16.mxu0 (!%p139_p2), %v349_v4  ;;  %696 = vmatprep.subr.bf16.mxu1 (!%p139_p2), %v349_v4 }
   0xb   : > { %663 = vmatpush3.bf16.msra.mxu0 (!%p139_p2), %v349_v4  ;;  %697 = vmatpush3.bf16.msra.mxu1 (!%p139_p2), %v349_v4 }
   0xd   : > { %s918_s16 = smov (!%p163_p3, %s606_s16), 63 }
   0xe   : > { %s607_s17 = sshll.u32 %s918_s16, 2  ;;  %s609_s21 = sshll.u32 %s918_s16, 3 }
   0xf   : > { %s769_s20 = scalar_lea.vmem %s913_s0, %s607_s17  ;;  %s812_s26 = scalar_lea.vmem %s916_s3, %s609_s21 }
  0x10   : > { %v707_v5 = vld [vmem:[%s769_s20] sm:$0xff]   ;;  %v709_v7 = vld [vmem:[%s769_s20 + $0x8] sm:$0xff]   ;;  %v711_v9 = vld [vmem:[%s769_s20 + $0x10] sm:$0xff]  }
  0x11   : > { %v708_v6 = vld [vmem:[%s769_s20 + $0x40] sm:$0xff]   ;;  %664 = vmatprep.mubr.msk.bf16.mxu0 %vm295_vm2, %v707_v5  ;;  %v710_v8 = vld [vmem:[%s769_s20 + $0x48] sm:$0xff]   ;;  %v712_v10 = vld [vmem:[%s769_s20 + $0x50] sm:$0xff]  }
  0x12   : > { %680 = vmatprep.mubr.msk.bf16.mxu1 %vm295_vm2, %v708_v6  ;;  %665 = vmatmul.mubr.msk.bf16.vlgmr.msra.gmra.mrb[0].mxu0 %vm295_vm2, %v709_v7  ;;  %v713_v11 = vld [vmem:[%s769_s20 + $0x18] sm:$0xff]   ;;  %v715_v13 = vld [vmem:[%s769_s20 + $0x20] sm:$0xff]   ;;  %v717_v15 = vld [vmem:[%s769_s20 + $0x28] sm:$0xff]  }
  0x13   : > { %681 = vmatmul.mubr.msk.bf16.vlgmr.msra.gmra.mrb[0].mxu1 %vm295_vm2, %v710_v8  ;;  %668 = vmatprep.mubr.msk.bf16.mxu0 %vm295_vm2, %v711_v9  ;;  %v714_v12 = vld [vmem:[%s769_s20 + $0x58] sm:$0xff]   ;;  %v716_v14 = vld [vmem:[%s769_s20 + $0x60] sm:$0xff]   ;;  %v718_v16 = vld [vmem:[%s769_s20 + $0x68] sm:$0xff]  }
  0x14   : > { %684 = vmatprep.mubr.msk.bf16.mxu1 %vm295_vm2, %v712_v10  ;;  %v719_v17 = vld [vmem:[%s769_s20 + $0x30] sm:$0xff]   ;;  %v721_v19 = vld [vmem:[%s769_s20 + $0x38] sm:$0xff]  }
  0x15   : > { %v720_v18 = vld [vmem:[%s769_s20 + $0x70] sm:$0xff]   ;;  %v722_v20 = vld [vmem:[%s769_s20 + $0x78] sm:$0xff]  }
  0x1a   : > { %669 = vmatmul.mubr.msk.bf16.gmra.mrb[4].mxu0 %vm295_vm2, %v713_v11 }
  0x1b   : > { %685 = vmatmul.mubr.msk.bf16.gmra.mrb[4].mxu1 %vm295_vm2, %v714_v12  ;;  %672 = vmatprep.mubr.msk.bf16.mxu0 %vm295_vm2, %v715_v13 }
  0x1c   : > { %688 = vmatprep.mubr.msk.bf16.mxu1 %vm295_vm2, %v716_v14 }
  0x22   : > { %673 = vmatmul.mubr.msk.bf16.gmra.mrb[8].mxu0 %vm295_vm2, %v717_v15 }
  0x23   : > { %689 = vmatmul.mubr.msk.bf16.gmra.mrb[8].mxu1 %vm295_vm2, %v718_v16  ;;  %676 = vmatprep.mubr.msk.bf16.mxu0 %vm295_vm2, %v719_v17 }
  0x24   : > { %692 = vmatprep.mubr.msk.bf16.mxu1 %vm295_vm2, %v720_v18 }
  0x2a   : > { %677 = vmatmul.mubr.msk.bf16.gmra.mrb[12].mxu0 %vm295_vm2, %v721_v19 }
  0x2b   : > { %693 = vmatmul.mubr.msk.bf16.gmra.mrb[12].mxu1 %vm295_vm2, %v722_v20 }
  0xe5   : > { %v666_v22 = vpop.f32.mrb[0].mxu0 }
  0xe6   : > { %v394_v23 = vadd.f32 %v666_v22, %v807_v21  ;;  %v682_v24 = vpop.f32.mrb[0].mxu1  ;;  %v385_v25 = vpop.f32.mrb[1].mxu0 }
  0xe7   : > { %v458_v26 = vadd.f32 %v682_v24, %v807_v21  ;;  %v386_v27 = vadd.f32 %v807_v21, %v385_v25  ;;  %v449_v28 = vpop.f32.mrb[1].mxu1  ;;  %v667_v29 = vpop.f32.mrb[2].mxu0 }
  0xe8   : > { %515 = vst.msk [vmem:[%s812_s26 + $0x10] sm:$0xff] %vm512_vm3, %v394_v23  ;;  %v450_v30 = vadd.f32 %v807_v21, %v449_v28  ;;  %v397_v31 = vadd.f32 %v667_v29, %v807_v21  ;;  %v683_v32 = vpop.f32.mrb[2].mxu1  ;;  %v388_v33 = vpop.f32.mrb[3].mxu0 }
  0xe9   : > { %531 = vst.msk [vmem:[%s812_s26 + $0x90] sm:$0xff] %vm512_vm3, %v458_v26  ;;  %513 = vst.msk [vmem:[%s812_s26] sm:$0xff] %vm512_vm3, %v386_v27  ;;  %v461_v34 = vadd.f32 %v683_v32, %v807_v21  ;;  %v389_v35 = vadd.f32 %v807_v21, %v388_v33  ;;  %v452_v36 = vpop.f32.mrb[3].mxu1 }
  0xea   : > { %529 = vst.msk [vmem:[%s812_s26 + $0x80] sm:$0xff] %vm512_vm3, %v450_v30  ;;  %516 = vst.msk [vmem:[%s812_s26 + $0x18] sm:$0xff] %vm512_vm3, %v397_v31  ;;  %v453_v37 = vadd.f32 %v807_v21, %v452_v36 }
  0xeb   : > { %532 = vst.msk [vmem:[%s812_s26 + $0x98] sm:$0xff] %vm512_vm3, %v461_v34  ;;  %514 = vst.msk [vmem:[%s812_s26 + $0x8] sm:$0xff] %vm512_vm3, %v389_v35 }
  0xec   : > { %530 = vst.msk [vmem:[%s812_s26 + $0x88] sm:$0xff] %vm512_vm3, %v453_v37 }
  0xed   : > { %v670_v38 = vpop.f32.mrb[4].mxu0 }
  0xee   : > { %v410_v39 = vadd.f32 %v670_v38, %v807_v21  ;;  %v686_v40 = vpop.f32.mrb[4].mxu1  ;;  %v401_v41 = vpop.f32.mrb[5].mxu0 }
  0xef   : > { %v474_v42 = vadd.f32 %v686_v40, %v807_v21  ;;  %v402_v43 = vadd.f32 %v807_v21, %v401_v41  ;;  %v465_v44 = vpop.f32.mrb[5].mxu1  ;;  %v671_v45 = vpop.f32.mrb[6].mxu0 }
  0xf0   : > { %519 = vst.msk [vmem:[%s812_s26 + $0x30] sm:$0xff] %vm512_vm3, %v410_v39  ;;  %v466_v46 = vadd.f32 %v807_v21, %v465_v44  ;;  %v413_v47 = vadd.f32 %v671_v45, %v807_v21  ;;  %v687_v48 = vpop.f32.mrb[6].mxu1  ;;  %v404_v49 = vpop.f32.mrb[7].mxu0 }
  0xf1   : > { %535 = vst.msk [vmem:[%s812_s26 + $0xb0] sm:$0xff] %vm512_vm3, %v474_v42  ;;  %517 = vst.msk [vmem:[%s812_s26 + $0x20] sm:$0xff] %vm512_vm3, %v402_v43  ;;  %v477_v50 = vadd.f32 %v687_v48, %v807_v21  ;;  %v405_v51 = vadd.f32 %v807_v21, %v404_v49  ;;  %v468_v52 = vpop.f32.mrb[7].mxu1 }
  0xf2   : > { %533 = vst.msk [vmem:[%s812_s26 + $0xa0] sm:$0xff] %vm512_vm3, %v466_v46  ;;  %520 = vst.msk [vmem:[%s812_s26 + $0x38] sm:$0xff] %vm512_vm3, %v413_v47  ;;  %v469_v53 = vadd.f32 %v807_v21, %v468_v52 }
  0xf3   : > { %536 = vst.msk [vmem:[%s812_s26 + $0xb8] sm:$0xff] %vm512_vm3, %v477_v50  ;;  %518 = vst.msk [vmem:[%s812_s26 + $0x28] sm:$0xff] %vm512_vm3, %v405_v51 }
  0xf4   : > { %534 = vst.msk [vmem:[%s812_s26 + $0xa8] sm:$0xff] %vm512_vm3, %v469_v53 }
  0xf5   : > { %v674_v54 = vpop.f32.mrb[8].mxu0 }
  0xf6   : > { %v426_v55 = vadd.f32 %v674_v54, %v807_v21  ;;  %v690_v56 = vpop.f32.mrb[8].mxu1  ;;  %v417_v57 = vpop.f32.mrb[9].mxu0 }
  0xf7   : > { %v490_v58 = vadd.f32 %v690_v56, %v807_v21  ;;  %v418_v59 = vadd.f32 %v807_v21, %v417_v57  ;;  %v481_v60 = vpop.f32.mrb[9].mxu1  ;;  %v675_v61 = vpop.f32.mrb[10].mxu0 }
  0xf8   : > { %523 = vst.msk [vmem:[%s812_s26 + $0x50] sm:$0xff] %vm512_vm3, %v426_v55  ;;  %v482_v62 = vadd.f32 %v807_v21, %v481_v60  ;;  %v429_v63 = vadd.f32 %v675_v61, %v807_v21  ;;  %v691_v0 = vpop.f32.mrb[10].mxu1  ;;  %v420_v1 = vpop.f32.mrb[11].mxu0 }
  0xf9   : > { %539 = vst.msk [vmem:[%s812_s26 + $0xd0] sm:$0xff] %vm512_vm3, %v490_v58  ;;  %521 = vst.msk [vmem:[%s812_s26 + $0x40] sm:$0xff] %vm512_vm3, %v418_v59  ;;  %v493_v2 = vadd.f32 %v691_v0, %v807_v21  ;;  %v421_v3 = vadd.f32 %v807_v21, %v420_v1  ;;  %v484_v4 = vpop.f32.mrb[11].mxu1 }
  0xfa   : > { %537 = vst.msk [vmem:[%s812_s26 + $0xc0] sm:$0xff] %vm512_vm3, %v482_v62  ;;  %524 = vst.msk [vmem:[%s812_s26 + $0x58] sm:$0xff] %vm512_vm3, %v429_v63  ;;  %v485_v5 = vadd.f32 %v807_v21, %v484_v4 }
  0xfb   : > { %540 = vst.msk [vmem:[%s812_s26 + $0xd8] sm:$0xff] %vm512_vm3, %v493_v2  ;;  %522 = vst.msk [vmem:[%s812_s26 + $0x48] sm:$0xff] %vm512_vm3, %v421_v3 }
  0xfc   : > { %538 = vst.msk [vmem:[%s812_s26 + $0xc8] sm:$0xff] %vm512_vm3, %v485_v5 }
  0xfd   : > { %v678_v6 = vpop.f32.mrb[12].mxu0 }
  0xfe   : > { %v442_v7 = vadd.f32 %v678_v6, %v807_v21  ;;  %v694_v8 = vpop.f32.mrb[12].mxu1  ;;  %v433_v9 = vpop.f32.mrb[13].mxu0 }
  0xff   : > { %v506_v10 = vadd.f32 %v694_v8, %v807_v21  ;;  %v434_v11 = vadd.f32 %v807_v21, %v433_v9  ;;  %v497_v12 = vpop.f32.mrb[13].mxu1  ;;  %v679_v13 = vpop.f32.mrb[14].mxu0 }
 0x100   : > { %527 = vst.msk [vmem:[%s812_s26 + $0x70] sm:$0xff] %vm512_vm3, %v442_v7  ;;  %v498_v14 = vadd.f32 %v807_v21, %v497_v12  ;;  %v445_v15 = vadd.f32 %v679_v13, %v807_v21  ;;  %v695_v16 = vpop.f32.mrb[14].mxu1  ;;  %v436_v17 = vpop.f32.mrb[15].mxu0 }
 0x101   : > { %543 = vst.msk [vmem:[%s812_s26 + $0xf0] sm:$0xff] %vm512_vm3, %v506_v10  ;;  %525 = vst.msk [vmem:[%s812_s26 + $0x60] sm:$0xff] %vm512_vm3, %v434_v11  ;;  %v509_v18 = vadd.f32 %v695_v16, %v807_v21  ;;  %v437_v19 = vadd.f32 %v807_v21, %v436_v17  ;;  %v500_v20 = vpop.f32.mrb[15].mxu1 }
 0x102   : > { %541 = vst.msk [vmem:[%s812_s26 + $0xe0] sm:$0xff] %vm512_vm3, %v498_v14  ;;  %528 = vst.msk [vmem:[%s812_s26 + $0x78] sm:$0xff] %vm512_vm3, %v445_v15  ;;  %v501_v22 = vadd.f32 %v807_v21, %v500_v20 }
 0x103   : > { %544 = vst.msk [vmem:[%s812_s26 + $0xf8] sm:$0xff] %vm512_vm3, %v509_v18  ;;  %526 = vst.msk [vmem:[%s812_s26 + $0x68] sm:$0xff] %vm512_vm3, %v437_v19 }
 0x104   : > { %542 = vst.msk [vmem:[%s812_s26 + $0xe8] sm:$0xff] %vm512_vm3, %v501_v22 }
 0x105 PF: > { %s13_s12 = sadd.s32 1, %s729_s12  }
 0x106   : > { %p10_p4 = scmp.ge.s32.totalorder %s13_s12, 4  }
 0x108   :  { %12 = sbr.rel (!%p10_p4) target bundleno = 1 (0x1), region = 62 }

// kernel: resunet_forward.24
= control target key start
LH: loop header
LB: loop body
LE: loop exit
PB: predicated region body
PF: predicated region fallthrough
CT: control target
= control target key end

     0   :  { %vm247_vm0 = vcmask 64512   ;;  %s500_s1 = inlined_call_operand.vmem [shape: bf16[128,8], index: 1, kind: input, shape index: {}]   ;;  %s501_s0 = inlined_call_operand.vmem [shape: bf16[128,128], index: 0, kind: input, shape index: {}]   ;;  %s502_s2 = inlined_call_operand.vmem [shape: f32[1,8], index: 2, kind: input, shape index: {}]   ;;  %s503_s3 = inlined_call_operand.vmem [shape: f32[128,8], index: 3, kind: output, shape index: {}]  }
   0x1   :  { %v349_v0 = vld [vmem:[%s500_s1] sm:$0xff]   ;;  %v350_v1 = vld [vmem:[%s500_s1 + $0x8] sm:$0xff]   ;;  %v351_v2 = vld [vmem:[%s500_s1 + $0x10] sm:$0xff]  }
   0x2   :  { %301 = vmatprep.subr.bf16.mxu0 %v349_v0  ;;  %333 = vmatprep.subr.bf16.mxu1 %v349_v0  ;;  %v352_v3 = vld [vmem:[%s500_s1 + $0x18] sm:$0xff]   ;;  %v357_v4 = vld [vmem:[%s501_s0] sm:$0xff]   ;;  %v354_v7 = vld [vmem:[%s500_s1 + $0x28] sm:$0xff]  }
   0x3   :  { %302 = vmatpush3.bf16.msra.mxu0 %v349_v0  ;;  %341 = vmatpush3.bf16.msra.mxu1 %v349_v0  ;;  %v358_v5 = vld [vmem:[%s501_s0 + $0x20] sm:$0xff]   ;;  %v355_v8 = vld [vmem:[%s500_s1 + $0x30] sm:$0xff]   ;;  %v356_v9 = vld [vmem:[%s500_s1 + $0x38] sm:$0xff]  }
   0x4   :  { %303 = vmatprep.subr.bf16.mxu0 %v350_v1  ;;  %334 = vmatprep.subr.bf16.mxu1 %v350_v1  ;;  %v353_v6 = vld [vmem:[%s500_s1 + $0x20] sm:$0xff]   ;;  %v359_v10 = vld [vmem:[%s501_s0 + $0x8] sm:$0xff]   ;;  %v361_v12 = vld [vmem:[%s501_s0 + $0x10] sm:$0xff]  }
   0x5   :  { %317 = vmatprep.mubr.bf16.mxu0 %v357_v4  ;;  %325 = vmatprep.mubr.bf16.mxu1 %v358_v5  ;;  %v360_v11 = vld [vmem:[%s501_s0 + $0x28] sm:$0xff]   ;;  %v362_v13 = vld [vmem:[%s501_s0 + $0x30] sm:$0xff]   ;;  %v363_v14 = vld [vmem:[%s501_s0 + $0x18] sm:$0xff]  }
   0x6   :  { %v364_v15 = vld [vmem:[%s501_s0 + $0x38] sm:$0xff]   ;;  %v268_v16 = vld [vmem:[%s502_s2] ss:$0 sm:$0xff] }
   0x7   :  { %304 = vmatpush3.bf16.msra.mxu0 %v350_v1  ;;  %342 = vmatpush3.bf16.msra.mxu1 %v350_v1 }
   0x8   :  { %305 = vmatprep.subr.bf16.mxu0 %v351_v2  ;;  %335 = vmatprep.subr.bf16.mxu1 %v351_v2 }
   0xb   :  { %306 = vmatpush3.bf16.msra.mxu0 %v351_v2  ;;  %343 = vmatpush3.bf16.msra.mxu1 %v351_v2 }
   0xc   :  { %307 = vmatprep.subr.bf16.mxu0 %v352_v3  ;;  %336 = vmatprep.subr.bf16.mxu1 %v352_v3 }
   0xf   :  { %308 = vmatpush3.bf16.msra.mxu0 %v352_v3  ;;  %344 = vmatpush3.bf16.msra.mxu1 %v352_v3 }
  0x10   :  { %309 = vmatprep.subr.bf16.mxu0 %v353_v6  ;;  %337 = vmatprep.subr.bf16.mxu1 %v353_v6 }
  0x13   :  { %310 = vmatpush3.bf16.msra.mxu0 %v353_v6  ;;  %345 = vmatpush3.bf16.msra.mxu1 %v353_v6 }
  0x14   :  { %311 = vmatprep.subr.bf16.mxu0 %v354_v7  ;;  %338 = vmatprep.subr.bf16.mxu1 %v354_v7 }
  0x17   :  { %312 = vmatpush3.bf16.msra.mxu0 %v354_v7  ;;  %346 = vmatpush3.bf16.msra.mxu1 %v354_v7 }
  0x18   :  { %313 = vmatprep.subr.bf16.mxu0 %v355_v8  ;;  %339 = vmatprep.subr.bf16.mxu1 %v355_v8 }
  0x1b   :  { %314 = vmatpush3.bf16.msra.mxu0 %v355_v8  ;;  %347 = vmatpush3.bf16.msra.mxu1 %v355_v8 }
  0x1c   :  { %315 = vmatprep.subr.bf16.mxu0 %v356_v9  ;;  %340 = vmatprep.subr.bf16.mxu1 %v356_v9 }
  0x1f   :  { %316 = vmatpush3.bf16.msra.mxu0 %v356_v9  ;;  %348 = vmatpush3.bf16.msra.mxu1 %v356_v9 }
  0x22   :  { %318 = vmatmul.mubr.bf16.vlgmr.msra.gmra.mrb[0].mxu0 %v359_v10  ;;  %326 = vmatmul.mubr.bf16.vlgmr.msra.gmra.mrb[0].mxu1 %v360_v11 }
  0x23   :  { %321 = vmatprep.mubr.bf16.mxu0 %v361_v12  ;;  %329 = vmatprep.mubr.bf16.mxu1 %v362_v13 }
  0x2a   :  { %322 = vmatmul.mubr.bf16.gmra.mrb[4].mxu0 %v363_v14  ;;  %330 = vmatmul.mubr.bf16.gmra.mrb[4].mxu1 %v364_v15 }
  0xf5   :  { %v319_v17 = vpop.f32.mrb[0].mxu0  ;;  %v327_v18 = vpop.f32.mrb[0].mxu1 }
  0xf6   :  { %v193_v19 = vadd.f32 %v319_v17, %v268_v16  ;;  %v225_v20 = vadd.f32 %v327_v18, %v268_v16  ;;  %v184_v21 = vpop.f32.mrb[1].mxu0  ;;  %v216_v22 = vpop.f32.mrb[1].mxu1 }
  0xf7   :  { %v185_v23 = vadd.f32 %v268_v16, %v184_v21  ;;  %v217_v24 = vadd.f32 %v268_v16, %v216_v22  ;;  %v320_v25 = vpop.f32.mrb[2].mxu0  ;;  %v328_v26 = vpop.f32.mrb[2].mxu1 }
  0xf8   :  { %250 = vst.msk [vmem:[%s503_s3 + $0x10] sm:$0xff] %vm247_vm0, %v193_v19  ;;  %258 = vst.msk [vmem:[%s503_s3 + $0x50] sm:$0xff] %vm247_vm0, %v225_v20  ;;  %v196_v27 = vadd.f32 %v320_v25, %v268_v16  ;;  %v228_v28 = vadd.f32 %v328_v26, %v268_v16  ;;  %v187_v29 = vpop.f32.mrb[3].mxu0  ;;  %v219_v30 = vpop.f32.mrb[3].mxu1 }
  0xf9   :  { %248 = vst.msk [vmem:[%s503_s3] sm:$0xff] %vm247_vm0, %v185_v23  ;;  %256 = vst.msk [vmem:[%s503_s3 + $0x40] sm:$0xff] %vm247_vm0, %v217_v24  ;;  %v188_v31 = vadd.f32 %v268_v16, %v187_v29  ;;  %v220_v32 = vadd.f32 %v268_v16, %v219_v30 }
  0xfa   :  { %251 = vst.msk [vmem:[%s503_s3 + $0x18] sm:$0xff] %vm247_vm0, %v196_v27  ;;  %259 = vst.msk [vmem:[%s503_s3 + $0x58] sm:$0xff] %vm247_vm0, %v228_v28 }
  0xfb   :  { %249 = vst.msk [vmem:[%s503_s3 + $0x8] sm:$0xff] %vm247_vm0, %v188_v31  ;;  %257 = vst.msk [vmem:[%s503_s3 + $0x48] sm:$0xff] %vm247_vm0, %v220_v32 }
  0xfd   :  { %v323_v33 = vpop.f32.mrb[4].mxu0  ;;  %v331_v34 = vpop.f32.mrb[4].mxu1 }
  0xfe   :  { %v209_v35 = vadd.f32 %v323_v33, %v268_v16  ;;  %v241_v36 = vadd.f32 %v331_v34, %v268_v16  ;;  %v200_v37 = vpop.f32.mrb[5].mxu0  ;;  %v232_v38 = vpop.f32.mrb[5].mxu1 }
  0xff   :  { %v201_v39 = vadd.f32 %v268_v16, %v200_v37  ;;  %v233_v40 = vadd.f32 %v268_v16, %v232_v38  ;;  %v324_v41 = vpop.f32.mrb[6].mxu0  ;;  %v332_v42 = vpop.f32.mrb[6].mxu1 }
 0x100   :  { %254 = vst.msk [vmem:[%s503_s3 + $0x30] sm:$0xff] %vm247_vm0, %v209_v35  ;;  %262 = vst.msk [vmem:[%s503_s3 + $0x70] sm:$0xff] %vm247_vm0, %v241_v36  ;;  %v212_v43 = vadd.f32 %v324_v41, %v268_v16  ;;  %v244_v44 = vadd.f32 %v332_v42, %v268_v16  ;;  %v203_v45 = vpop.f32.mrb[7].mxu0  ;;  %v235_v46 = vpop.f32.mrb[7].mxu1 }
 0x101   :  { %252 = vst.msk [vmem:[%s503_s3 + $0x20] sm:$0xff] %vm247_vm0, %v201_v39  ;;  %260 = vst.msk [vmem:[%s503_s3 + $0x60] sm:$0xff] %vm247_vm0, %v233_v40  ;;  %v204_v47 = vadd.f32 %v268_v16, %v203_v45  ;;  %v236_v48 = vadd.f32 %v268_v16, %v235_v46 }
 0x102   :  { %255 = vst.msk [vmem:[%s503_s3 + $0x38] sm:$0xff] %vm247_vm0, %v212_v43  ;;  %263 = vst.msk [vmem:[%s503_s3 + $0x78] sm:$0xff] %vm247_vm0, %v244_v44 }
 0x103   :  { %253 = vst.msk [vmem:[%s503_s3 + $0x28] sm:$0xff] %vm247_vm0, %v204_v47  ;;  %261 = vst.msk [vmem:[%s503_s3 + $0x68] sm:$0xff] %vm247_vm0, %v236_v48 }

// kernel: resunet_forward.25
= control target key start
LH: loop header
LB: loop body
LE: loop exit
PB: predicated region body
PF: predicated region fallthrough
CT: control target
= control target key end

     0   :  { %vm114_vm0 = vcmask 588800   ;;  %vm139_vm1 = vcmask 1043456   ;;  %vm240_vm2 = vcmask 64512   ;;  %s481_s1 = inlined_call_operand.vmem [shape: bf16[72,8], index: 1, kind: input, shape index: {}]   ;;  %s482_s0 = inlined_call_operand.vmem [shape: bf16[128,72], index: 0, kind: input, shape index: {}]   ;;  %s483_s2 = inlined_call_operand.vmem [shape: f32[1,8], index: 2, kind: input, shape index: {}]   ;;  %s484_s3 = inlined_call_operand.vmem [shape: f32[128,8], index: 3, kind: output, shape index: {}]  }
   0x1   :  { %v334_v0 = vld [vmem:[%s481_s1] sm:$0xff]   ;;  %v335_v1 = vld [vmem:[%s481_s1 + $0x8] sm:$0xff]   ;;  %v336_v2 = vld [vmem:[%s481_s1 + $0x10] sm:$0xff]  }
   0x2   :  { %296 = vmatprep.subr.bf16.mxu0 %v334_v0  ;;  %322 = vmatprep.subr.bf16.mxu1 %v334_v0  ;;  %v339_v3 = vld [vmem:[%s482_s0] sm:$0xff]   ;;  %v337_v5 = vld [vmem:[%s481_s1 + $0x18] sm:$0xff]   ;;  %v341_v8 = vld [vmem:[%s482_s0 + $0x8] sm:$0xff]  }
   0x3   :  { %297 = vmatpush3.bf16.msra.mxu0 %v334_v0  ;;  %327 = vmatpush3.bf16.msra.mxu1 %v334_v0  ;;  %v340_v4 = vld [vmem:[%s482_s0 + $0x20] sm:$0xff]   ;;  %v342_v9 = vld [vmem:[%s482_s0 + $0x28] sm:$0xff]   ;;  %v343_v10 = vld [vmem:[%s482_s0 + $0x10] sm:$0xff]  }
   0x4   :  { %298 = vmatprep.subr.bf16.mxu0 %v335_v1  ;;  %323 = vmatprep.subr.bf16.mxu1 %v335_v1  ;;  %v338_v6 = vld [vmem:[%s481_s1 + $0x20] ss:$0 sps:$4 sm:$0xff]   ;;  %v344_v11 = vld [vmem:[%s482_s0 + $0x30] sm:$0xff]   ;;  %v345_v12 = vld [vmem:[%s482_s0 + $0x18] sm:$0xff]  }
   0x5   :  { %306 = vmatprep.mubr.msk.bf16.mxu0 %vm114_vm0, %v339_v3  ;;  %314 = vmatprep.mubr.msk.bf16.mxu1 %vm114_vm0, %v340_v4  ;;  %v141_v7 = vsel %vm139_vm1, %v338_v6, 0  ;;  %v346_v13 = vld [vmem:[%s482_s0 + $0x38] sm:$0xff]   ;;  %v261_v14 = vld [vmem:[%s483_s2] ss:$0 sm:$0xff] }
   0x7   :  { %299 = vmatpush3.bf16.msra.mxu0 %v335_v1  ;;  %328 = vmatpush3.bf16.msra.mxu1 %v335_v1 }
   0x8   :  { %300 = vmatprep.subr.bf16.mxu0 %v336_v2  ;;  %324 = vmatprep.subr.bf16.mxu1 %v336_v2 }
   0xb   :  { %301 = vmatpush3.bf16.msra.mxu0 %v336_v2  ;;  %329 = vmatpush3.bf16.msra.mxu1 %v336_v2 }
   0xc   :  { %302 = vmatprep.subr.bf16.mxu0 %v337_v5  ;;  %325 = vmatprep.subr.bf16.mxu1 %v337_v5 }
   0xf   :  { %303 = vmatpush3.bf16.msra.mxu0 %v337_v5  ;;  %330 = vmatpush3.bf16.msra.mxu1 %v337_v5 }
  0x10   :  { %332 = vmatprep.subr.msk.bf16.mxu0 %vm139_vm1, %v338_v6  ;;  %333 = vmatprep.subr.msk.bf16.mxu1 %vm139_vm1, %v338_v6 }
  0x13   :  { %305 = vmatpush3.bf16.msra.mxu0 %v141_v7  ;;  %331 = vmatpush3.bf16.msra.mxu1 %v141_v7 }
  0x16   :  { %307 = vmatmul.mubr.msk.bf16.vlgmr.msra.gmra.mrb[0].mxu0 %vm114_vm0, %v341_v8  ;;  %315 = vmatmul.mubr.msk.bf16.vlgmr.msra.gmra.mrb[0].mxu1 %vm114_vm0, %v342_v9 }
  0x17   :  { %310 = vmatprep.mubr.msk.bf16.mxu0 %vm114_vm0, %v343_v10  ;;  %318 = vmatprep.mubr.msk.bf16.mxu1 %vm114_vm0, %v344_v11 }
  0x1e   :  { %311 = vmatmul.mubr.msk.bf16.gmra.mrb[4].mxu0 %vm114_vm0, %v345_v12  ;;  %319 = vmatmul.mubr.msk.bf16.gmra.mrb[4].mxu1 %vm114_vm0, %v346_v13 }
  0xe9   :  { %v308_v15 = vpop.f32.mrb[0].mxu0  ;;  %v316_v16 = vpop.f32.mrb[0].mxu1 }
  0xea   :  { %v186_v17 = vadd.f32 %v308_v15, %v261_v14  ;;  %v218_v18 = vadd.f32 %v316_v16, %v261_v14  ;;  %v177_v19 = vpop.f32.mrb[1].mxu0  ;;  %v209_v20 = vpop.f32.mrb[1].mxu1 }
  0xeb   :  { %v178_v21 = vadd.f32 %v261_v14, %v177_v19  ;;  %v210_v22 = vadd.f32 %v261_v14, %v209_v20  ;;  %v309_v23 = vpop.f32.mrb[2].mxu0  ;;  %v317_v24 = vpop.f32.mrb[2].mxu1 }
  0xec   :  { %243 = vst.msk [vmem:[%s484_s3 + $0x10] sm:$0xff] %vm240_vm2, %v186_v17  ;;  %251 = vst.msk [vmem:[%s484_s3 + $0x50] sm:$0xff] %vm240_vm2, %v218_v18  ;;  %v189_v25 = vadd.f32 %v309_v23, %v261_v14  ;;  %v221_v26 = vadd.f32 %v317_v24, %v261_v14  ;;  %v180_v27 = vpop.f32.mrb[3].mxu0  ;;  %v212_v28 = vpop.f32.mrb[3].mxu1 }
  0xed   :  { %241 = vst.msk [vmem:[%s484_s3] sm:$0xff] %vm240_vm2, %v178_v21  ;;  %249 = vst.msk [vmem:[%s484_s3 + $0x40] sm:$0xff] %vm240_vm2, %v210_v22  ;;  %v181_v29 = vadd.f32 %v261_v14, %v180_v27  ;;  %v213_v30 = vadd.f32 %v261_v14, %v212_v28 }
  0xee   :  { %244 = vst.msk [vmem:[%s484_s3 + $0x18] sm:$0xff] %vm240_vm2, %v189_v25  ;;  %252 = vst.msk [vmem:[%s484_s3 + $0x58] sm:$0xff] %vm240_vm2, %v221_v26 }
  0xef   :  { %242 = vst.msk [vmem:[%s484_s3 + $0x8] sm:$0xff] %vm240_vm2, %v181_v29  ;;  %250 = vst.msk [vmem:[%s484_s3 + $0x48] sm:$0xff] %vm240_vm2, %v213_v30 }
  0xf1   :  { %v312_v31 = vpop.f32.mrb[4].mxu0  ;;  %v320_v32 = vpop.f32.mrb[4].mxu1 }
  0xf2   :  { %v202_v33 = vadd.f32 %v312_v31, %v261_v14  ;;  %v234_v34 = vadd.f32 %v320_v32, %v261_v14  ;;  %v193_v35 = vpop.f32.mrb[5].mxu0  ;;  %v225_v36 = vpop.f32.mrb[5].mxu1 }
  0xf3   :  { %v194_v37 = vadd.f32 %v261_v14, %v193_v35  ;;  %v226_v38 = vadd.f32 %v261_v14, %v225_v36  ;;  %v313_v39 = vpop.f32.mrb[6].mxu0  ;;  %v321_v40 = vpop.f32.mrb[6].mxu1 }
  0xf4   :  { %247 = vst.msk [vmem:[%s484_s3 + $0x30] sm:$0xff] %vm240_vm2, %v202_v33  ;;  %255 = vst.msk [vmem:[%s484_s3 + $0x70] sm:$0xff] %vm240_vm2, %v234_v34  ;;  %v205_v41 = vadd.f32 %v313_v39, %v261_v14  ;;  %v237_v42 = vadd.f32 %v321_v40, %v261_v14  ;;  %v196_v43 = vpop.f32.mrb[7].mxu0  ;;  %v228_v44 = vpop.f32.mrb[7].mxu1 }
  0xf5   :  { %245 = vst.msk [vmem:[%s484_s3 + $0x20] sm:$0xff] %vm240_vm2, %v194_v37  ;;  %253 = vst.msk [vmem:[%s484_s3 + $0x60] sm:$0xff] %vm240_vm2, %v226_v38  ;;  %v197_v45 = vadd.f32 %v261_v14, %v196_v43  ;;  %v229_v46 = vadd.f32 %v261_v14, %v228_v44 }
  0xf6   :  { %248 = vst.msk [vmem:[%s484_s3 + $0x38] sm:$0xff] %vm240_vm2, %v205_v41  ;;  %256 = vst.msk [vmem:[%s484_s3 + $0x78] sm:$0xff] %vm240_vm2, %v237_v42 }
  0xf7   :  { %246 = vst.msk [vmem:[%s484_s3 + $0x28] sm:$0xff] %vm240_vm2, %v197_v45  ;;  %254 = vst.msk [vmem:[%s484_s3 + $0x68] sm:$0xff] %vm240_vm2, %v229_v46 }

// kernel: resunet_forward.26
= control target key start
LH: loop header
LB: loop body
LE: loop exit
PB: predicated region body
PF: predicated region fallthrough
CT: control target
= control target key end

     0   :  { %vm107_vm0 = vcmask 1043456   ;;  %vm82_vm1 = vcmask 64512   ;;  %s525_s1 = inlined_call_operand.vmem [shape: bf16[8,8], index: 1, kind: input, shape index: {}]   ;;  %s526_s0 = inlined_call_operand.vmem [shape: bf16[128,8], index: 0, kind: input, shape index: {}]   ;;  %s527_s2 = inlined_call_operand.vmem [shape: f32[1,8], index: 2, kind: input, shape index: {}]   ;;  %s528_s3 = inlined_call_operand.vmem [shape: f32[128,8], index: 3, kind: input, shape index: {}]   ;;  %s529_s4 = inlined_call_operand.vmem [shape: f32[128,8], index: 4, kind: output, shape index: {}]  }
   0x1   :  { %v34_v0 = vld [vmem:[%s525_s1] sm:$0xf]  ;;  %v326_v4 = vld [vmem:[%s526_s0 + $0x8] sm:$0xff]   ;;  %v328_v6 = vld [vmem:[%s526_s0 + $0x10] sm:$0xff]  }
   0x2   :  { %322 = vmatprep.subr.msk.bf16.mxu0 %vm107_vm0, %v34_v0  ;;  %323 = vmatprep.subr.msk.bf16.mxu1 %vm107_vm0, %v34_v0  ;;  %v109_v1 = vsel %vm107_vm0, %v34_v0, 0  ;;  %v324_v2 = vld [vmem:[%s526_s0] sm:$0xff]   ;;  %v327_v5 = vld [vmem:[%s526_s0 + $0x28] sm:$0xff]   ;;  %v329_v7 = vld [vmem:[%s526_s0 + $0x30] sm:$0xff]  }
   0x3   :  { %303 = vmatpush3.bf16.msra.mxu0 %v109_v1  ;;  %321 = vmatpush3.bf16.msra.mxu1 %v109_v1  ;;  %v325_v3 = vld [vmem:[%s526_s0 + $0x20] sm:$0xff]   ;;  %v330_v8 = vld [vmem:[%s526_s0 + $0x18] sm:$0xff]   ;;  %v210_v12 = vld [vmem:[%s528_s3 + $0x10] sm:$0xff] }
   0x4   :  { %304 = vmatprep.mubr.msk.bf16.mxu0 %vm82_vm1, %v324_v2  ;;  %312 = vmatprep.mubr.msk.bf16.mxu1 %vm82_vm1, %v325_v3  ;;  %v331_v9 = vld [vmem:[%s526_s0 + $0x38] sm:$0xff]   ;;  %v395_v10 = vld [vmem:[%s527_s2] ss:$0 sm:$0xff]  ;;  %v218_v15 = vld [vmem:[%s528_s3 + $0x50] sm:$0xff] }
   0x5   :  { %v208_v17 = vld [vmem:[%s528_s3] sm:$0xff]  ;;  %v211_v23 = vld [vmem:[%s528_s3 + $0x18] sm:$0xff]  ;;  %v209_v30 = vld [vmem:[%s528_s3 + $0x8] sm:$0xff] }
   0x6   :  { %305 = vmatmul.mubr.msk.bf16.vlgmr.msra.gmra.mrb[0].mxu0 %vm82_vm1, %v326_v4  ;;  %313 = vmatmul.mubr.msk.bf16.vlgmr.msra.gmra.mrb[0].mxu1 %vm82_vm1, %v327_v5  ;;  %v216_v21 = vld [vmem:[%s528_s3 + $0x40] sm:$0xff]  ;;  %v219_v28 = vld [vmem:[%s528_s3 + $0x58] sm:$0xff]  ;;  %v217_v36 = vld [vmem:[%s528_s3 + $0x48] sm:$0xff] }
   0x7   :  { %308 = vmatprep.mubr.msk.bf16.mxu0 %vm82_vm1, %v328_v6  ;;  %316 = vmatprep.mubr.msk.bf16.mxu1 %vm82_vm1, %v329_v7  ;;  %v214_v51 = vld [vmem:[%s528_s3 + $0x30] sm:$0xff]  ;;  %v212_v57 = vld [vmem:[%s528_s3 + $0x20] sm:$0xff]  ;;  %v215_v63 = vld [vmem:[%s528_s3 + $0x38] sm:$0xff] }
   0x8   :  { %v222_v55 = vld [vmem:[%s528_s3 + $0x70] sm:$0xff]  ;;  %v220_v61 = vld [vmem:[%s528_s3 + $0x60] sm:$0xff]  ;;  %v223_v4 = vld [vmem:[%s528_s3 + $0x78] sm:$0xff] }
   0x9   :  { %v213_v6 = vld [vmem:[%s528_s3 + $0x28] sm:$0xff] }
   0xe   :  { %309 = vmatmul.mubr.msk.bf16.gmra.mrb[4].mxu0 %vm82_vm1, %v330_v8  ;;  %317 = vmatmul.mubr.msk.bf16.gmra.mrb[4].mxu1 %vm82_vm1, %v331_v9 }
  0xd9   :  { %v306_v11 = vpop.f32.mrb[0].mxu0  ;;  %v314_v14 = vpop.f32.mrb[0].mxu1 }
  0xda   :  { %v154_v13 = vadd.f32 %v306_v11, %v395_v10  ;;  %v145_v16 = vpop.f32.mrb[1].mxu0  ;;  %v186_v18 = vadd.f32 %v314_v14, %v395_v10  ;;  %v177_v20 = vpop.f32.mrb[1].mxu1 }
  0xdb   :  { %v146_v19 = vadd.f32 %v395_v10, %v145_v16  ;;  %v307_v22 = vpop.f32.mrb[2].mxu0  ;;  %v178_v25 = vadd.f32 %v395_v10, %v177_v20  ;;  %v315_v27 = vpop.f32.mrb[2].mxu1 }
  0xdc   :  { %v226_v24 = vadd.f32 %v210_v12, %v154_v13  ;;  %v157_v26 = vadd.f32 %v307_v22, %v395_v10  ;;  %v148_v29 = vpop.f32.mrb[3].mxu0  ;;  %v234_v31 = vadd.f32 %v218_v15, %v186_v18  ;;  %v189_v33 = vadd.f32 %v315_v27, %v395_v10  ;;  %v180_v35 = vpop.f32.mrb[3].mxu1  ;;  %v221_v13 = vld [vmem:[%s528_s3 + $0x68] sm:$0xff] }
  0xdd   :  { %v224_v32 = vadd.f32 %v208_v17, %v146_v19  ;;  %v149_v34 = vadd.f32 %v395_v10, %v148_v29  ;;  %v232_v38 = vadd.f32 %v216_v21, %v178_v25  ;;  %v181_v40 = vadd.f32 %v395_v10, %v180_v35 }
  0xde   :  { %v242_v37 = vmax.f32 %v226_v24, 0.0  ;;  %v227_v39 = vadd.f32 %v211_v23, %v157_v26  ;;  %v250_v41 = vmax.f32 %v234_v31, 0.0  ;;  %v235_v43 = vadd.f32 %v219_v28, %v189_v33 }
  0xdf   :  { %v240_v42 = vmax.f32 %v224_v32, 0.0  ;;  %v225_v44 = vadd.f32 %v209_v30, %v149_v34  ;;  %v248_v45 = vmax.f32 %v232_v38, 0.0  ;;  %v233_v47 = vadd.f32 %v217_v36, %v181_v40 }
  0xe0   :  { %258 = vst.msk [vmem:[%s529_s4 + $0x10] sm:$0xff] %vm82_vm1, %v242_v37  ;;  %v243_v46 = vmax.f32 %v227_v39, 0.0  ;;  %266 = vst.msk [vmem:[%s529_s4 + $0x50] sm:$0xff] %vm82_vm1, %v250_v41  ;;  %v251_v48 = vmax.f32 %v235_v43, 0.0 }
  0xe1   :  { %256 = vst.msk [vmem:[%s529_s4] sm:$0xff] %vm82_vm1, %v240_v42  ;;  %v241_v49 = vmax.f32 %v225_v44, 0.0  ;;  %v310_v50 = vpop.f32.mrb[4].mxu0  ;;  %264 = vst.msk [vmem:[%s529_s4 + $0x40] sm:$0xff] %vm82_vm1, %v248_v45  ;;  %v249_v52 = vmax.f32 %v233_v47, 0.0  ;;  %v318_v54 = vpop.f32.mrb[4].mxu1 }
  0xe2   :  { %259 = vst.msk [vmem:[%s529_s4 + $0x18] sm:$0xff] %vm82_vm1, %v243_v46  ;;  %v170_v53 = vadd.f32 %v310_v50, %v395_v10  ;;  %v161_v56 = vpop.f32.mrb[5].mxu0  ;;  %267 = vst.msk [vmem:[%s529_s4 + $0x58] sm:$0xff] %vm82_vm1, %v251_v48  ;;  %v202_v58 = vadd.f32 %v318_v54, %v395_v10  ;;  %v193_v60 = vpop.f32.mrb[5].mxu1 }
  0xe3   :  { %257 = vst.msk [vmem:[%s529_s4 + $0x8] sm:$0xff] %vm82_vm1, %v241_v49  ;;  %v162_v59 = vadd.f32 %v395_v10, %v161_v56  ;;  %v311_v62 = vpop.f32.mrb[6].mxu0  ;;  %265 = vst.msk [vmem:[%s529_s4 + $0x48] sm:$0xff] %vm82_vm1, %v249_v52  ;;  %v194_v1 = vadd.f32 %v395_v10, %v193_v60  ;;  %v319_v3 = vpop.f32.mrb[6].mxu1 }
  0xe4   :  { %v230_v0 = vadd.f32 %v214_v51, %v170_v53  ;;  %v173_v2 = vadd.f32 %v311_v62, %v395_v10  ;;  %v164_v5 = vpop.f32.mrb[7].mxu0  ;;  %v238_v7 = vadd.f32 %v222_v55, %v202_v58  ;;  %v205_v9 = vadd.f32 %v319_v3, %v395_v10  ;;  %v196_v12 = vpop.f32.mrb[7].mxu1 }
  0xe5   :  { %v228_v8 = vadd.f32 %v212_v57, %v162_v59  ;;  %v165_v11 = vadd.f32 %v395_v10, %v164_v5  ;;  %v236_v15 = vadd.f32 %v220_v61, %v194_v1  ;;  %v197_v17 = vadd.f32 %v395_v10, %v196_v12 }
  0xe6   :  { %v246_v14 = vmax.f32 %v230_v0, 0.0  ;;  %v231_v16 = vadd.f32 %v215_v63, %v173_v2  ;;  %v254_v18 = vmax.f32 %v238_v7, 0.0  ;;  %v239_v20 = vadd.f32 %v223_v4, %v205_v9 }
  0xe7   :  { %v244_v19 = vmax.f32 %v228_v8, 0.0  ;;  %v229_v21 = vadd.f32 %v213_v6, %v165_v11  ;;  %v252_v22 = vmax.f32 %v236_v15, 0.0  ;;  %v237_v24 = vadd.f32 %v221_v13, %v197_v17 }
  0xe8   :  { %262 = vst.msk [vmem:[%s529_s4 + $0x30] sm:$0xff] %vm82_vm1, %v246_v14  ;;  %v247_v23 = vmax.f32 %v231_v16, 0.0  ;;  %270 = vst.msk [vmem:[%s529_s4 + $0x70] sm:$0xff] %vm82_vm1, %v254_v18  ;;  %v255_v10 = vmax.f32 %v239_v20, 0.0 }
  0xe9   :  { %260 = vst.msk [vmem:[%s529_s4 + $0x20] sm:$0xff] %vm82_vm1, %v244_v19  ;;  %v245_v25 = vmax.f32 %v229_v21, 0.0  ;;  %268 = vst.msk [vmem:[%s529_s4 + $0x60] sm:$0xff] %vm82_vm1, %v252_v22  ;;  %v253_v26 = vmax.f32 %v237_v24, 0.0 }
  0xea   :  { %263 = vst.msk [vmem:[%s529_s4 + $0x38] sm:$0xff] %vm82_vm1, %v247_v23  ;;  %271 = vst.msk [vmem:[%s529_s4 + $0x78] sm:$0xff] %vm82_vm1, %v255_v10 }
  0xeb   :  { %261 = vst.msk [vmem:[%s529_s4 + $0x28] sm:$0xff] %vm82_vm1, %v245_v25  ;;  %269 = vst.msk [vmem:[%s529_s4 + $0x68] sm:$0xff] %vm82_vm1, %v253_v26 }

// kernel: resunet_forward.27
= control target key start
LH: loop header
LB: loop body
LE: loop exit
PB: predicated region body
PF: predicated region fallthrough
CT: control target
= control target key end

     0   :  { %vm151_vm0 = vcmask 130048   ;;  %s276_s1 = inlined_call_operand.vmem [shape: bf16[128,16], index: 1, kind: input, shape index: {}]   ;;  %s277_s0 = inlined_call_operand.vmem [shape: bf16[32,128], index: 0, kind: input, shape index: {}]   ;;  %s278_s2 = inlined_call_operand.vmem [shape: f32[1,16], index: 2, kind: input, shape index: {}]   ;;  %s279_s3 = inlined_call_operand.vmem [shape: f32[32,16], index: 3, kind: output, shape index: {}]  }
   0x1   :  { %v201_v0 = vld [vmem:[%s276_s1] sm:$0xff]   ;;  %v202_v1 = vld [vmem:[%s276_s1 + $0x8] sm:$0xff]   ;;  %v203_v2 = vld [vmem:[%s276_s1 + $0x10] sm:$0xff]  }
   0x2   :  { %181 = vmatprep.subr.bf16.mxu0 %v201_v0  ;;  %v204_v3 = vld [vmem:[%s276_s1 + $0x18] sm:$0xff]   ;;  %v209_v4 = vld [vmem:[%s277_s0] sm:$0xff]   ;;  %v206_v6 = vld [vmem:[%s276_s1 + $0x28] sm:$0xff]  }
   0x3   :  { %182 = vmatpush3.bf16.msra.mxu0 %v201_v0  ;;  %197 = vmatprep.mubr.bf16.mxu0 %v209_v4  ;;  %v205_v5 = vld [vmem:[%s276_s1 + $0x20] sm:$0xff]   ;;  %v207_v7 = vld [vmem:[%s276_s1 + $0x30] sm:$0xff]   ;;  %v208_v8 = vld [vmem:[%s276_s1 + $0x38] sm:$0xff]  }
   0x4   :  { %183 = vmatprep.subr.bf16.mxu0 %v202_v1  ;;  %v210_v9 = vld [vmem:[%s277_s0 + $0x8] sm:$0xff]   ;;  %v160_v10 = vld [vmem:[%s278_s2] ss:$0 sm:$0xff] }
   0x7   :  { %184 = vmatpush3.bf16.msra.mxu0 %v202_v1 }
   0x8   :  { %185 = vmatprep.subr.bf16.mxu0 %v203_v2 }
   0xb   :  { %186 = vmatpush3.bf16.msra.mxu0 %v203_v2 }
   0xc   :  { %187 = vmatprep.subr.bf16.mxu0 %v204_v3 }
   0xf   :  { %188 = vmatpush3.bf16.msra.mxu0 %v204_v3 }
  0x10   :  { %189 = vmatprep.subr.bf16.mxu0 %v205_v5 }
  0x13   :  { %190 = vmatpush3.bf16.msra.mxu0 %v205_v5 }
  0x14   :  { %191 = vmatprep.subr.bf16.mxu0 %v206_v6 }
  0x17   :  { %192 = vmatpush3.bf16.msra.mxu0 %v206_v6 }
  0x18   :  { %193 = vmatprep.subr.bf16.mxu0 %v207_v7 }
  0x1b   :  { %194 = vmatpush3.bf16.msra.mxu0 %v207_v7 }
  0x1c   :  { %195 = vmatprep.subr.bf16.mxu0 %v208_v8 }
  0x1f   :  { %196 = vmatpush3.bf16.msra.mxu0 %v208_v8 }
  0x22   :  { %198 = vmatmul.mubr.bf16.vlgmr.msra.gmra.mrb[0].mxu0 %v210_v9 }
  0xf5   :  { %v199_v11 = vpop.f32.mrb[0].mxu0 }
  0xf6   :  { %v145_v12 = vadd.f32 %v199_v11, %v160_v10  ;;  %v136_v13 = vpop.f32.mrb[1].mxu0 }
  0xf7   :  { %v137_v14 = vadd.f32 %v160_v10, %v136_v13  ;;  %v200_v15 = vpop.f32.mrb[2].mxu0 }
  0xf8   :  { %154 = vst.msk [vmem:[%s279_s3 + $0x10] sm:$0xff] %vm151_vm0, %v145_v12  ;;  %v148_v16 = vadd.f32 %v200_v15, %v160_v10  ;;  %v139_v17 = vpop.f32.mrb[3].mxu0 }
  0xf9   :  { %152 = vst.msk [vmem:[%s279_s3] sm:$0xff] %vm151_vm0, %v137_v14  ;;  %v140_v18 = vadd.f32 %v160_v10, %v139_v17 }
  0xfa   :  { %155 = vst.msk [vmem:[%s279_s3 + $0x18] sm:$0xff] %vm151_vm0, %v148_v16 }
  0xfb   :  { %153 = vst.msk [vmem:[%s279_s3 + $0x8] sm:$0xff] %vm151_vm0, %v140_v18 }

// kernel: resunet_forward.28
= control target key start
LH: loop header
LB: loop body
LE: loop exit
PB: predicated region body
PF: predicated region fallthrough
CT: control target
= control target key end

     0   :  { %v230_v0 = vmov 0   ;;  %vm116_vm0 = vcmask 130048   ;;  %s311_s1 = inlined_call_operand.vmem [shape: bf16[144,16], index: 1, kind: input, shape index: {}]   ;;  %s312_s0 = inlined_call_operand.vmem [shape: bf16[32,144], index: 0, kind: input, shape index: {}]   ;;  %s313_s2 = inlined_call_operand.vmem [shape: f32[1,16], index: 2, kind: input, shape index: {}]   ;;  %s314_s3 = inlined_call_operand.vmem [shape: f32[32,16], index: 3, kind: output, shape index: {}]  }
   0x1   :  { %123 = vmatprep.subr.bf16.mxu0 %v230_v0  ;;  %196 = vmatprep.subr.bf16.mxu1 %v230_v0  ;;  %v215_v1 = vld [vmem:[%s311_s1] sm:$0xff]   ;;  %v216_v2 = vld [vmem:[%s311_s1 + $0x8] sm:$0xff]   ;;  %v217_v3 = vld [vmem:[%s311_s1 + $0x10] sm:$0xff]  }
   0x2   :  { %124 = vmatpush1.bf16.msra.mxu0 %v215_v1  ;;  %205 = vmatpush1.bf16.msra.mxu1 %v215_v1  ;;  %v218_v4 = vld [vmem:[%s311_s1 + $0x18] sm:$0xff]   ;;  %v226_v5 = vld [vmem:[%s312_s0 + $0x4] ss:$8 sps:$4 sm:$0xff]   ;;  %v221_v9 = vld [vmem:[%s311_s1 + $0x30] sm:$0xff]  }
   0x3   :  { %125 = vmatprep.subr.bf16.mxu0 %v230_v0  ;;  %197 = vmatprep.subr.bf16.mxu1 %v230_v0  ;;  %v229_v6 = vld [vmem:[%s312_s0 + $0x14] ss:$8 sps:$4 sm:$0xff]   ;;  %v219_v7 = vld [vmem:[%s311_s1 + $0x20] sm:$0xff]   ;;  %v220_v8 = vld [vmem:[%s311_s1 + $0x28] sm:$0xff]  }
   0x4   :  { %194 = vmatprep.mubr.msk.bf16.mxu0 %vm116_vm0, %v226_v5  ;;  %195 = vmatprep.mubr.msk.bf16.mxu1 %vm116_vm0, %v229_v6  ;;  %v222_v10 = vld [vmem:[%s311_s1 + $0x38] sm:$0xff]   ;;  %v223_v11 = vld [vmem:[%s311_s1 + $0x40] sm:$0xff]  }
   0x5   :  { %v224_v12 = vld [vmem:[%s312_s0] ss:$8 sps:$4 sm:$0xff]   ;;  %v227_v13 = vld [vmem:[%s312_s0 + $0x10] ss:$8 sps:$4 sm:$0xff]  }
   0x6   :  { %126 = vmatpush1.bf16.msra.mxu0 %v216_v2  ;;  %206 = vmatpush1.bf16.msra.mxu1 %v216_v2  ;;  %v180_v14 = vld [vmem:[%s313_s2] ss:$0 sm:$0xff] }
   0x7   :  { %127 = vmatprep.subr.bf16.mxu0 %v230_v0  ;;  %198 = vmatprep.subr.bf16.mxu1 %v230_v0 }
   0xa   :  { %128 = vmatpush1.bf16.msra.mxu0 %v217_v3  ;;  %207 = vmatpush1.bf16.msra.mxu1 %v217_v3 }
   0xb   :  { %129 = vmatprep.subr.bf16.mxu0 %v230_v0  ;;  %199 = vmatprep.subr.bf16.mxu1 %v230_v0 }
   0xe   :  { %130 = vmatpush1.bf16.msra.mxu0 %v218_v4  ;;  %208 = vmatpush1.bf16.msra.mxu1 %v218_v4 }
   0xf   :  { %131 = vmatprep.subr.bf16.mxu0 %v230_v0  ;;  %200 = vmatprep.subr.bf16.mxu1 %v230_v0 }
  0x12   :  { %132 = vmatpush1.bf16.msra.mxu0 %v219_v7  ;;  %209 = vmatpush1.bf16.msra.mxu1 %v219_v7 }
  0x13   :  { %133 = vmatprep.subr.bf16.mxu0 %v230_v0  ;;  %201 = vmatprep.subr.bf16.mxu1 %v230_v0 }
  0x16   :  { %134 = vmatpush1.bf16.msra.mxu0 %v220_v8  ;;  %210 = vmatpush1.bf16.msra.mxu1 %v220_v8 }
  0x17   :  { %135 = vmatprep.subr.bf16.mxu0 %v230_v0  ;;  %202 = vmatprep.subr.bf16.mxu1 %v230_v0 }
  0x1a   :  { %136 = vmatpush1.bf16.msra.mxu0 %v221_v9  ;;  %211 = vmatpush1.bf16.msra.mxu1 %v221_v9 }
  0x1b   :  { %137 = vmatprep.subr.bf16.mxu0 %v230_v0  ;;  %203 = vmatprep.subr.bf16.mxu1 %v230_v0 }
  0x1e   :  { %138 = vmatpush1.bf16.msra.mxu0 %v222_v10  ;;  %212 = vmatpush1.bf16.msra.mxu1 %v222_v10 }
  0x1f   :  { %139 = vmatprep.subr.bf16.mxu0 %v230_v0  ;;  %204 = vmatprep.subr.bf16.mxu1 %v230_v0 }
  0x22   :  { %140 = vmatpush1.bf16.msra.mxu0 %v223_v11  ;;  %213 = vmatpush1.bf16.msra.mxu1 %v223_v11 }
  0x25   :  { %156 = vmatmul.mubr.bf16.vlgmr.msra.gmra.mrb[0].mxu0 %v224_v12  ;;  %164 = vmatmul.mubr.bf16.vlgmr.msra.gmra.mrb[0].mxu1 %v227_v13 }
  0xf8   :  { %v157_v15 = vpop.f32.mrb[0].mxu0  ;;  %v165_v16 = vpop.f32.mrb[0].mxu1 }
  0xf9   :  { %v158_v17 = vadd.f32 %v180_v14, %v157_v15  ;;  %v166_v18 = vadd.f32 %v180_v14, %v165_v16  ;;  %v159_v19 = vpop.f32.mrb[1].mxu0  ;;  %v167_v20 = vpop.f32.mrb[1].mxu1 }
  0xfa   :  { %v160_v21 = vpop.f32.mrb[2].mxu0  ;;  %v168_v22 = vpop.f32.mrb[2].mxu1 }
  0xfb   :  { %172 = vst.msk [vmem:[%s314_s3] sm:$0xff] %vm116_vm0, %v158_v17  ;;  %174 = vst.msk [vmem:[%s314_s3 + $0x10] sm:$0xff] %vm116_vm0, %v166_v18  ;;  %v161_v23 = vadd.f32 %v180_v14, %v160_v21  ;;  %v169_v24 = vadd.f32 %v180_v14, %v168_v22  ;;  %v162_v25 = vpop.f32.mrb[3].mxu0  ;;  %v170_v26 = vpop.f32.mrb[3].mxu1 }
  0xfd   :  { %173 = vst.msk [vmem:[%s314_s3 + $0x8] sm:$0xff] %vm116_vm0, %v161_v23  ;;  %175 = vst.msk [vmem:[%s314_s3 + $0x18] sm:$0xff] %vm116_vm0, %v169_v24 }

// kernel: resunet_forward.29
= control target key start
LH: loop header
LB: loop body
LE: loop exit
PB: predicated region body
PF: predicated region fallthrough
CT: control target
= control target key end

     0   :  { %vm47_vm0 = vcmask 1043456   ;;  %vm40_vm1 = vcmask 64512   ;;  %vm112_vm2 = vcmask 130048   ;;  %s199_s1 = inlined_call_operand.vmem [shape: bf16[8,16], index: 1, kind: input, shape index: {}]   ;;  %s200_s0 = inlined_call_operand.vmem [shape: bf16[32,8], index: 0, kind: input, shape index: {}]   ;;  %s201_s2 = inlined_call_operand.vmem [shape: f32[1,16], index: 2, kind: input, shape index: {}]   ;;  %s202_s3 = inlined_call_operand.vmem [shape: f32[32,16], index: 3, kind: input, shape index: {}]   ;;  %s203_s4 = inlined_call_operand.vmem [shape: f32[32,16], index: 4, kind: output, shape index: {}]  }
   0x1   :  { %v22_v0 = vld [vmem:[%s199_s1] sm:$0xf]  ;;  %v137_v3 = vld [vmem:[%s200_s0 + $0x8] sm:$0xff]   ;;  %v102_v6 = vld [vmem:[%s202_s3 + $0x10] sm:$0xff] }
   0x2   :  { %135 = vmatprep.subr.msk.bf16.mxu0 %vm47_vm0, %v22_v0  ;;  %v49_v1 = vsel %vm47_vm0, %v22_v0, 0  ;;  %v136_v2 = vld [vmem:[%s200_s0] sm:$0xff]   ;;  %v103_v12 = vld [vmem:[%s202_s3 + $0x18] sm:$0xff]  ;;  %v101_v16 = vld [vmem:[%s202_s3 + $0x8] sm:$0xff] }
   0x3   :  { %130 = vmatpush3.bf16.msra.mxu0 %v49_v1  ;;  %131 = vmatprep.mubr.msk.bf16.mxu0 %vm40_vm1, %v136_v2  ;;  %v121_v4 = vld [vmem:[%s201_s2] ss:$0 sm:$0xff] }
   0x4   :  { %v100_v9 = vld [vmem:[%s202_s3] sm:$0xff] }
   0x6   :  { %132 = vmatmul.mubr.msk.bf16.vlgmr.msra.gmra.mrb[0].mxu0 %vm40_vm1, %v137_v3 }
  0xd9   :  { %v133_v5 = vpop.f32.mrb[0].mxu0 }
  0xda   :  { %v94_v7 = vadd.f32 %v133_v5, %v121_v4  ;;  %v85_v8 = vpop.f32.mrb[1].mxu0 }
  0xdb   :  { %v86_v10 = vadd.f32 %v121_v4, %v85_v8  ;;  %v134_v11 = vpop.f32.mrb[2].mxu0 }
  0xdc   :  { %v106_v13 = vadd.f32 %v102_v6, %v94_v7  ;;  %v97_v14 = vadd.f32 %v134_v11, %v121_v4  ;;  %v88_v15 = vpop.f32.mrb[3].mxu0 }
  0xdd   :  { %v104_v17 = vadd.f32 %v100_v9, %v86_v10  ;;  %v89_v18 = vadd.f32 %v121_v4, %v88_v15 }
  0xde   :  { %v110_v19 = vmax.f32 %v106_v13, 0.0  ;;  %v107_v20 = vadd.f32 %v103_v12, %v97_v14 }
  0xdf   :  { %v108_v21 = vmax.f32 %v104_v17, 0.0  ;;  %v105_v22 = vadd.f32 %v101_v16, %v89_v18 }
  0xe0   :  { %115 = vst.msk [vmem:[%s203_s4 + $0x10] sm:$0xff] %vm112_vm2, %v110_v19  ;;  %v111_v23 = vmax.f32 %v107_v20, 0.0 }
  0xe1   :  { %113 = vst.msk [vmem:[%s203_s4] sm:$0xff] %vm112_vm2, %v108_v21  ;;  %v109_v24 = vmax.f32 %v105_v22, 0.0 }
  0xe2   :  { %116 = vst.msk [vmem:[%s203_s4 + $0x18] sm:$0xff] %vm112_vm2, %v111_v23 }
  0xe3   :  { %114 = vst.msk [vmem:[%s203_s4 + $0x8] sm:$0xff] %vm112_vm2, %v109_v24 }

// kernel: resunet_forward.30
= control target key start
LH: loop header
LB: loop body
LE: loop exit
PB: predicated region body
PF: predicated region fallthrough
CT: control target
= control target key end

     0   :  { %vm198_vm0 = vcmask 130048   ;;  %s340_s1 = inlined_call_operand.vmem [shape: bf16[256,16], index: 1, kind: input, shape index: {}]   ;;  %s341_s0 = inlined_call_operand.vmem [shape: bf16[8,256], index: 0, kind: input, shape index: {}]   ;;  %s342_s2 = inlined_call_operand.vmem [shape: f32[1,16], index: 2, kind: input, shape index: {}]   ;;  %s343_s3 = inlined_call_operand.vmem [shape: f32[8,16], index: 3, kind: output, shape index: {}]  }
   0x1   :  { %v245_v0 = vld [vmem:[%s340_s1 + $0x40] sm:$0xff]   ;;  %v247_v2 = vld [vmem:[%s340_s1 + $0x48] sm:$0xff]   ;;  %v249_v4 = vld [vmem:[%s340_s1 + $0x50] sm:$0xff]  }
   0x2   :  { %v246_v1 = vld [vmem:[%s340_s1] sm:$0xff]   ;;  %223 = vmatprep.subr.bf16.mxu0 %v245_v0  ;;  %v248_v3 = vld [vmem:[%s340_s1 + $0x8] sm:$0xff]   ;;  %v250_v5 = vld [vmem:[%s340_s1 + $0x10] sm:$0xff]  }
   0x3   :  { %224 = vmatpush3.bf16.msra.mxu0 %v246_v1  ;;  %v251_v6 = vld [vmem:[%s340_s1 + $0x58] sm:$0xff]   ;;  %v253_v8 = vld [vmem:[%s340_s1 + $0x60] sm:$0xff]   ;;  %v255_v10 = vld [vmem:[%s340_s1 + $0x68] sm:$0xff]  }
   0x4   :  { %225 = vmatprep.subr.bf16.mxu0 %v247_v2  ;;  %v252_v7 = vld [vmem:[%s340_s1 + $0x18] sm:$0xff]   ;;  %v254_v9 = vld [vmem:[%s340_s1 + $0x20] sm:$0xff]   ;;  %v256_v13 = vld [vmem:[%s340_s1 + $0x28] sm:$0xff]  }
   0x5   :  { %v15_v11 = vld [vmem:[%s341_s0] sm:$0xff]  ;;  %v257_v14 = vld [vmem:[%s340_s1 + $0x70] sm:$0xff]   ;;  %v259_v16 = vld [vmem:[%s340_s1 + $0x78] sm:$0xff]  }
   0x6   :  { %v206_v12 = vcombine.high %v15_v11, %v15_v11  ;;  %v258_v15 = vld [vmem:[%s340_s1 + $0x30] sm:$0xff]   ;;  %v260_v17 = vld [vmem:[%s340_s1 + $0x38] sm:$0xff]   ;;  %v205_v18 = vcombine.low %v15_v11, %v15_v11  ;;  %v204_v20 = vld [vmem:[%s342_s2] ss:$0 sm:$0xff] }
   0x7   :  { %226 = vmatpush3.bf16.msra.mxu0 %v248_v3 }
   0x8   :  { %227 = vmatprep.subr.bf16.mxu0 %v249_v4  ;;  %190 = vmatprep.mubr.bf16.mxu0 %v206_v12 }
   0xb   :  { %228 = vmatpush3.bf16.msra.mxu0 %v250_v5 }
   0xc   :  { %229 = vmatprep.subr.bf16.mxu0 %v251_v6 }
   0xf   :  { %230 = vmatpush3.bf16.msra.mxu0 %v252_v7 }
  0x10   :  { %231 = vmatprep.subr.bf16.mxu0 %v253_v8 }
  0x13   :  { %232 = vmatpush3.bf16.msra.mxu0 %v254_v9 }
  0x14   :  { %233 = vmatprep.subr.bf16.mxu0 %v255_v10 }
  0x17   :  { %234 = vmatpush3.bf16.msra.mxu0 %v256_v13 }
  0x18   :  { %235 = vmatprep.subr.bf16.mxu0 %v257_v14 }
  0x1b   :  { %236 = vmatpush3.bf16.msra.mxu0 %v258_v15 }
  0x1c   :  { %237 = vmatprep.subr.bf16.mxu0 %v259_v16 }
  0x1f   :  { %238 = vmatpush3.bf16.msra.mxu0 %v260_v17 }
  0x22   :  { %191 = vmatmul.mubr.bf16.vlgmr.msra.gmra.mrb[0].mxu0 %v205_v18 }
  0xf5   :  { %v239_v19 = vpop.f32.mrb[0].mxu0 }
  0xf6   :  { %v240_v21 = vpop.f32.mrb[1].mxu0 }
  0xf7   :  { %v241_v22 = vadd.f32 %v240_v21, %v239_v19  ;;  %v242_v23 = vpop.f32.mrb[2].mxu0 }
  0xf8   :  { %v243_v24 = vpop.f32.mrb[3].mxu0 }
  0xf9   :  { %v193_v25 = vadd.f32 %v241_v22, %v204_v20 }
  0xfb   :  { %199 = vst.msk [vmem:[%s343_s3] sm:$0xff] %vm198_vm0, %v193_v25 }

// kernel: resunet_forward.31
= control target key start
LH: loop header
LB: loop body
LE: loop exit
PB: predicated region body
PF: predicated region fallthrough
CT: control target
= control target key end

     0   :  { %v175_v0 = vmov 0   ;;  %vm101_vm0 = vcmask 130048   ;;  %s234_s1 = inlined_call_operand.vmem [shape: bf16[144,16], index: 1, kind: input, shape index: {}]   ;;  %s235_s0 = inlined_call_operand.vmem [shape: bf16[8,144], index: 0, kind: input, shape index: {}]   ;;  %s236_s2 = inlined_call_operand.vmem [shape: f32[1,16], index: 2, kind: input, shape index: {}]   ;;  %s237_s3 = inlined_call_operand.vmem [shape: f32[8,16], index: 3, kind: output, shape index: {}]  }
   0x1   :  { %105 = vmatprep.subr.bf16.mxu0 %v175_v0  ;;  %v164_v1 = vld [vmem:[%s234_s1] sm:$0xff]   ;;  %v165_v2 = vld [vmem:[%s234_s1 + $0x8] sm:$0xff]   ;;  %v166_v3 = vld [vmem:[%s234_s1 + $0x10] sm:$0xff]  }
   0x2   :  { %106 = vmatpush1.bf16.msra.mxu0 %v164_v1  ;;  %v15_v4 = vld [vmem:[%s235_s0] sm:$0xff]  ;;  %v167_v5 = vld [vmem:[%s234_s1 + $0x18] sm:$0xff]   ;;  %v169_v8 = vld [vmem:[%s234_s1 + $0x28] sm:$0xff]  }
   0x3   :  { %107 = vmatprep.subr.bf16.mxu0 %v175_v0  ;;  %v152_v6 = vcombine.high %v15_v4, %v15_v4  ;;  %v168_v7 = vld [vmem:[%s234_s1 + $0x20] sm:$0xff]   ;;  %v170_v9 = vld [vmem:[%s234_s1 + $0x30] sm:$0xff]   ;;  %v171_v10 = vld [vmem:[%s234_s1 + $0x38] sm:$0xff]   ;;  %v151_v12 = vcombine.low %v15_v4, %v15_v4 }
   0x4   :  { %v172_v11 = vld [vmem:[%s234_s1 + $0x40] sm:$0xff]  }
   0x5   :  { %162 = vmatprep.mubr.msk.bf16.mxu0 %vm101_vm0, %v152_v6  ;;  %v150_v13 = vld [vmem:[%s236_s2] ss:$0 sm:$0xff] }
   0x6   :  { %108 = vmatpush1.bf16.msra.mxu0 %v165_v2 }
   0x7   :  { %109 = vmatprep.subr.bf16.mxu0 %v175_v0 }
   0xa   :  { %110 = vmatpush1.bf16.msra.mxu0 %v166_v3 }
   0xb   :  { %111 = vmatprep.subr.bf16.mxu0 %v175_v0 }
   0xe   :  { %112 = vmatpush1.bf16.msra.mxu0 %v167_v5 }
   0xf   :  { %113 = vmatprep.subr.bf16.mxu0 %v175_v0 }
  0x12   :  { %114 = vmatpush1.bf16.msra.mxu0 %v168_v7 }
  0x13   :  { %115 = vmatprep.subr.bf16.mxu0 %v175_v0 }
  0x16   :  { %116 = vmatpush1.bf16.msra.mxu0 %v169_v8 }
  0x17   :  { %117 = vmatprep.subr.bf16.mxu0 %v175_v0 }
  0x1a   :  { %118 = vmatpush1.bf16.msra.mxu0 %v170_v9 }
  0x1b   :  { %119 = vmatprep.subr.bf16.mxu0 %v175_v0 }
  0x1e   :  { %120 = vmatpush1.bf16.msra.mxu0 %v171_v10 }
  0x1f   :  { %121 = vmatprep.subr.bf16.mxu0 %v175_v0 }
  0x22   :  { %122 = vmatpush1.bf16.msra.mxu0 %v172_v11 }
  0x25   :  { %138 = vmatmul.mubr.bf16.vlgmr.msra.gmra.mrb[0].mxu0 %v151_v12 }
  0xf8   :  { %v139_v14 = vpop.f32.mrb[0].mxu0 }
  0xf9   :  { %v140_v15 = vadd.f32 %v150_v13, %v139_v14  ;;  %v141_v16 = vpop.f32.mrb[1].mxu0 }
  0xfa   :  { %v142_v17 = vpop.f32.mrb[2].mxu0 }
  0xfb   :  { %145 = vst.msk [vmem:[%s237_s3] sm:$0xff] %vm101_vm0, %v140_v15  ;;  %v143_v18 = vpop.f32.mrb[3].mxu0 }

// kernel: resunet_forward.32
= control target key start
LH: loop header
LB: loop body
LE: loop exit
PB: predicated region body
PF: predicated region fallthrough
CT: control target
= control target key end

     0   :  { %v100_v0 = vmov 0.0   ;;  %vm101_vm0 = vmmov 0   ;;  %vm34_vm1 = vcmask 130048   ;;  %s142_s1 = inlined_call_operand.vmem [shape: bf16[16,16], index: 1, kind: input, shape index: {}]   ;;  %s143_s0 = inlined_call_operand.vmem [shape: bf16[8,16], index: 0, kind: input, shape index: {}]   ;;  %s144_s2 = inlined_call_operand.vmem [shape: f32[1,16], index: 2, kind: input, shape index: {}]   ;;  %s145_s3 = inlined_call_operand.vmem [shape: f32[8,16], index: 3, kind: input, shape index: {}]   ;;  %s146_s4 = inlined_call_operand.vmem [shape: f32[8,16], index: 4, kind: output, shape index: {}]  }
   0x1   :  { %91 = vmatprep.subr.bf16.mxu0 %v100_v0  ;;  %v99_v1 = vld [vmem:[%s142_s1] sm:$0xff]   ;;  %93 = vmatprep.mubr.msk.bf16.mxu0 %vm101_vm0, %v100_v0 }
   0x2   :  { %92 = vmatpush3.bf16.msra.mxu0 %v99_v1  ;;  %v18_v2 = vld [vmem:[%s143_s0] sm:$0xf] }
   0x3   :  { %v86_v3 = vld [vmem:[%s144_s2] ss:$0 sm:$0xff] }
   0x4   :  { %v78_v5 = vld [vmem:[%s145_s3] sm:$0xff] }
   0x5   :  { %94 = vmatmul.mubr.msk.bf16.vlgmr.msra.gmra.mrb[0].mxu0 %vm34_vm1, %v18_v2 }
  0xd8   :  { %v72_v4 = vpop.f32.mrb[0].mxu0 }
  0xd9   :  { %v73_v6 = vadd.f32 %v86_v3, %v72_v4  ;;  %v95_v7 = vpop.f32.mrb[1].mxu0 }
  0xda   :  { %v75_v8 = vpop.f32.mrb[2].mxu0 }
  0xdb   :  { %v79_v9 = vadd.f32 %v78_v5, %v73_v6  ;;  %v96_v10 = vpop.f32.mrb[3].mxu0 }
  0xdd   :  { %v80_v11 = vmax.f32 %v79_v9, 0.0 }
  0xdf   :  { %81 = vst.msk [vmem:[%s146_s4] sm:$0xff] %vm34_vm1, %v80_v11 }

// kernel: tile.38
= control target key start
LH: loop header
LB: loop body
LE: loop exit
PB: predicated region body
PF: predicated region fallthrough
CT: control target
= control target key end

     0   :  { %s22_s0 = inlined_call_operand.vmem [shape: f32[16], index: 0, kind: input, shape index: {}]   ;;  %s23_s1 = inlined_call_operand.vmem [shape: f32[4,16], index: 1, kind: output, shape index: {}]  }
   0x1   :  { %v4_v0 = vld [vmem:[%s22_s0] ss:$0 sm:$0xff] }
   0x2   :  { %5 = vst [vmem:[%s23_s1] sm:$0xf] %v4_v0 }

// kernel: tile.39
= control target key start
LH: loop header
LB: loop body
LE: loop exit
PB: predicated region body
PF: predicated region fallthrough
CT: control target
= control target key end

     0   :  { %vm7_vm0 = vcmask 130048   ;;  %s37_s8 = smov 16   ;;  %s38_s9 = smov 32   ;;  %vm13_vm1 = vcmask 523648   ;;  %vm19_vm2 = vcmask 392448   ;;  %vm25_vm3 = vcmask 261248   ;;  %s55_s0 = inlined_call_operand.vmem [shape: f32[4,16], index: 0, kind: input, shape index: {}]   ;;  %s56_s1 = inlined_call_operand.vmem [shape: f32[1,64], index: 1, kind: output, shape index: {}]  }
   0x1   :  { %v4_v0 = vld [vmem:[%s55_s0] sm:$0xf]  ;;  %s36_s0 = smov 48  }
   0x2   :  { %5 = vst [vmem:[#allocation1] sm:$0xf] %v4_v0 }
   0x9   :  { %v10_v1 = vld [vmem:[#allocation1 + $0x3] sm:$0x1]   ;;  %v22_v2 = vld [vmem:[#allocation1 + $0x1] sm:$0x1]   ;;  %v6_v3 = vld [vmem:[#allocation1] sm:$0x1]  }
   0xa   :  { %11 = vrot.lane.b32.xlu0 %v10_v1, %s36_s0  ;;  %23 = vrot.lane.b32.xlu1 %v22_v2, %s37_s8  ;;  %v16_v4 = vld [vmem:[#allocation1 + $0x2] sm:$0x1]   ;;  %8 = vst.msk [vmem:[#allocation0] sm:$0x1] %vm7_vm0, %v6_v3  }
   0xe   :  { %17 = vrot.lane.b32.xlu0 %v16_v4, %s38_s9 }
  0x7c   :  { %v12_v5 = vpop.permute.xlu0 %11   ;;  %v24_v6 = vpop.permute.xlu1 %23  }
  0x7d   :  { %14 = vst.msk [vmem:[#allocation0] sm:$0x1] %vm13_vm1, %v12_v5  }
  0x80   :  { %v18_v7 = vpop.permute.xlu0 %17  }
  0x81   :  { %20 = vst.msk [vmem:[#allocation0] sm:$0x1] %vm19_vm2, %v18_v7  }
  0x82   :  { %26 = vst.msk [vmem:[#allocation0] sm:$0x1] %vm25_vm3, %v24_v6  }
  0x89   :  { %v30_v8 = vld [vmem:[#allocation0] sm:$0x1] }
  0x8a   :  { %32 = vst [vmem:[%s56_s1] sm:$0x1] %v30_v8 }

// kernel: resunet_forward.33
= control target key start
LH: loop header
LB: loop body
LE: loop exit
PB: predicated region body
PF: predicated region fallthrough
CT: control target
= control target key end

     0   :  { %v176_v0 = vmov 0   ;;  %vm101_vm0 = vcmask 130048   ;;  %vm145_vm1 = vcmask 523264   ;;  %s233_s1 = inlined_call_operand.vmem [shape: bf16[144,64], index: 1, kind: input, shape index: {}]   ;;  %s234_s0 = inlined_call_operand.vmem [shape: bf16[8,144], index: 0, kind: input, shape index: {}]   ;;  %s235_s2 = inlined_call_operand.vmem [shape: f32[1,64], index: 2, kind: input, shape index: {}]   ;;  %s236_s3 = inlined_call_operand.vmem [shape: f32[8,64], index: 3, kind: output, shape index: {}]  }
   0x1   :  { %105 = vmatprep.subr.bf16.mxu0 %v176_v0  ;;  %v165_v1 = vld [vmem:[%s233_s1] sm:$0xff]   ;;  %v166_v2 = vld [vmem:[%s233_s1 + $0x8] sm:$0xff]   ;;  %v167_v3 = vld [vmem:[%s233_s1 + $0x10] sm:$0xff]  }
   0x2   :  { %106 = vmatpush1.bf16.msra.mxu0 %v165_v1  ;;  %v15_v4 = vld [vmem:[%s234_s0] sm:$0xff]  ;;  %v168_v5 = vld [vmem:[%s233_s1 + $0x18] sm:$0xff]   ;;  %v170_v8 = vld [vmem:[%s233_s1 + $0x28] sm:$0xff]  }
   0x3   :  { %107 = vmatprep.subr.bf16.mxu0 %v176_v0  ;;  %v153_v6 = vcombine.high %v15_v4, %v15_v4  ;;  %v169_v7 = vld [vmem:[%s233_s1 + $0x20] sm:$0xff]   ;;  %v171_v9 = vld [vmem:[%s233_s1 + $0x30] sm:$0xff]   ;;  %v172_v10 = vld [vmem:[%s233_s1 + $0x38] sm:$0xff]   ;;  %v152_v12 = vcombine.low %v15_v4, %v15_v4 }
   0x4   :  { %v173_v11 = vld [vmem:[%s233_s1 + $0x40] sm:$0xff]  }
   0x5   :  { %163 = vmatprep.mubr.msk.bf16.mxu0 %vm101_vm0, %v153_v6  ;;  %v151_v13 = vld [vmem:[%s235_s2] ss:$0 sm:$0xff] }
   0x6   :  { %108 = vmatpush1.bf16.msra.mxu0 %v166_v2 }
   0x7   :  { %109 = vmatprep.subr.bf16.mxu0 %v176_v0 }
   0xa   :  { %110 = vmatpush1.bf16.msra.mxu0 %v167_v3 }
   0xb   :  { %111 = vmatprep.subr.bf16.mxu0 %v176_v0 }
   0xe   :  { %112 = vmatpush1.bf16.msra.mxu0 %v168_v5 }
   0xf   :  { %113 = vmatprep.subr.bf16.mxu0 %v176_v0 }
  0x12   :  { %114 = vmatpush1.bf16.msra.mxu0 %v169_v7 }
  0x13   :  { %115 = vmatprep.subr.bf16.mxu0 %v176_v0 }
  0x16   :  { %116 = vmatpush1.bf16.msra.mxu0 %v170_v8 }
  0x17   :  { %117 = vmatprep.subr.bf16.mxu0 %v176_v0 }
  0x1a   :  { %118 = vmatpush1.bf16.msra.mxu0 %v171_v9 }
  0x1b   :  { %119 = vmatprep.subr.bf16.mxu0 %v176_v0 }
  0x1e   :  { %120 = vmatpush1.bf16.msra.mxu0 %v172_v10 }
  0x1f   :  { %121 = vmatprep.subr.bf16.mxu0 %v176_v0 }
  0x22   :  { %122 = vmatpush1.bf16.msra.mxu0 %v173_v11 }
  0x25   :  { %138 = vmatmul.mubr.bf16.vlgmr.msra.gmra.mrb[0].mxu0 %v152_v12 }
  0xf8   :  { %v139_v14 = vpop.f32.mrb[0].mxu0 }
  0xf9   :  { %v140_v15 = vadd.f32 %v151_v13, %v139_v14  ;;  %v141_v16 = vpop.f32.mrb[1].mxu0 }
  0xfa   :  { %v142_v17 = vpop.f32.mrb[2].mxu0 }
  0xfb   :  { %146 = vst.msk [vmem:[%s236_s3] sm:$0xff] %vm145_vm1, %v140_v15  ;;  %v143_v18 = vpop.f32.mrb[3].mxu0 }

// kernel: resunet_forward.35
= control target key start
LH: loop header
LB: loop body
LE: loop exit
PB: predicated region body
PF: predicated region fallthrough
CT: control target
= control target key end

     0   :  { %v101_v0 = vmov 0.0   ;;  %vm102_vm0 = vmmov 0   ;;  %vm34_vm1 = vcmask 130048   ;;  %vm81_vm2 = vcmask 523264   ;;  %s143_s1 = inlined_call_operand.vmem [shape: bf16[16,64], index: 1, kind: input, shape index: {}]   ;;  %s144_s0 = inlined_call_operand.vmem [shape: bf16[8,16], index: 0, kind: input, shape index: {}]   ;;  %s145_s2 = inlined_call_operand.vmem [shape: f32[1,64], index: 2, kind: input, shape index: {}]   ;;  %s146_s3 = inlined_call_operand.vmem [shape: f32[8,64], index: 3, kind: input, shape index: {}]   ;;  %s147_s4 = inlined_call_operand.vmem [shape: f32[8,64], index: 4, kind: output, shape index: {}]  }
   0x1   :  { %92 = vmatprep.subr.bf16.mxu0 %v101_v0  ;;  %v100_v1 = vld [vmem:[%s143_s1] sm:$0xff]   ;;  %94 = vmatprep.mubr.msk.bf16.mxu0 %vm102_vm0, %v101_v0 }
   0x2   :  { %93 = vmatpush3.bf16.msra.mxu0 %v100_v1  ;;  %v18_v2 = vld [vmem:[%s144_s0] sm:$0xf] }
   0x3   :  { %v87_v3 = vld [vmem:[%s145_s2] ss:$0 sm:$0xff] }
   0x4   :  { %v78_v5 = vld [vmem:[%s146_s3] sm:$0xff] }
   0x5   :  { %95 = vmatmul.mubr.msk.bf16.vlgmr.msra.gmra.mrb[0].mxu0 %vm34_vm1, %v18_v2 }
  0xd8   :  { %v72_v4 = vpop.f32.mrb[0].mxu0 }
  0xd9   :  { %v73_v6 = vadd.f32 %v87_v3, %v72_v4  ;;  %v96_v7 = vpop.f32.mrb[1].mxu0 }
  0xda   :  { %v75_v8 = vpop.f32.mrb[2].mxu0 }
  0xdb   :  { %v79_v9 = vadd.f32 %v78_v5, %v73_v6  ;;  %v97_v10 = vpop.f32.mrb[3].mxu0 }
  0xdd   :  { %v80_v11 = vmax.f32 %v79_v9, 0.0 }
  0xdf   :  { %82 = vst.msk [vmem:[%s147_s4] sm:$0xff] %vm81_vm2, %v80_v11 }

// kernel: resunet_forward.36
= control target key start
LH: loop header
LB: loop body
LE: loop exit
PB: predicated region body
PF: predicated region fallthrough
CT: control target
= control target key end

     0   :  { %vm52_vm0 = vcmask 261120   ;;  %vm108_vm1 = vcmask 130048   ;;  %s187_s1 = inlined_call_operand.vmem [shape: bf16[32,16], index: 1, kind: input, shape index: {}]   ;;  %s188_s0 = inlined_call_operand.vmem [shape: bf16[32,32], index: 0, kind: input, shape index: {}]   ;;  %s189_s2 = inlined_call_operand.vmem [shape: f32[1,16], index: 2, kind: input, shape index: {}]   ;;  %s190_s3 = inlined_call_operand.vmem [shape: f32[32,16], index: 3, kind: output, shape index: {}]  }
   0x1   :  { %v136_v0 = vld [vmem:[%s187_s1] sm:$0xff]   ;;  %v137_v1 = vld [vmem:[%s187_s1 + $0x8] sm:$0xff]  }
   0x2   :  { %128 = vmatprep.subr.bf16.mxu0 %v136_v0  ;;  %v138_v2 = vld [vmem:[%s188_s0] sm:$0xff]   ;;  %v139_v3 = vld [vmem:[%s188_s0 + $0x8] sm:$0xff]  }
   0x3   :  { %129 = vmatpush3.bf16.msra.mxu0 %v136_v0  ;;  %132 = vmatprep.mubr.msk.bf16.mxu0 %vm52_vm0, %v138_v2  ;;  %v117_v4 = vld [vmem:[%s189_s2] ss:$0 sm:$0xff] }
   0x4   :  { %130 = vmatprep.subr.bf16.mxu0 %v137_v1 }
   0x7   :  { %131 = vmatpush3.bf16.msra.mxu0 %v137_v1 }
   0xa   :  { %133 = vmatmul.mubr.msk.bf16.vlgmr.msra.gmra.mrb[0].mxu0 %vm52_vm0, %v139_v3 }
  0xdd   :  { %v134_v5 = vpop.f32.mrb[0].mxu0 }
  0xde   :  { %v102_v6 = vadd.f32 %v134_v5, %v117_v4  ;;  %v93_v7 = vpop.f32.mrb[1].mxu0 }
  0xdf   :  { %v94_v8 = vadd.f32 %v117_v4, %v93_v7  ;;  %v135_v9 = vpop.f32.mrb[2].mxu0 }
  0xe0   :  { %111 = vst.msk [vmem:[%s190_s3 + $0x10] sm:$0xff] %vm108_vm1, %v102_v6  ;;  %v105_v10 = vadd.f32 %v135_v9, %v117_v4  ;;  %v96_v11 = vpop.f32.mrb[3].mxu0 }
  0xe1   :  { %109 = vst.msk [vmem:[%s190_s3] sm:$0xff] %vm108_vm1, %v94_v8  ;;  %v97_v12 = vadd.f32 %v117_v4, %v96_v11 }
  0xe2   :  { %112 = vst.msk [vmem:[%s190_s3 + $0x18] sm:$0xff] %vm108_vm1, %v105_v10 }
  0xe3   :  { %110 = vst.msk [vmem:[%s190_s3 + $0x8] sm:$0xff] %vm108_vm1, %v97_v12 }

// kernel: tile.48
= control target key start
LH: loop header
LB: loop body
LE: loop exit
PB: predicated region body
PF: predicated region fallthrough
CT: control target
= control target key end

     0   :  { %s22_s0 = inlined_call_operand.vmem [shape: f32[8], index: 0, kind: input, shape index: {}]   ;;  %s23_s1 = inlined_call_operand.vmem [shape: f32[4,8], index: 1, kind: output, shape index: {}]  }
   0x1   :  { %v4_v0 = vld [vmem:[%s22_s0] ss:$0 sm:$0xff] }
   0x2   :  { %5 = vst [vmem:[%s23_s1] sm:$0xf] %v4_v0 }

// kernel: tile.49
= control target key start
LH: loop header
LB: loop body
LE: loop exit
PB: predicated region body
PF: predicated region fallthrough
CT: control target
= control target key end

     0   :  { %vm7_vm0 = vcmask 64512   ;;  %s37_s8 = smov 8   ;;  %s38_s9 = smov 16   ;;  %vm13_vm1 = vcmask 261312   ;;  %vm19_vm2 = vcmask 195712   ;;  %vm25_vm3 = vcmask 130112   ;;  %s55_s0 = inlined_call_operand.vmem [shape: f32[4,8], index: 0, kind: input, shape index: {}]   ;;  %s56_s1 = inlined_call_operand.vmem [shape: f32[1,32], index: 1, kind: output, shape index: {}]  }
   0x1   :  { %v4_v0 = vld [vmem:[%s55_s0] sm:$0xf]  ;;  %s36_s0 = smov 24  }
   0x2   :  { %5 = vst [vmem:[#allocation1] sm:$0xf] %v4_v0 }
   0x9   :  { %v10_v1 = vld [vmem:[#allocation1 + $0x3] sm:$0x1]   ;;  %v22_v2 = vld [vmem:[#allocation1 + $0x1] sm:$0x1]   ;;  %v6_v3 = vld [vmem:[#allocation1] sm:$0x1]  }
   0xa   :  { %11 = vrot.lane.b32.xlu0 %v10_v1, %s36_s0  ;;  %23 = vrot.lane.b32.xlu1 %v22_v2, %s37_s8  ;;  %v16_v4 = vld [vmem:[#allocation1 + $0x2] sm:$0x1]   ;;  %8 = vst.msk [vmem:[#allocation0] sm:$0x1] %vm7_vm0, %v6_v3  }
   0xe   :  { %17 = vrot.lane.b32.xlu0 %v16_v4, %s38_s9 }
  0x7c   :  { %v12_v5 = vpop.permute.xlu0 %11   ;;  %v24_v6 = vpop.permute.xlu1 %23  }
  0x7d   :  { %14 = vst.msk [vmem:[#allocation0] sm:$0x1] %vm13_vm1, %v12_v5  }
  0x80   :  { %v18_v7 = vpop.permute.xlu0 %17  }
  0x81   :  { %20 = vst.msk [vmem:[#allocation0] sm:$0x1] %vm19_vm2, %v18_v7  }
  0x82   :  { %26 = vst.msk [vmem:[#allocation0] sm:$0x1] %vm25_vm3, %v24_v6  }
  0x89   :  { %v30_v8 = vld [vmem:[#allocation0] sm:$0x1] }
  0x8a   :  { %32 = vst [vmem:[%s56_s1] sm:$0x1] %v30_v8 }

// kernel: resunet_forward.37
= control target key start
LH: loop header
LB: loop body
LE: loop exit
PB: predicated region body
PF: predicated region fallthrough
CT: control target
= control target key end

     0   :  { %v231_v0 = vmov 0   ;;  %vm116_vm0 = vcmask 130048   ;;  %vm172_vm1 = vcmask 261120   ;;  %s306_s1 = inlined_call_operand.vmem [shape: bf16[144,32], index: 1, kind: input, shape index: {}]   ;;  %s307_s0 = inlined_call_operand.vmem [shape: bf16[32,144], index: 0, kind: input, shape index: {}]   ;;  %s308_s2 = inlined_call_operand.vmem [shape: f32[1,32], index: 2, kind: input, shape index: {}]   ;;  %s309_s3 = inlined_call_operand.vmem [shape: f32[32,32], index: 3, kind: output, shape index: {}]  }
   0x1   :  { %123 = vmatprep.subr.bf16.mxu0 %v231_v0  ;;  %197 = vmatprep.subr.bf16.mxu1 %v231_v0  ;;  %v216_v1 = vld [vmem:[%s306_s1] sm:$0xff]   ;;  %v217_v2 = vld [vmem:[%s306_s1 + $0x8] sm:$0xff]   ;;  %v218_v3 = vld [vmem:[%s306_s1 + $0x10] sm:$0xff]  }
   0x2   :  { %124 = vmatpush1.bf16.msra.mxu0 %v216_v1  ;;  %206 = vmatpush1.bf16.msra.mxu1 %v216_v1  ;;  %v219_v4 = vld [vmem:[%s306_s1 + $0x18] sm:$0xff]   ;;  %v227_v5 = vld [vmem:[%s307_s0 + $0x4] ss:$8 sps:$4 sm:$0xff]   ;;  %v222_v9 = vld [vmem:[%s306_s1 + $0x30] sm:$0xff]  }
   0x3   :  { %125 = vmatprep.subr.bf16.mxu0 %v231_v0  ;;  %198 = vmatprep.subr.bf16.mxu1 %v231_v0  ;;  %v230_v6 = vld [vmem:[%s307_s0 + $0x14] ss:$8 sps:$4 sm:$0xff]   ;;  %v220_v7 = vld [vmem:[%s306_s1 + $0x20] sm:$0xff]   ;;  %v221_v8 = vld [vmem:[%s306_s1 + $0x28] sm:$0xff]  }
   0x4   :  { %195 = vmatprep.mubr.msk.bf16.mxu0 %vm116_vm0, %v227_v5  ;;  %196 = vmatprep.mubr.msk.bf16.mxu1 %vm116_vm0, %v230_v6  ;;  %v223_v10 = vld [vmem:[%s306_s1 + $0x38] sm:$0xff]   ;;  %v224_v11 = vld [vmem:[%s306_s1 + $0x40] sm:$0xff]  }
   0x5   :  { %v225_v12 = vld [vmem:[%s307_s0] ss:$8 sps:$4 sm:$0xff]   ;;  %v228_v13 = vld [vmem:[%s307_s0 + $0x10] ss:$8 sps:$4 sm:$0xff]  }
   0x6   :  { %126 = vmatpush1.bf16.msra.mxu0 %v217_v2  ;;  %207 = vmatpush1.bf16.msra.mxu1 %v217_v2  ;;  %v181_v14 = vld [vmem:[%s308_s2] ss:$0 sm:$0xff] }
   0x7   :  { %127 = vmatprep.subr.bf16.mxu0 %v231_v0  ;;  %199 = vmatprep.subr.bf16.mxu1 %v231_v0 }
   0xa   :  { %128 = vmatpush1.bf16.msra.mxu0 %v218_v3  ;;  %208 = vmatpush1.bf16.msra.mxu1 %v218_v3 }
   0xb   :  { %129 = vmatprep.subr.bf16.mxu0 %v231_v0  ;;  %200 = vmatprep.subr.bf16.mxu1 %v231_v0 }
   0xe   :  { %130 = vmatpush1.bf16.msra.mxu0 %v219_v4  ;;  %209 = vmatpush1.bf16.msra.mxu1 %v219_v4 }
   0xf   :  { %131 = vmatprep.subr.bf16.mxu0 %v231_v0  ;;  %201 = vmatprep.subr.bf16.mxu1 %v231_v0 }
  0x12   :  { %132 = vmatpush1.bf16.msra.mxu0 %v220_v7  ;;  %210 = vmatpush1.bf16.msra.mxu1 %v220_v7 }
  0x13   :  { %133 = vmatprep.subr.bf16.mxu0 %v231_v0  ;;  %202 = vmatprep.subr.bf16.mxu1 %v231_v0 }
  0x16   :  { %134 = vmatpush1.bf16.msra.mxu0 %v221_v8  ;;  %211 = vmatpush1.bf16.msra.mxu1 %v221_v8 }
  0x17   :  { %135 = vmatprep.subr.bf16.mxu0 %v231_v0  ;;  %203 = vmatprep.subr.bf16.mxu1 %v231_v0 }
  0x1a   :  { %136 = vmatpush1.bf16.msra.mxu0 %v222_v9  ;;  %212 = vmatpush1.bf16.msra.mxu1 %v222_v9 }
  0x1b   :  { %137 = vmatprep.subr.bf16.mxu0 %v231_v0  ;;  %204 = vmatprep.subr.bf16.mxu1 %v231_v0 }
  0x1e   :  { %138 = vmatpush1.bf16.msra.mxu0 %v223_v10  ;;  %213 = vmatpush1.bf16.msra.mxu1 %v223_v10 }
  0x1f   :  { %139 = vmatprep.subr.bf16.mxu0 %v231_v0  ;;  %205 = vmatprep.subr.bf16.mxu1 %v231_v0 }
  0x22   :  { %140 = vmatpush1.bf16.msra.mxu0 %v224_v11  ;;  %214 = vmatpush1.bf16.msra.mxu1 %v224_v11 }
  0x25   :  { %156 = vmatmul.mubr.bf16.vlgmr.msra.gmra.mrb[0].mxu0 %v225_v12  ;;  %164 = vmatmul.mubr.bf16.vlgmr.msra.gmra.mrb[0].mxu1 %v228_v13 }
  0xf8   :  { %v157_v15 = vpop.f32.mrb[0].mxu0  ;;  %v165_v16 = vpop.f32.mrb[0].mxu1 }
  0xf9   :  { %v158_v17 = vadd.f32 %v181_v14, %v157_v15  ;;  %v166_v18 = vadd.f32 %v181_v14, %v165_v16  ;;  %v159_v19 = vpop.f32.mrb[1].mxu0  ;;  %v167_v20 = vpop.f32.mrb[1].mxu1 }
  0xfa   :  { %v160_v21 = vpop.f32.mrb[2].mxu0  ;;  %v168_v22 = vpop.f32.mrb[2].mxu1 }
  0xfb   :  { %173 = vst.msk [vmem:[%s309_s3] sm:$0xff] %vm172_vm1, %v158_v17  ;;  %175 = vst.msk [vmem:[%s309_s3 + $0x10] sm:$0xff] %vm172_vm1, %v166_v18  ;;  %v161_v23 = vadd.f32 %v181_v14, %v160_v21  ;;  %v169_v24 = vadd.f32 %v181_v14, %v168_v22  ;;  %v162_v25 = vpop.f32.mrb[3].mxu0  ;;  %v170_v26 = vpop.f32.mrb[3].mxu1 }
  0xfd   :  { %174 = vst.msk [vmem:[%s309_s3 + $0x8] sm:$0xff] %vm172_vm1, %v161_v23  ;;  %176 = vst.msk [vmem:[%s309_s3 + $0x18] sm:$0xff] %vm172_vm1, %v169_v24 }

// kernel: resunet_forward.39
= control target key start
LH: loop header
LB: loop body
LE: loop exit
PB: predicated region body
PF: predicated region fallthrough
CT: control target
= control target key end

     0   :  { %vm47_vm0 = vcmask 130048   ;;  %vm115_vm1 = vcmask 261120   ;;  %s203_s1 = inlined_call_operand.vmem [shape: bf16[16,32], index: 1, kind: input, shape index: {}]   ;;  %s204_s0 = inlined_call_operand.vmem [shape: bf16[32,16], index: 0, kind: input, shape index: {}]   ;;  %s205_s2 = inlined_call_operand.vmem [shape: f32[1,32], index: 2, kind: input, shape index: {}]   ;;  %s206_s3 = inlined_call_operand.vmem [shape: f32[32,32], index: 3, kind: input, shape index: {}]   ;;  %s207_s4 = inlined_call_operand.vmem [shape: f32[32,32], index: 4, kind: output, shape index: {}]  }
   0x1   :  { %v139_v0 = vld [vmem:[%s203_s1] sm:$0xff]   ;;  %v141_v2 = vld [vmem:[%s204_s0 + $0x8] sm:$0xff]   ;;  %v105_v5 = vld [vmem:[%s206_s3 + $0x10] sm:$0xff] }
   0x2   :  { %v140_v1 = vld [vmem:[%s204_s0] sm:$0xff]   ;;  %133 = vmatprep.subr.bf16.mxu0 %v139_v0  ;;  %v106_v11 = vld [vmem:[%s206_s3 + $0x18] sm:$0xff]  ;;  %v104_v15 = vld [vmem:[%s206_s3 + $0x8] sm:$0xff] }
   0x3   :  { %134 = vmatpush3.bf16.msra.mxu0 %v139_v0  ;;  %135 = vmatprep.mubr.msk.bf16.mxu0 %vm47_vm0, %v140_v1  ;;  %v124_v3 = vld [vmem:[%s205_s2] ss:$0 sm:$0xff] }
   0x4   :  { %v103_v8 = vld [vmem:[%s206_s3] sm:$0xff] }
   0x6   :  { %136 = vmatmul.mubr.msk.bf16.vlgmr.msra.gmra.mrb[0].mxu0 %vm47_vm0, %v141_v2 }
  0xd9   :  { %v137_v4 = vpop.f32.mrb[0].mxu0 }
  0xda   :  { %v97_v6 = vadd.f32 %v137_v4, %v124_v3  ;;  %v88_v7 = vpop.f32.mrb[1].mxu0 }
  0xdb   :  { %v89_v9 = vadd.f32 %v124_v3, %v88_v7  ;;  %v138_v10 = vpop.f32.mrb[2].mxu0 }
  0xdc   :  { %v109_v12 = vadd.f32 %v105_v5, %v97_v6  ;;  %v100_v13 = vadd.f32 %v138_v10, %v124_v3  ;;  %v91_v14 = vpop.f32.mrb[3].mxu0 }
  0xdd   :  { %v107_v16 = vadd.f32 %v103_v8, %v89_v9  ;;  %v92_v17 = vadd.f32 %v124_v3, %v91_v14 }
  0xde   :  { %v113_v18 = vmax.f32 %v109_v12, 0.0  ;;  %v110_v19 = vadd.f32 %v106_v11, %v100_v13 }
  0xdf   :  { %v111_v20 = vmax.f32 %v107_v16, 0.0  ;;  %v108_v21 = vadd.f32 %v104_v15, %v92_v17 }
  0xe0   :  { %118 = vst.msk [vmem:[%s207_s4 + $0x10] sm:$0xff] %vm115_vm1, %v113_v18  ;;  %v114_v22 = vmax.f32 %v110_v19, 0.0 }
  0xe1   :  { %116 = vst.msk [vmem:[%s207_s4] sm:$0xff] %vm115_vm1, %v111_v20  ;;  %v112_v23 = vmax.f32 %v108_v21, 0.0 }
  0xe2   :  { %119 = vst.msk [vmem:[%s207_s4 + $0x18] sm:$0xff] %vm115_vm1, %v114_v22 }
  0xe3   :  { %117 = vst.msk [vmem:[%s207_s4 + $0x8] sm:$0xff] %vm115_vm1, %v112_v23 }

// kernel: resunet_forward.40
= control target key start
LH: loop header
LB: loop body
LE: loop exit
PB: predicated region body
PF: predicated region fallthrough
CT: control target
= control target key end

     0   :  { %vm86_vm0 = vcmask 130048   ;;  %vm208_vm1 = vcmask 64512   ;;  %s407_s1 = inlined_call_operand.vmem [shape: bf16[16,8], index: 1, kind: input, shape index: {}]   ;;  %s408_s0 = inlined_call_operand.vmem [shape: bf16[128,16], index: 0, kind: input, shape index: {}]   ;;  %s409_s2 = inlined_call_operand.vmem [shape: f32[1,8], index: 2, kind: input, shape index: {}]   ;;  %s410_s3 = inlined_call_operand.vmem [shape: f32[128,8], index: 3, kind: output, shape index: {}]  }
   0x1   :  { %v276_v0 = vld [vmem:[%s407_s1] sm:$0xff]   ;;  %v279_v3 = vld [vmem:[%s408_s0 + $0x8] sm:$0xff]   ;;  %v281_v5 = vld [vmem:[%s408_s0 + $0x10] sm:$0xff]  }
   0x2   :  { %v277_v1 = vld [vmem:[%s408_s0] sm:$0xff]   ;;  %256 = vmatprep.subr.bf16.mxu0 %v276_v0  ;;  %274 = vmatprep.subr.bf16.mxu1 %v276_v0  ;;  %v280_v4 = vld [vmem:[%s408_s0 + $0x28] sm:$0xff]   ;;  %v282_v6 = vld [vmem:[%s408_s0 + $0x30] sm:$0xff]  }
   0x3   :  { %v278_v2 = vld [vmem:[%s408_s0 + $0x20] sm:$0xff]   ;;  %257 = vmatpush3.bf16.msra.mxu0 %v276_v0  ;;  %275 = vmatpush3.bf16.msra.mxu1 %v276_v0  ;;  %v283_v7 = vld [vmem:[%s408_s0 + $0x18] sm:$0xff]  }
   0x4   :  { %258 = vmatprep.mubr.msk.bf16.mxu0 %vm86_vm0, %v277_v1  ;;  %266 = vmatprep.mubr.msk.bf16.mxu1 %vm86_vm0, %v278_v2  ;;  %v284_v8 = vld [vmem:[%s408_s0 + $0x38] sm:$0xff]   ;;  %v229_v9 = vld [vmem:[%s409_s2] ss:$0 sm:$0xff] }
   0x6   :  { %259 = vmatmul.mubr.msk.bf16.vlgmr.msra.gmra.mrb[0].mxu0 %vm86_vm0, %v279_v3  ;;  %267 = vmatmul.mubr.msk.bf16.vlgmr.msra.gmra.mrb[0].mxu1 %vm86_vm0, %v280_v4 }
   0x7   :  { %262 = vmatprep.mubr.msk.bf16.mxu0 %vm86_vm0, %v281_v5  ;;  %270 = vmatprep.mubr.msk.bf16.mxu1 %vm86_vm0, %v282_v6 }
   0xe   :  { %263 = vmatmul.mubr.msk.bf16.gmra.mrb[4].mxu0 %vm86_vm0, %v283_v7  ;;  %271 = vmatmul.mubr.msk.bf16.gmra.mrb[4].mxu1 %vm86_vm0, %v284_v8 }
  0xd9   :  { %v260_v10 = vpop.f32.mrb[0].mxu0  ;;  %v268_v11 = vpop.f32.mrb[0].mxu1 }
  0xda   :  { %v154_v12 = vadd.f32 %v260_v10, %v229_v9  ;;  %v186_v13 = vadd.f32 %v268_v11, %v229_v9  ;;  %v145_v14 = vpop.f32.mrb[1].mxu0  ;;  %v177_v15 = vpop.f32.mrb[1].mxu1 }
  0xdb   :  { %v146_v16 = vadd.f32 %v229_v9, %v145_v14  ;;  %v178_v17 = vadd.f32 %v229_v9, %v177_v15  ;;  %v261_v18 = vpop.f32.mrb[2].mxu0  ;;  %v269_v19 = vpop.f32.mrb[2].mxu1 }
  0xdc   :  { %211 = vst.msk [vmem:[%s410_s3 + $0x10] sm:$0xff] %vm208_vm1, %v154_v12  ;;  %219 = vst.msk [vmem:[%s410_s3 + $0x50] sm:$0xff] %vm208_vm1, %v186_v13  ;;  %v157_v20 = vadd.f32 %v261_v18, %v229_v9  ;;  %v189_v21 = vadd.f32 %v269_v19, %v229_v9  ;;  %v148_v22 = vpop.f32.mrb[3].mxu0  ;;  %v180_v23 = vpop.f32.mrb[3].mxu1 }
  0xdd   :  { %209 = vst.msk [vmem:[%s410_s3] sm:$0xff] %vm208_vm1, %v146_v16  ;;  %217 = vst.msk [vmem:[%s410_s3 + $0x40] sm:$0xff] %vm208_vm1, %v178_v17  ;;  %v149_v24 = vadd.f32 %v229_v9, %v148_v22  ;;  %v181_v25 = vadd.f32 %v229_v9, %v180_v23 }
  0xde   :  { %212 = vst.msk [vmem:[%s410_s3 + $0x18] sm:$0xff] %vm208_vm1, %v157_v20  ;;  %220 = vst.msk [vmem:[%s410_s3 + $0x58] sm:$0xff] %vm208_vm1, %v189_v21 }
  0xdf   :  { %210 = vst.msk [vmem:[%s410_s3 + $0x8] sm:$0xff] %vm208_vm1, %v149_v24  ;;  %218 = vst.msk [vmem:[%s410_s3 + $0x48] sm:$0xff] %vm208_vm1, %v181_v25 }
  0xe1   :  { %v264_v26 = vpop.f32.mrb[4].mxu0  ;;  %v272_v27 = vpop.f32.mrb[4].mxu1 }
  0xe2   :  { %v170_v28 = vadd.f32 %v264_v26, %v229_v9  ;;  %v202_v29 = vadd.f32 %v272_v27, %v229_v9  ;;  %v161_v30 = vpop.f32.mrb[5].mxu0  ;;  %v193_v31 = vpop.f32.mrb[5].mxu1 }
  0xe3   :  { %v162_v32 = vadd.f32 %v229_v9, %v161_v30  ;;  %v194_v33 = vadd.f32 %v229_v9, %v193_v31  ;;  %v265_v34 = vpop.f32.mrb[6].mxu0  ;;  %v273_v35 = vpop.f32.mrb[6].mxu1 }
  0xe4   :  { %215 = vst.msk [vmem:[%s410_s3 + $0x30] sm:$0xff] %vm208_vm1, %v170_v28  ;;  %223 = vst.msk [vmem:[%s410_s3 + $0x70] sm:$0xff] %vm208_vm1, %v202_v29  ;;  %v173_v36 = vadd.f32 %v265_v34, %v229_v9  ;;  %v205_v37 = vadd.f32 %v273_v35, %v229_v9  ;;  %v164_v38 = vpop.f32.mrb[7].mxu0  ;;  %v196_v39 = vpop.f32.mrb[7].mxu1 }
  0xe5   :  { %213 = vst.msk [vmem:[%s410_s3 + $0x20] sm:$0xff] %vm208_vm1, %v162_v32  ;;  %221 = vst.msk [vmem:[%s410_s3 + $0x60] sm:$0xff] %vm208_vm1, %v194_v33  ;;  %v165_v40 = vadd.f32 %v229_v9, %v164_v38  ;;  %v197_v41 = vadd.f32 %v229_v9, %v196_v39 }
  0xe6   :  { %216 = vst.msk [vmem:[%s410_s3 + $0x38] sm:$0xff] %vm208_vm1, %v173_v36  ;;  %224 = vst.msk [vmem:[%s410_s3 + $0x78] sm:$0xff] %vm208_vm1, %v205_v37 }
  0xe7   :  { %214 = vst.msk [vmem:[%s410_s3 + $0x28] sm:$0xff] %vm208_vm1, %v165_v40  ;;  %222 = vst.msk [vmem:[%s410_s3 + $0x68] sm:$0xff] %vm208_vm1, %v197_v41 }

// kernel: resunet_forward.41
= control target key start
LH: loop header
LB: loop body
LE: loop exit
PB: predicated region body
PF: predicated region fallthrough
CT: control target
= control target key end

     0   :  { %vm114_vm0 = vcmask 588800   ;;  %vm139_vm1 = vcmask 1043456   ;;  %vm240_vm2 = vcmask 261120   ;;  %s481_s1 = inlined_call_operand.vmem [shape: bf16[72,32], index: 1, kind: input, shape index: {}]   ;;  %s482_s0 = inlined_call_operand.vmem [shape: bf16[128,72], index: 0, kind: input, shape index: {}]   ;;  %s483_s2 = inlined_call_operand.vmem [shape: f32[1,32], index: 2, kind: input, shape index: {}]   ;;  %s484_s3 = inlined_call_operand.vmem [shape: f32[128,32], index: 3, kind: output, shape index: {}]  }
   0x1   :  { %v334_v0 = vld [vmem:[%s481_s1] sm:$0xff]   ;;  %v335_v1 = vld [vmem:[%s481_s1 + $0x8] sm:$0xff]   ;;  %v336_v2 = vld [vmem:[%s481_s1 + $0x10] sm:$0xff]  }
   0x2   :  { %296 = vmatprep.subr.bf16.mxu0 %v334_v0  ;;  %322 = vmatprep.subr.bf16.mxu1 %v334_v0  ;;  %v339_v3 = vld [vmem:[%s482_s0] sm:$0xff]   ;;  %v337_v5 = vld [vmem:[%s481_s1 + $0x18] sm:$0xff]   ;;  %v341_v8 = vld [vmem:[%s482_s0 + $0x8] sm:$0xff]  }
   0x3   :  { %297 = vmatpush3.bf16.msra.mxu0 %v334_v0  ;;  %327 = vmatpush3.bf16.msra.mxu1 %v334_v0  ;;  %v340_v4 = vld [vmem:[%s482_s0 + $0x20] sm:$0xff]   ;;  %v342_v9 = vld [vmem:[%s482_s0 + $0x28] sm:$0xff]   ;;  %v343_v10 = vld [vmem:[%s482_s0 + $0x10] sm:$0xff]  }
   0x4   :  { %298 = vmatprep.subr.bf16.mxu0 %v335_v1  ;;  %323 = vmatprep.subr.bf16.mxu1 %v335_v1  ;;  %v338_v6 = vld [vmem:[%s481_s1 + $0x20] ss:$0 sps:$4 sm:$0xff]   ;;  %v344_v11 = vld [vmem:[%s482_s0 + $0x30] sm:$0xff]   ;;  %v345_v12 = vld [vmem:[%s482_s0 + $0x18] sm:$0xff]  }
   0x5   :  { %306 = vmatprep.mubr.msk.bf16.mxu0 %vm114_vm0, %v339_v3  ;;  %314 = vmatprep.mubr.msk.bf16.mxu1 %vm114_vm0, %v340_v4  ;;  %v141_v7 = vsel %vm139_vm1, %v338_v6, 0  ;;  %v346_v13 = vld [vmem:[%s482_s0 + $0x38] sm:$0xff]   ;;  %v261_v14 = vld [vmem:[%s483_s2] ss:$0 sm:$0xff] }
   0x7   :  { %299 = vmatpush3.bf16.msra.mxu0 %v335_v1  ;;  %328 = vmatpush3.bf16.msra.mxu1 %v335_v1 }
   0x8   :  { %300 = vmatprep.subr.bf16.mxu0 %v336_v2  ;;  %324 = vmatprep.subr.bf16.mxu1 %v336_v2 }
   0xb   :  { %301 = vmatpush3.bf16.msra.mxu0 %v336_v2  ;;  %329 = vmatpush3.bf16.msra.mxu1 %v336_v2 }
   0xc   :  { %302 = vmatprep.subr.bf16.mxu0 %v337_v5  ;;  %325 = vmatprep.subr.bf16.mxu1 %v337_v5 }
   0xf   :  { %303 = vmatpush3.bf16.msra.mxu0 %v337_v5  ;;  %330 = vmatpush3.bf16.msra.mxu1 %v337_v5 }
  0x10   :  { %332 = vmatprep.subr.msk.bf16.mxu0 %vm139_vm1, %v338_v6  ;;  %333 = vmatprep.subr.msk.bf16.mxu1 %vm139_vm1, %v338_v6 }
  0x13   :  { %305 = vmatpush3.bf16.msra.mxu0 %v141_v7  ;;  %331 = vmatpush3.bf16.msra.mxu1 %v141_v7 }
  0x16   :  { %307 = vmatmul.mubr.msk.bf16.vlgmr.msra.gmra.mrb[0].mxu0 %vm114_vm0, %v341_v8  ;;  %315 = vmatmul.mubr.msk.bf16.vlgmr.msra.gmra.mrb[0].mxu1 %vm114_vm0, %v342_v9 }
  0x17   :  { %310 = vmatprep.mubr.msk.bf16.mxu0 %vm114_vm0, %v343_v10  ;;  %318 = vmatprep.mubr.msk.bf16.mxu1 %vm114_vm0, %v344_v11 }
  0x1e   :  { %311 = vmatmul.mubr.msk.bf16.gmra.mrb[4].mxu0 %vm114_vm0, %v345_v12  ;;  %319 = vmatmul.mubr.msk.bf16.gmra.mrb[4].mxu1 %vm114_vm0, %v346_v13 }
  0xe9   :  { %v308_v15 = vpop.f32.mrb[0].mxu0  ;;  %v316_v16 = vpop.f32.mrb[0].mxu1 }
  0xea   :  { %v186_v17 = vadd.f32 %v308_v15, %v261_v14  ;;  %v218_v18 = vadd.f32 %v316_v16, %v261_v14  ;;  %v177_v19 = vpop.f32.mrb[1].mxu0  ;;  %v209_v20 = vpop.f32.mrb[1].mxu1 }
  0xeb   :  { %v178_v21 = vadd.f32 %v261_v14, %v177_v19  ;;  %v210_v22 = vadd.f32 %v261_v14, %v209_v20  ;;  %v309_v23 = vpop.f32.mrb[2].mxu0  ;;  %v317_v24 = vpop.f32.mrb[2].mxu1 }
  0xec   :  { %243 = vst.msk [vmem:[%s484_s3 + $0x10] sm:$0xff] %vm240_vm2, %v186_v17  ;;  %251 = vst.msk [vmem:[%s484_s3 + $0x50] sm:$0xff] %vm240_vm2, %v218_v18  ;;  %v189_v25 = vadd.f32 %v309_v23, %v261_v14  ;;  %v221_v26 = vadd.f32 %v317_v24, %v261_v14  ;;  %v180_v27 = vpop.f32.mrb[3].mxu0  ;;  %v212_v28 = vpop.f32.mrb[3].mxu1 }
  0xed   :  { %241 = vst.msk [vmem:[%s484_s3] sm:$0xff] %vm240_vm2, %v178_v21  ;;  %249 = vst.msk [vmem:[%s484_s3 + $0x40] sm:$0xff] %vm240_vm2, %v210_v22  ;;  %v181_v29 = vadd.f32 %v261_v14, %v180_v27  ;;  %v213_v30 = vadd.f32 %v261_v14, %v212_v28 }
  0xee   :  { %244 = vst.msk [vmem:[%s484_s3 + $0x18] sm:$0xff] %vm240_vm2, %v189_v25  ;;  %252 = vst.msk [vmem:[%s484_s3 + $0x58] sm:$0xff] %vm240_vm2, %v221_v26 }
  0xef   :  { %242 = vst.msk [vmem:[%s484_s3 + $0x8] sm:$0xff] %vm240_vm2, %v181_v29  ;;  %250 = vst.msk [vmem:[%s484_s3 + $0x48] sm:$0xff] %vm240_vm2, %v213_v30 }
  0xf1   :  { %v312_v31 = vpop.f32.mrb[4].mxu0  ;;  %v320_v32 = vpop.f32.mrb[4].mxu1 }
  0xf2   :  { %v202_v33 = vadd.f32 %v312_v31, %v261_v14  ;;  %v234_v34 = vadd.f32 %v320_v32, %v261_v14  ;;  %v193_v35 = vpop.f32.mrb[5].mxu0  ;;  %v225_v36 = vpop.f32.mrb[5].mxu1 }
  0xf3   :  { %v194_v37 = vadd.f32 %v261_v14, %v193_v35  ;;  %v226_v38 = vadd.f32 %v261_v14, %v225_v36  ;;  %v313_v39 = vpop.f32.mrb[6].mxu0  ;;  %v321_v40 = vpop.f32.mrb[6].mxu1 }
  0xf4   :  { %247 = vst.msk [vmem:[%s484_s3 + $0x30] sm:$0xff] %vm240_vm2, %v202_v33  ;;  %255 = vst.msk [vmem:[%s484_s3 + $0x70] sm:$0xff] %vm240_vm2, %v234_v34  ;;  %v205_v41 = vadd.f32 %v313_v39, %v261_v14  ;;  %v237_v42 = vadd.f32 %v321_v40, %v261_v14  ;;  %v196_v43 = vpop.f32.mrb[7].mxu0  ;;  %v228_v44 = vpop.f32.mrb[7].mxu1 }
  0xf5   :  { %245 = vst.msk [vmem:[%s484_s3 + $0x20] sm:$0xff] %vm240_vm2, %v194_v37  ;;  %253 = vst.msk [vmem:[%s484_s3 + $0x60] sm:$0xff] %vm240_vm2, %v226_v38  ;;  %v197_v45 = vadd.f32 %v261_v14, %v196_v43  ;;  %v229_v46 = vadd.f32 %v261_v14, %v228_v44 }
  0xf6   :  { %248 = vst.msk [vmem:[%s484_s3 + $0x38] sm:$0xff] %vm240_vm2, %v205_v41  ;;  %256 = vst.msk [vmem:[%s484_s3 + $0x78] sm:$0xff] %vm240_vm2, %v237_v42 }
  0xf7   :  { %246 = vst.msk [vmem:[%s484_s3 + $0x28] sm:$0xff] %vm240_vm2, %v197_v45  ;;  %254 = vst.msk [vmem:[%s484_s3 + $0x68] sm:$0xff] %vm240_vm2, %v229_v46 }

// kernel: resunet_forward.42
= control target key start
LH: loop header
LB: loop body
LE: loop exit
PB: predicated region body
PF: predicated region fallthrough
CT: control target
= control target key end

     0   :  { %s814_s12 = smov 0   ;;  %s987_s0 = inlined_call_operand.vmem [shape: bf16[512,72], index: 0, kind: input, shape index: {}]   ;;  %s988_s1 = inlined_call_operand.vmem [shape: bf16[72,8], index: 1, kind: input, shape index: {}]   ;;  %s989_s2 = inlined_call_operand.vmem [shape: f32[1,8], index: 2, kind: input, shape index: {}]   ;;  %s990_s3 = inlined_call_operand.vmem [shape: f32[512,8], index: 3, kind: output, shape index: {}]  }
   0x1 LB: > { %s633_s13 = sadd.s32 4294967295, %s792_s12   ;;  %p637_p0 = scmp.ge.s32.totalorder %s792_s12, 1  ;;  %s792_s12 = sphi %s814_s12, %s13_s12  }
   0x2   : > { %p138_p1 = scmp.lt.s32.totalorder %s792_s12, 3 }
   0x4   : > { %p139_p2 = pnand %p637_p0, %p138_p1 }
   0x5   : > { %v765_v0 = vld [vmem:[%s988_s1] sm:$0xff] (!%p139_p2)   ;;  %v766_v1 = vld [vmem:[%s988_s1 + $0x8] sm:$0xff] (!%p139_p2)   ;;  %s638_s18 = sshll.u32 (!%p139_p2), %s633_s13, 5  ;;  %v767_v2 = vld [vmem:[%s988_s1 + $0x10] sm:$0xff] (!%p139_p2)   ;;  %vm330_vm0 = vcmask (!%p139_p2), 588800   ;;  %vm379_vm1 = vcmask (!%p139_p2), 1043456  }
   0x6   : > { %142 = sbr.rel (%p139_p2) target bundleno = 268 (0x10c), region = 32  ;;  %703 = vmatprep.subr.bf16.mxu0 (!%p139_p2), %v765_v0  ;;  %745 = vmatprep.subr.bf16.mxu1 (!%p139_p2), %v765_v0  ;;  %p163_p3 = scmp.lt.s32.totalorder (!%p139_p2), %s638_s18, 63  ;;  %v768_v3 = vld [vmem:[%s988_s1 + $0x18] sm:$0xff] (!%p139_p2)   ;;  %v769_v6 = vld [vmem:[%s988_s1 + $0x20] ss:$0 sps:$4 sm:$0xff] (!%p139_p2)   ;;  %vm544_vm2 = vcmask (!%p139_p2), 64512  }
   0x7   : > { %704 = vmatpush3.bf16.msra.mxu0 (!%p139_p2), %v765_v0  ;;  %750 = vmatpush3.bf16.msra.mxu1 (!%p139_p2), %v765_v0  ;;  %v381_v7 = vsel (!%p139_p2), %vm379_vm1, %v769_v6, 0  ;;  %v881_v22 = vld [vmem:[%s989_s2] ss:$0 sm:$0xff] (!%p139_p2) }
   0x8   : > { %705 = vmatprep.subr.bf16.mxu0 (!%p139_p2), %v766_v1  ;;  %746 = vmatprep.subr.bf16.mxu1 (!%p139_p2), %v766_v1 }
   0xb   : > { %706 = vmatpush3.bf16.msra.mxu0 (!%p139_p2), %v766_v1  ;;  %751 = vmatpush3.bf16.msra.mxu1 (!%p139_p2), %v766_v1 }
   0xc   : > { %707 = vmatprep.subr.bf16.mxu0 (!%p139_p2), %v767_v2  ;;  %747 = vmatprep.subr.bf16.mxu1 (!%p139_p2), %v767_v2 }
   0xd   : > { %s992_s18 = smov (!%p163_p3, %s638_s18), 63 }
   0xe   : > { %s639_s21 = sshll.u32 %s992_s18, 2  ;;  %s641_s29 = sshll.u32 %s992_s18, 3 }
   0xf   : > { %s840_s26 = scalar_lea.vmem %s987_s0, %s639_s21  ;;  %708 = vmatpush3.bf16.msra.mxu0 %v767_v2  ;;  %752 = vmatpush3.bf16.msra.mxu1 %v767_v2  ;;  %s886_s7 = scalar_lea.vmem %s990_s3, %s641_s29 }
  0x10   : > { %v770_v4 = vld [vmem:[%s840_s26] sm:$0xff]   ;;  %709 = vmatprep.subr.bf16.mxu0 %v768_v3  ;;  %748 = vmatprep.subr.bf16.mxu1 %v768_v3  ;;  %v772_v8 = vld [vmem:[%s840_s26 + $0x8] sm:$0xff]   ;;  %v774_v10 = vld [vmem:[%s840_s26 + $0x10] sm:$0xff]  }
  0x11   : > { %v771_v5 = vld [vmem:[%s840_s26 + $0x40] sm:$0xff]   ;;  %713 = vmatprep.mubr.msk.bf16.mxu0 %vm330_vm0, %v770_v4  ;;  %v773_v9 = vld [vmem:[%s840_s26 + $0x48] sm:$0xff]   ;;  %v775_v11 = vld [vmem:[%s840_s26 + $0x50] sm:$0xff]  }
  0x12   : > { %729 = vmatprep.mubr.msk.bf16.mxu1 %vm330_vm0, %v771_v5  ;;  %v776_v12 = vld [vmem:[%s840_s26 + $0x18] sm:$0xff]   ;;  %v778_v14 = vld [vmem:[%s840_s26 + $0x20] sm:$0xff]   ;;  %v780_v16 = vld [vmem:[%s840_s26 + $0x28] sm:$0xff]  }
  0x13   : > { %710 = vmatpush3.bf16.msra.mxu0 %v768_v3  ;;  %753 = vmatpush3.bf16.msra.mxu1 %v768_v3  ;;  %v777_v13 = vld [vmem:[%s840_s26 + $0x58] sm:$0xff]   ;;  %v779_v15 = vld [vmem:[%s840_s26 + $0x60] sm:$0xff]   ;;  %v781_v17 = vld [vmem:[%s840_s26 + $0x68] sm:$0xff]  }
  0x14   : > { %755 = vmatprep.subr.msk.bf16.mxu0 %vm379_vm1, %v769_v6  ;;  %756 = vmatprep.subr.msk.bf16.mxu1 %vm379_vm1, %v769_v6  ;;  %v782_v18 = vld [vmem:[%s840_s26 + $0x30] sm:$0xff]   ;;  %v784_v20 = vld [vmem:[%s840_s26 + $0x38] sm:$0xff]  }
  0x15   : > { %v783_v19 = vld [vmem:[%s840_s26 + $0x70] sm:$0xff]   ;;  %v785_v21 = vld [vmem:[%s840_s26 + $0x78] sm:$0xff]  }
  0x17   : > { %712 = vmatpush3.bf16.msra.mxu0 %v381_v7  ;;  %754 = vmatpush3.bf16.msra.mxu1 %v381_v7 }
  0x1a   : > { %714 = vmatmul.mubr.msk.bf16.vlgmr.msra.gmra.mrb[0].mxu0 %vm330_vm0, %v772_v8  ;;  %730 = vmatmul.mubr.msk.bf16.vlgmr.msra.gmra.mrb[0].mxu1 %vm330_vm0, %v773_v9 }
  0x1b   : > { %717 = vmatprep.mubr.msk.bf16.mxu0 %vm330_vm0, %v774_v10  ;;  %733 = vmatprep.mubr.msk.bf16.mxu1 %vm330_vm0, %v775_v11 }
  0x22   : > { %718 = vmatmul.mubr.msk.bf16.gmra.mrb[4].mxu0 %vm330_vm0, %v776_v12  ;;  %734 = vmatmul.mubr.msk.bf16.gmra.mrb[4].mxu1 %vm330_vm0, %v777_v13 }
  0x23   : > { %721 = vmatprep.mubr.msk.bf16.mxu0 %vm330_vm0, %v778_v14  ;;  %737 = vmatprep.mubr.msk.bf16.mxu1 %vm330_vm0, %v779_v15 }
  0x2a   : > { %722 = vmatmul.mubr.msk.bf16.gmra.mrb[8].mxu0 %vm330_vm0, %v780_v16  ;;  %738 = vmatmul.mubr.msk.bf16.gmra.mrb[8].mxu1 %vm330_vm0, %v781_v17 }
  0x2b   : > { %725 = vmatprep.mubr.msk.bf16.mxu0 %vm330_vm0, %v782_v18  ;;  %741 = vmatprep.mubr.msk.bf16.mxu1 %vm330_vm0, %v783_v19 }
  0x32   : > { %726 = vmatmul.mubr.msk.bf16.gmra.mrb[12].mxu0 %vm330_vm0, %v784_v20  ;;  %742 = vmatmul.mubr.msk.bf16.gmra.mrb[12].mxu1 %vm330_vm0, %v785_v21 }
  0xed   : > { %v715_v23 = vpop.f32.mrb[0].mxu0  ;;  %v731_v24 = vpop.f32.mrb[0].mxu1 }
  0xee   : > { %v426_v25 = vadd.f32 %v715_v23, %v881_v22  ;;  %v490_v26 = vadd.f32 %v731_v24, %v881_v22  ;;  %v417_v27 = vpop.f32.mrb[1].mxu0  ;;  %v481_v28 = vpop.f32.mrb[1].mxu1 }
  0xef   : > { %v418_v29 = vadd.f32 %v881_v22, %v417_v27  ;;  %v482_v30 = vadd.f32 %v881_v22, %v481_v28  ;;  %v716_v31 = vpop.f32.mrb[2].mxu0  ;;  %v732_v32 = vpop.f32.mrb[2].mxu1 }
  0xf0   : > { %547 = vst.msk [vmem:[%s886_s7 + $0x10] sm:$0xff] %vm544_vm2, %v426_v25  ;;  %563 = vst.msk [vmem:[%s886_s7 + $0x90] sm:$0xff] %vm544_vm2, %v490_v26  ;;  %v429_v33 = vadd.f32 %v716_v31, %v881_v22  ;;  %v493_v34 = vadd.f32 %v732_v32, %v881_v22  ;;  %v420_v35 = vpop.f32.mrb[3].mxu0  ;;  %v484_v36 = vpop.f32.mrb[3].mxu1 }
  0xf1   : > { %545 = vst.msk [vmem:[%s886_s7] sm:$0xff] %vm544_vm2, %v418_v29  ;;  %561 = vst.msk [vmem:[%s886_s7 + $0x80] sm:$0xff] %vm544_vm2, %v482_v30  ;;  %v421_v37 = vadd.f32 %v881_v22, %v420_v35  ;;  %v485_v38 = vadd.f32 %v881_v22, %v484_v36 }
  0xf2   : > { %548 = vst.msk [vmem:[%s886_s7 + $0x18] sm:$0xff] %vm544_vm2, %v429_v33  ;;  %564 = vst.msk [vmem:[%s886_s7 + $0x98] sm:$0xff] %vm544_vm2, %v493_v34 }
  0xf3   : > { %546 = vst.msk [vmem:[%s886_s7 + $0x8] sm:$0xff] %vm544_vm2, %v421_v37  ;;  %562 = vst.msk [vmem:[%s886_s7 + $0x88] sm:$0xff] %vm544_vm2, %v485_v38 }
  0xf5   : > { %v719_v39 = vpop.f32.mrb[4].mxu0  ;;  %v735_v40 = vpop.f32.mrb[4].mxu1 }
  0xf6   : > { %v442_v41 = vadd.f32 %v719_v39, %v881_v22  ;;  %v506_v42 = vadd.f32 %v735_v40, %v881_v22  ;;  %v433_v43 = vpop.f32.mrb[5].mxu0  ;;  %v497_v44 = vpop.f32.mrb[5].mxu1 }
  0xf7   : > { %v434_v45 = vadd.f32 %v881_v22, %v433_v43  ;;  %v498_v46 = vadd.f32 %v881_v22, %v497_v44  ;;  %v720_v47 = vpop.f32.mrb[6].mxu0  ;;  %v736_v48 = vpop.f32.mrb[6].mxu1 }
  0xf8   : > { %551 = vst.msk [vmem:[%s886_s7 + $0x30] sm:$0xff] %vm544_vm2, %v442_v41  ;;  %567 = vst.msk [vmem:[%s886_s7 + $0xb0] sm:$0xff] %vm544_vm2, %v506_v42  ;;  %v445_v49 = vadd.f32 %v720_v47, %v881_v22  ;;  %v509_v50 = vadd.f32 %v736_v48, %v881_v22  ;;  %v436_v51 = vpop.f32.mrb[7].mxu0  ;;  %v500_v52 = vpop.f32.mrb[7].mxu1 }
  0xf9   : > { %549 = vst.msk [vmem:[%s886_s7 + $0x20] sm:$0xff] %vm544_vm2, %v434_v45  ;;  %565 = vst.msk [vmem:[%s886_s7 + $0xa0] sm:$0xff] %vm544_vm2, %v498_v46  ;;  %v437_v53 = vadd.f32 %v881_v22, %v436_v51  ;;  %v501_v54 = vadd.f32 %v881_v22, %v500_v52 }
  0xfa   : > { %552 = vst.msk [vmem:[%s886_s7 + $0x38] sm:$0xff] %vm544_vm2, %v445_v49  ;;  %568 = vst.msk [vmem:[%s886_s7 + $0xb8] sm:$0xff] %vm544_vm2, %v509_v50 }
  0xfb   : > { %550 = vst.msk [vmem:[%s886_s7 + $0x28] sm:$0xff] %vm544_vm2, %v437_v53  ;;  %566 = vst.msk [vmem:[%s886_s7 + $0xa8] sm:$0xff] %vm544_vm2, %v501_v54 }
  0xfd   : > { %v723_v55 = vpop.f32.mrb[8].mxu0  ;;  %v739_v56 = vpop.f32.mrb[8].mxu1 }
  0xfe   : > { %v458_v57 = vadd.f32 %v723_v55, %v881_v22  ;;  %v522_v58 = vadd.f32 %v739_v56, %v881_v22  ;;  %v449_v59 = vpop.f32.mrb[9].mxu0  ;;  %v513_v60 = vpop.f32.mrb[9].mxu1 }
  0xff   : > { %v450_v61 = vadd.f32 %v881_v22, %v449_v59  ;;  %v514_v62 = vadd.f32 %v881_v22, %v513_v60  ;;  %v724_v63 = vpop.f32.mrb[10].mxu0  ;;  %v740_v0 = vpop.f32.mrb[10].mxu1 }
 0x100   : > { %555 = vst.msk [vmem:[%s886_s7 + $0x50] sm:$0xff] %vm544_vm2, %v458_v57  ;;  %571 = vst.msk [vmem:[%s886_s7 + $0xd0] sm:$0xff] %vm544_vm2, %v522_v58  ;;  %v461_v1 = vadd.f32 %v724_v63, %v881_v22  ;;  %v525_v2 = vadd.f32 %v740_v0, %v881_v22  ;;  %v452_v3 = vpop.f32.mrb[11].mxu0  ;;  %v516_v4 = vpop.f32.mrb[11].mxu1 }
 0x101   : > { %553 = vst.msk [vmem:[%s886_s7 + $0x40] sm:$0xff] %vm544_vm2, %v450_v61  ;;  %569 = vst.msk [vmem:[%s886_s7 + $0xc0] sm:$0xff] %vm544_vm2, %v514_v62  ;;  %v453_v5 = vadd.f32 %v881_v22, %v452_v3  ;;  %v517_v6 = vadd.f32 %v881_v22, %v516_v4 }
 0x102   : > { %556 = vst.msk [vmem:[%s886_s7 + $0x58] sm:$0xff] %vm544_vm2, %v461_v1  ;;  %572 = vst.msk [vmem:[%s886_s7 + $0xd8] sm:$0xff] %vm544_vm2, %v525_v2 }
 0x103   : > { %554 = vst.msk [vmem:[%s886_s7 + $0x48] sm:$0xff] %vm544_vm2, %v453_v5  ;;  %570 = vst.msk [vmem:[%s886_s7 + $0xc8] sm:$0xff] %vm544_vm2, %v517_v6 }
 0x105   : > { %v727_v7 = vpop.f32.mrb[12].mxu0  ;;  %v743_v8 = vpop.f32.mrb[12].mxu1 }
 0x106   : > { %v474_v9 = vadd.f32 %v727_v7, %v881_v22  ;;  %v538_v10 = vadd.f32 %v743_v8, %v881_v22  ;;  %v465_v11 = vpop.f32.mrb[13].mxu0  ;;  %v529_v12 = vpop.f32.mrb[13].mxu1 }
 0x107   : > { %v466_v13 = vadd.f32 %v881_v22, %v465_v11  ;;  %v530_v14 = vadd.f32 %v881_v22, %v529_v12  ;;  %v728_v15 = vpop.f32.mrb[14].mxu0  ;;  %v744_v16 = vpop.f32.mrb[14].mxu1 }
 0x108   : > { %559 = vst.msk [vmem:[%s886_s7 + $0x70] sm:$0xff] %vm544_vm2, %v474_v9  ;;  %575 = vst.msk [vmem:[%s886_s7 + $0xf0] sm:$0xff] %vm544_vm2, %v538_v10  ;;  %v477_v17 = vadd.f32 %v728_v15, %v881_v22  ;;  %v541_v18 = vadd.f32 %v744_v16, %v881_v22  ;;  %v468_v19 = vpop.f32.mrb[15].mxu0  ;;  %v532_v20 = vpop.f32.mrb[15].mxu1 }
 0x109   : > { %557 = vst.msk [vmem:[%s886_s7 + $0x60] sm:$0xff] %vm544_vm2, %v466_v13  ;;  %573 = vst.msk [vmem:[%s886_s7 + $0xe0] sm:$0xff] %vm544_vm2, %v530_v14  ;;  %v469_v21 = vadd.f32 %v881_v22, %v468_v19  ;;  %v533_v23 = vadd.f32 %v881_v22, %v532_v20 }
 0x10a   : > { %560 = vst.msk [vmem:[%s886_s7 + $0x78] sm:$0xff] %vm544_vm2, %v477_v17  ;;  %576 = vst.msk [vmem:[%s886_s7 + $0xf8] sm:$0xff] %vm544_vm2, %v541_v18 }
 0x10b   : > { %558 = vst.msk [vmem:[%s886_s7 + $0x68] sm:$0xff] %vm544_vm2, %v469_v21  ;;  %574 = vst.msk [vmem:[%s886_s7 + $0xe8] sm:$0xff] %vm544_vm2, %v533_v23 }
 0x10c PF: > { %s13_s12 = sadd.s32 1, %s792_s12  }
 0x10d   : > { %p10_p4 = scmp.ge.s32.totalorder %s13_s12, 4  }
 0x10f   :  { %12 = sbr.rel (!%p10_p4) target bundleno = 1 (0x1), region = 62 }

// kernel: resunet_forward.43
= control target key start
LH: loop header
LB: loop body
LE: loop exit
PB: predicated region body
PF: predicated region fallthrough
CT: control target
= control target key end

     0   :  { %vm107_vm0 = vcmask 1043456   ;;  %vm82_vm1 = vcmask 64512   ;;  %vm256_vm2 = vcmask 261120   ;;  %s526_s1 = inlined_call_operand.vmem [shape: bf16[8,32], index: 1, kind: input, shape index: {}]   ;;  %s527_s0 = inlined_call_operand.vmem [shape: bf16[128,8], index: 0, kind: input, shape index: {}]   ;;  %s528_s2 = inlined_call_operand.vmem [shape: f32[1,32], index: 2, kind: input, shape index: {}]   ;;  %s529_s3 = inlined_call_operand.vmem [shape: f32[128,32], index: 3, kind: input, shape index: {}]   ;;  %s530_s4 = inlined_call_operand.vmem [shape: f32[128,32], index: 4, kind: output, shape index: {}]  }
   0x1   :  { %v34_v0 = vld [vmem:[%s526_s1] sm:$0xf]  ;;  %v327_v4 = vld [vmem:[%s527_s0 + $0x8] sm:$0xff]   ;;  %v329_v6 = vld [vmem:[%s527_s0 + $0x10] sm:$0xff]  }
   0x2   :  { %323 = vmatprep.subr.msk.bf16.mxu0 %vm107_vm0, %v34_v0  ;;  %324 = vmatprep.subr.msk.bf16.mxu1 %vm107_vm0, %v34_v0  ;;  %v109_v1 = vsel %vm107_vm0, %v34_v0, 0  ;;  %v325_v2 = vld [vmem:[%s527_s0] sm:$0xff]   ;;  %v328_v5 = vld [vmem:[%s527_s0 + $0x28] sm:$0xff]   ;;  %v330_v7 = vld [vmem:[%s527_s0 + $0x30] sm:$0xff]  }
   0x3   :  { %304 = vmatpush3.bf16.msra.mxu0 %v109_v1  ;;  %322 = vmatpush3.bf16.msra.mxu1 %v109_v1  ;;  %v326_v3 = vld [vmem:[%s527_s0 + $0x20] sm:$0xff]   ;;  %v331_v8 = vld [vmem:[%s527_s0 + $0x18] sm:$0xff]   ;;  %v210_v12 = vld [vmem:[%s529_s3 + $0x10] sm:$0xff] }
   0x4   :  { %305 = vmatprep.mubr.msk.bf16.mxu0 %vm82_vm1, %v325_v2  ;;  %313 = vmatprep.mubr.msk.bf16.mxu1 %vm82_vm1, %v326_v3  ;;  %v332_v9 = vld [vmem:[%s527_s0 + $0x38] sm:$0xff]   ;;  %v396_v10 = vld [vmem:[%s528_s2] ss:$0 sm:$0xff]  ;;  %v218_v15 = vld [vmem:[%s529_s3 + $0x50] sm:$0xff] }
   0x5   :  { %v208_v17 = vld [vmem:[%s529_s3] sm:$0xff]  ;;  %v211_v23 = vld [vmem:[%s529_s3 + $0x18] sm:$0xff]  ;;  %v209_v30 = vld [vmem:[%s529_s3 + $0x8] sm:$0xff] }
   0x6   :  { %306 = vmatmul.mubr.msk.bf16.vlgmr.msra.gmra.mrb[0].mxu0 %vm82_vm1, %v327_v4  ;;  %314 = vmatmul.mubr.msk.bf16.vlgmr.msra.gmra.mrb[0].mxu1 %vm82_vm1, %v328_v5  ;;  %v216_v21 = vld [vmem:[%s529_s3 + $0x40] sm:$0xff]  ;;  %v219_v28 = vld [vmem:[%s529_s3 + $0x58] sm:$0xff]  ;;  %v217_v36 = vld [vmem:[%s529_s3 + $0x48] sm:$0xff] }
   0x7   :  { %309 = vmatprep.mubr.msk.bf16.mxu0 %vm82_vm1, %v329_v6  ;;  %317 = vmatprep.mubr.msk.bf16.mxu1 %vm82_vm1, %v330_v7  ;;  %v214_v51 = vld [vmem:[%s529_s3 + $0x30] sm:$0xff]  ;;  %v212_v57 = vld [vmem:[%s529_s3 + $0x20] sm:$0xff]  ;;  %v215_v63 = vld [vmem:[%s529_s3 + $0x38] sm:$0xff] }
   0x8   :  { %v222_v55 = vld [vmem:[%s529_s3 + $0x70] sm:$0xff]  ;;  %v220_v61 = vld [vmem:[%s529_s3 + $0x60] sm:$0xff]  ;;  %v223_v4 = vld [vmem:[%s529_s3 + $0x78] sm:$0xff] }
   0x9   :  { %v213_v6 = vld [vmem:[%s529_s3 + $0x28] sm:$0xff] }
   0xe   :  { %310 = vmatmul.mubr.msk.bf16.gmra.mrb[4].mxu0 %vm82_vm1, %v331_v8  ;;  %318 = vmatmul.mubr.msk.bf16.gmra.mrb[4].mxu1 %vm82_vm1, %v332_v9 }
  0xd9   :  { %v307_v11 = vpop.f32.mrb[0].mxu0  ;;  %v315_v14 = vpop.f32.mrb[0].mxu1 }
  0xda   :  { %v154_v13 = vadd.f32 %v307_v11, %v396_v10  ;;  %v145_v16 = vpop.f32.mrb[1].mxu0  ;;  %v186_v18 = vadd.f32 %v315_v14, %v396_v10  ;;  %v177_v20 = vpop.f32.mrb[1].mxu1 }
  0xdb   :  { %v146_v19 = vadd.f32 %v396_v10, %v145_v16  ;;  %v308_v22 = vpop.f32.mrb[2].mxu0  ;;  %v178_v25 = vadd.f32 %v396_v10, %v177_v20  ;;  %v316_v27 = vpop.f32.mrb[2].mxu1 }
  0xdc   :  { %v226_v24 = vadd.f32 %v210_v12, %v154_v13  ;;  %v157_v26 = vadd.f32 %v308_v22, %v396_v10  ;;  %v148_v29 = vpop.f32.mrb[3].mxu0  ;;  %v234_v31 = vadd.f32 %v218_v15, %v186_v18  ;;  %v189_v33 = vadd.f32 %v316_v27, %v396_v10  ;;  %v180_v35 = vpop.f32.mrb[3].mxu1  ;;  %v221_v13 = vld [vmem:[%s529_s3 + $0x68] sm:$0xff] }
  0xdd   :  { %v224_v32 = vadd.f32 %v208_v17, %v146_v19  ;;  %v149_v34 = vadd.f32 %v396_v10, %v148_v29  ;;  %v232_v38 = vadd.f32 %v216_v21, %v178_v25  ;;  %v181_v40 = vadd.f32 %v396_v10, %v180_v35 }
  0xde   :  { %v242_v37 = vmax.f32 %v226_v24, 0.0  ;;  %v227_v39 = vadd.f32 %v211_v23, %v157_v26  ;;  %v250_v41 = vmax.f32 %v234_v31, 0.0  ;;  %v235_v43 = vadd.f32 %v219_v28, %v189_v33 }
  0xdf   :  { %v240_v42 = vmax.f32 %v224_v32, 0.0  ;;  %v225_v44 = vadd.f32 %v209_v30, %v149_v34  ;;  %v248_v45 = vmax.f32 %v232_v38, 0.0  ;;  %v233_v47 = vadd.f32 %v217_v36, %v181_v40 }
  0xe0   :  { %259 = vst.msk [vmem:[%s530_s4 + $0x10] sm:$0xff] %vm256_vm2, %v242_v37  ;;  %v243_v46 = vmax.f32 %v227_v39, 0.0  ;;  %267 = vst.msk [vmem:[%s530_s4 + $0x50] sm:$0xff] %vm256_vm2, %v250_v41  ;;  %v251_v48 = vmax.f32 %v235_v43, 0.0 }
  0xe1   :  { %257 = vst.msk [vmem:[%s530_s4] sm:$0xff] %vm256_vm2, %v240_v42  ;;  %v241_v49 = vmax.f32 %v225_v44, 0.0  ;;  %v311_v50 = vpop.f32.mrb[4].mxu0  ;;  %265 = vst.msk [vmem:[%s530_s4 + $0x40] sm:$0xff] %vm256_vm2, %v248_v45  ;;  %v249_v52 = vmax.f32 %v233_v47, 0.0  ;;  %v319_v54 = vpop.f32.mrb[4].mxu1 }
  0xe2   :  { %260 = vst.msk [vmem:[%s530_s4 + $0x18] sm:$0xff] %vm256_vm2, %v243_v46  ;;  %v170_v53 = vadd.f32 %v311_v50, %v396_v10  ;;  %v161_v56 = vpop.f32.mrb[5].mxu0  ;;  %268 = vst.msk [vmem:[%s530_s4 + $0x58] sm:$0xff] %vm256_vm2, %v251_v48  ;;  %v202_v58 = vadd.f32 %v319_v54, %v396_v10  ;;  %v193_v60 = vpop.f32.mrb[5].mxu1 }
  0xe3   :  { %258 = vst.msk [vmem:[%s530_s4 + $0x8] sm:$0xff] %vm256_vm2, %v241_v49  ;;  %v162_v59 = vadd.f32 %v396_v10, %v161_v56  ;;  %v312_v62 = vpop.f32.mrb[6].mxu0  ;;  %266 = vst.msk [vmem:[%s530_s4 + $0x48] sm:$0xff] %vm256_vm2, %v249_v52  ;;  %v194_v1 = vadd.f32 %v396_v10, %v193_v60  ;;  %v320_v3 = vpop.f32.mrb[6].mxu1 }
  0xe4   :  { %v230_v0 = vadd.f32 %v214_v51, %v170_v53  ;;  %v173_v2 = vadd.f32 %v312_v62, %v396_v10  ;;  %v164_v5 = vpop.f32.mrb[7].mxu0  ;;  %v238_v7 = vadd.f32 %v222_v55, %v202_v58  ;;  %v205_v9 = vadd.f32 %v320_v3, %v396_v10  ;;  %v196_v12 = vpop.f32.mrb[7].mxu1 }
  0xe5   :  { %v228_v8 = vadd.f32 %v212_v57, %v162_v59  ;;  %v165_v11 = vadd.f32 %v396_v10, %v164_v5  ;;  %v236_v15 = vadd.f32 %v220_v61, %v194_v1  ;;  %v197_v17 = vadd.f32 %v396_v10, %v196_v12 }
  0xe6   :  { %v246_v14 = vmax.f32 %v230_v0, 0.0  ;;  %v231_v16 = vadd.f32 %v215_v63, %v173_v2  ;;  %v254_v18 = vmax.f32 %v238_v7, 0.0  ;;  %v239_v20 = vadd.f32 %v223_v4, %v205_v9 }
  0xe7   :  { %v244_v19 = vmax.f32 %v228_v8, 0.0  ;;  %v229_v21 = vadd.f32 %v213_v6, %v165_v11  ;;  %v252_v22 = vmax.f32 %v236_v15, 0.0  ;;  %v237_v24 = vadd.f32 %v221_v13, %v197_v17 }
  0xe8   :  { %263 = vst.msk [vmem:[%s530_s4 + $0x30] sm:$0xff] %vm256_vm2, %v246_v14  ;;  %v247_v23 = vmax.f32 %v231_v16, 0.0  ;;  %271 = vst.msk [vmem:[%s530_s4 + $0x70] sm:$0xff] %vm256_vm2, %v254_v18  ;;  %v255_v10 = vmax.f32 %v239_v20, 0.0 }
  0xe9   :  { %261 = vst.msk [vmem:[%s530_s4 + $0x20] sm:$0xff] %vm256_vm2, %v244_v19  ;;  %v245_v25 = vmax.f32 %v229_v21, 0.0  ;;  %269 = vst.msk [vmem:[%s530_s4 + $0x60] sm:$0xff] %vm256_vm2, %v252_v22  ;;  %v253_v26 = vmax.f32 %v237_v24, 0.0 }
  0xea   :  { %264 = vst.msk [vmem:[%s530_s4 + $0x38] sm:$0xff] %vm256_vm2, %v247_v23  ;;  %272 = vst.msk [vmem:[%s530_s4 + $0x78] sm:$0xff] %vm256_vm2, %v255_v10 }
  0xeb   :  { %262 = vst.msk [vmem:[%s530_s4 + $0x28] sm:$0xff] %vm256_vm2, %v245_v25  ;;  %270 = vst.msk [vmem:[%s530_s4 + $0x68] sm:$0xff] %vm256_vm2, %v253_v26 }

// kernel: resunet_forward.45
= control target key start
LH: loop header
LB: loop body
LE: loop exit
PB: predicated region body
PF: predicated region fallthrough
CT: control target
= control target key end

     0   :  { %s749_s12 = smov 0   ;;  %s910_s0 = inlined_call_operand.vmem [shape: bf16[512,8], index: 0, kind: input, shape index: {}]   ;;  %s911_s1 = inlined_call_operand.vmem [shape: bf16[8,3], index: 1, kind: input, shape index: {}]   ;;  %s912_s2 = inlined_call_operand.vmem [shape: f32[1,3], index: 2, kind: input, shape index: {}]   ;;  %s913_s3 = inlined_call_operand.vmem [shape: f32[512,3], index: 3, kind: output, shape index: {}]  }
   0x1 LB: > { %s598_s13 = sadd.s32 4294967295, %s727_s12   ;;  %p602_p0 = scmp.ge.s32.totalorder %s727_s12, 1  ;;  %s727_s12 = sphi %s749_s12, %s13_s12  }
   0x2   : > { %p138_p1 = scmp.lt.s32.totalorder %s727_s12, 3 }
   0x4   : > { %p139_p2 = pnand %p602_p0, %p138_p1 }
   0x5   : > { %v207_v0 = vld [vmem:[%s911_s1] sm:$0xf] (!%p139_p2)  ;;  %vm344_vm0 = vcmask (!%p139_p2), 1043456   ;;  %s603_s16 = sshll.u32 (!%p139_p2), %s598_s13, 5  ;;  %vm295_vm1 = vcmask (!%p139_p2), 64512   ;;  %vm509_vm2 = vcmask (!%p139_p2), 23552  }
   0x6   : > { %142 = sbr.rel (%p139_p2) target bundleno = 261 (0x105), region = 32  ;;  %695 = vmatprep.subr.msk.bf16.mxu0 (!%p139_p2), %vm344_vm0, %v207_v0  ;;  %696 = vmatprep.subr.msk.bf16.mxu1 (!%p139_p2), %vm344_vm0, %v207_v0  ;;  %v346_v1 = vsel (!%p139_p2), %vm344_vm0, %v207_v0, 0  ;;  %p163_p3 = scmp.lt.s32.totalorder (!%p139_p2), %s603_s16, 63  ;;  %v804_v18 = vld [vmem:[%s912_s2] ss:$0 sm:$0xff] (!%p139_p2) }
   0x7   : > { %660 = vmatpush3.bf16.msra.mxu0 (!%p139_p2), %v346_v1  ;;  %694 = vmatpush3.bf16.msra.mxu1 (!%p139_p2), %v346_v1 }
   0xd   : > { %s915_s16 = smov (!%p163_p3, %s603_s16), 63 }
   0xe   : > { %s604_s17 = sshll.u32 %s915_s16, 2  ;;  %s606_s21 = sshll.u32 %s915_s16, 3 }
   0xf   : > { %s766_s20 = scalar_lea.vmem %s910_s0, %s604_s17  ;;  %s809_s26 = scalar_lea.vmem %s913_s3, %s606_s21 }
  0x10   : > { %v705_v2 = vld [vmem:[%s766_s20] sm:$0xff]   ;;  %v707_v4 = vld [vmem:[%s766_s20 + $0x8] sm:$0xff]   ;;  %v709_v6 = vld [vmem:[%s766_s20 + $0x10] sm:$0xff]  }
  0x11   : > { %v706_v3 = vld [vmem:[%s766_s20 + $0x40] sm:$0xff]   ;;  %661 = vmatprep.mubr.msk.bf16.mxu0 %vm295_vm1, %v705_v2  ;;  %v708_v5 = vld [vmem:[%s766_s20 + $0x48] sm:$0xff]   ;;  %v710_v7 = vld [vmem:[%s766_s20 + $0x50] sm:$0xff]  }
  0x12   : > { %677 = vmatprep.mubr.msk.bf16.mxu1 %vm295_vm1, %v706_v3  ;;  %662 = vmatmul.mubr.msk.bf16.vlgmr.msra.gmra.mrb[0].mxu0 %vm295_vm1, %v707_v4  ;;  %v711_v8 = vld [vmem:[%s766_s20 + $0x18] sm:$0xff]   ;;  %v713_v10 = vld [vmem:[%s766_s20 + $0x20] sm:$0xff]   ;;  %v715_v12 = vld [vmem:[%s766_s20 + $0x28] sm:$0xff]  }
  0x13   : > { %678 = vmatmul.mubr.msk.bf16.vlgmr.msra.gmra.mrb[0].mxu1 %vm295_vm1, %v708_v5  ;;  %665 = vmatprep.mubr.msk.bf16.mxu0 %vm295_vm1, %v709_v6  ;;  %v712_v9 = vld [vmem:[%s766_s20 + $0x58] sm:$0xff]   ;;  %v714_v11 = vld [vmem:[%s766_s20 + $0x60] sm:$0xff]   ;;  %v716_v13 = vld [vmem:[%s766_s20 + $0x68] sm:$0xff]  }
  0x14   : > { %681 = vmatprep.mubr.msk.bf16.mxu1 %vm295_vm1, %v710_v7  ;;  %v717_v14 = vld [vmem:[%s766_s20 + $0x30] sm:$0xff]   ;;  %v719_v16 = vld [vmem:[%s766_s20 + $0x38] sm:$0xff]  }
  0x15   : > { %v718_v15 = vld [vmem:[%s766_s20 + $0x70] sm:$0xff]   ;;  %v720_v17 = vld [vmem:[%s766_s20 + $0x78] sm:$0xff]  }
  0x1a   : > { %666 = vmatmul.mubr.msk.bf16.gmra.mrb[4].mxu0 %vm295_vm1, %v711_v8 }
  0x1b   : > { %682 = vmatmul.mubr.msk.bf16.gmra.mrb[4].mxu1 %vm295_vm1, %v712_v9  ;;  %669 = vmatprep.mubr.msk.bf16.mxu0 %vm295_vm1, %v713_v10 }
  0x1c   : > { %685 = vmatprep.mubr.msk.bf16.mxu1 %vm295_vm1, %v714_v11 }
  0x22   : > { %670 = vmatmul.mubr.msk.bf16.gmra.mrb[8].mxu0 %vm295_vm1, %v715_v12 }
  0x23   : > { %686 = vmatmul.mubr.msk.bf16.gmra.mrb[8].mxu1 %vm295_vm1, %v716_v13  ;;  %673 = vmatprep.mubr.msk.bf16.mxu0 %vm295_vm1, %v717_v14 }
  0x24   : > { %689 = vmatprep.mubr.msk.bf16.mxu1 %vm295_vm1, %v718_v15 }
  0x2a   : > { %674 = vmatmul.mubr.msk.bf16.gmra.mrb[12].mxu0 %vm295_vm1, %v719_v16 }
  0x2b   : > { %690 = vmatmul.mubr.msk.bf16.gmra.mrb[12].mxu1 %vm295_vm1, %v720_v17 }
  0xe5   : > { %v663_v19 = vpop.f32.mrb[0].mxu0 }
  0xe6   : > { %v391_v20 = vadd.f32 %v663_v19, %v804_v18  ;;  %v679_v21 = vpop.f32.mrb[0].mxu1  ;;  %v382_v22 = vpop.f32.mrb[1].mxu0 }
  0xe7   : > { %v455_v23 = vadd.f32 %v679_v21, %v804_v18  ;;  %v383_v24 = vadd.f32 %v804_v18, %v382_v22  ;;  %v446_v25 = vpop.f32.mrb[1].mxu1  ;;  %v664_v26 = vpop.f32.mrb[2].mxu0 }
  0xe8   : > { %512 = vst.msk [vmem:[%s809_s26 + $0x10] sm:$0xff] %vm509_vm2, %v391_v20  ;;  %v447_v27 = vadd.f32 %v804_v18, %v446_v25  ;;  %v394_v28 = vadd.f32 %v664_v26, %v804_v18  ;;  %v680_v29 = vpop.f32.mrb[2].mxu1  ;;  %v385_v30 = vpop.f32.mrb[3].mxu0 }
  0xe9   : > { %528 = vst.msk [vmem:[%s809_s26 + $0x90] sm:$0xff] %vm509_vm2, %v455_v23  ;;  %510 = vst.msk [vmem:[%s809_s26] sm:$0xff] %vm509_vm2, %v383_v24  ;;  %v458_v31 = vadd.f32 %v680_v29, %v804_v18  ;;  %v386_v32 = vadd.f32 %v804_v18, %v385_v30  ;;  %v449_v33 = vpop.f32.mrb[3].mxu1 }
  0xea   : > { %526 = vst.msk [vmem:[%s809_s26 + $0x80] sm:$0xff] %vm509_vm2, %v447_v27  ;;  %513 = vst.msk [vmem:[%s809_s26 + $0x18] sm:$0xff] %vm509_vm2, %v394_v28  ;;  %v450_v34 = vadd.f32 %v804_v18, %v449_v33 }
  0xeb   : > { %529 = vst.msk [vmem:[%s809_s26 + $0x98] sm:$0xff] %vm509_vm2, %v458_v31  ;;  %511 = vst.msk [vmem:[%s809_s26 + $0x8] sm:$0xff] %vm509_vm2, %v386_v32 }
  0xec   : > { %527 = vst.msk [vmem:[%s809_s26 + $0x88] sm:$0xff] %vm509_vm2, %v450_v34 }
  0xed   : > { %v667_v35 = vpop.f32.mrb[4].mxu0 }
  0xee   : > { %v407_v36 = vadd.f32 %v667_v35, %v804_v18  ;;  %v683_v37 = vpop.f32.mrb[4].mxu1  ;;  %v398_v38 = vpop.f32.mrb[5].mxu0 }
  0xef   : > { %v471_v39 = vadd.f32 %v683_v37, %v804_v18  ;;  %v399_v40 = vadd.f32 %v804_v18, %v398_v38  ;;  %v462_v41 = vpop.f32.mrb[5].mxu1  ;;  %v668_v42 = vpop.f32.mrb[6].mxu0 }
  0xf0   : > { %516 = vst.msk [vmem:[%s809_s26 + $0x30] sm:$0xff] %vm509_vm2, %v407_v36  ;;  %v463_v43 = vadd.f32 %v804_v18, %v462_v41  ;;  %v410_v44 = vadd.f32 %v668_v42, %v804_v18  ;;  %v684_v45 = vpop.f32.mrb[6].mxu1  ;;  %v401_v46 = vpop.f32.mrb[7].mxu0 }
  0xf1   : > { %532 = vst.msk [vmem:[%s809_s26 + $0xb0] sm:$0xff] %vm509_vm2, %v471_v39  ;;  %514 = vst.msk [vmem:[%s809_s26 + $0x20] sm:$0xff] %vm509_vm2, %v399_v40  ;;  %v474_v47 = vadd.f32 %v684_v45, %v804_v18  ;;  %v402_v48 = vadd.f32 %v804_v18, %v401_v46  ;;  %v465_v49 = vpop.f32.mrb[7].mxu1 }
  0xf2   : > { %530 = vst.msk [vmem:[%s809_s26 + $0xa0] sm:$0xff] %vm509_vm2, %v463_v43  ;;  %517 = vst.msk [vmem:[%s809_s26 + $0x38] sm:$0xff] %vm509_vm2, %v410_v44  ;;  %v466_v50 = vadd.f32 %v804_v18, %v465_v49 }
  0xf3   : > { %533 = vst.msk [vmem:[%s809_s26 + $0xb8] sm:$0xff] %vm509_vm2, %v474_v47  ;;  %515 = vst.msk [vmem:[%s809_s26 + $0x28] sm:$0xff] %vm509_vm2, %v402_v48 }
  0xf4   : > { %531 = vst.msk [vmem:[%s809_s26 + $0xa8] sm:$0xff] %vm509_vm2, %v466_v50 }
  0xf5   : > { %v671_v51 = vpop.f32.mrb[8].mxu0 }
  0xf6   : > { %v423_v52 = vadd.f32 %v671_v51, %v804_v18  ;;  %v687_v53 = vpop.f32.mrb[8].mxu1  ;;  %v414_v54 = vpop.f32.mrb[9].mxu0 }
  0xf7   : > { %v487_v55 = vadd.f32 %v687_v53, %v804_v18  ;;  %v415_v56 = vadd.f32 %v804_v18, %v414_v54  ;;  %v478_v57 = vpop.f32.mrb[9].mxu1  ;;  %v672_v58 = vpop.f32.mrb[10].mxu0 }
  0xf8   : > { %520 = vst.msk [vmem:[%s809_s26 + $0x50] sm:$0xff] %vm509_vm2, %v423_v52  ;;  %v479_v59 = vadd.f32 %v804_v18, %v478_v57  ;;  %v426_v60 = vadd.f32 %v672_v58, %v804_v18  ;;  %v688_v61 = vpop.f32.mrb[10].mxu1  ;;  %v417_v62 = vpop.f32.mrb[11].mxu0 }
  0xf9   : > { %536 = vst.msk [vmem:[%s809_s26 + $0xd0] sm:$0xff] %vm509_vm2, %v487_v55  ;;  %518 = vst.msk [vmem:[%s809_s26 + $0x40] sm:$0xff] %vm509_vm2, %v415_v56  ;;  %v490_v63 = vadd.f32 %v688_v61, %v804_v18  ;;  %v418_v0 = vadd.f32 %v804_v18, %v417_v62  ;;  %v481_v1 = vpop.f32.mrb[11].mxu1 }
  0xfa   : > { %534 = vst.msk [vmem:[%s809_s26 + $0xc0] sm:$0xff] %vm509_vm2, %v479_v59  ;;  %521 = vst.msk [vmem:[%s809_s26 + $0x58] sm:$0xff] %vm509_vm2, %v426_v60  ;;  %v482_v2 = vadd.f32 %v804_v18, %v481_v1 }
  0xfb   : > { %537 = vst.msk [vmem:[%s809_s26 + $0xd8] sm:$0xff] %vm509_vm2, %v490_v63  ;;  %519 = vst.msk [vmem:[%s809_s26 + $0x48] sm:$0xff] %vm509_vm2, %v418_v0 }
  0xfc   : > { %535 = vst.msk [vmem:[%s809_s26 + $0xc8] sm:$0xff] %vm509_vm2, %v482_v2 }
  0xfd   : > { %v675_v3 = vpop.f32.mrb[12].mxu0 }
  0xfe   : > { %v439_v4 = vadd.f32 %v675_v3, %v804_v18  ;;  %v691_v5 = vpop.f32.mrb[12].mxu1  ;;  %v430_v6 = vpop.f32.mrb[13].mxu0 }
  0xff   : > { %v503_v7 = vadd.f32 %v691_v5, %v804_v18  ;;  %v431_v8 = vadd.f32 %v804_v18, %v430_v6  ;;  %v494_v9 = vpop.f32.mrb[13].mxu1  ;;  %v676_v10 = vpop.f32.mrb[14].mxu0 }
 0x100   : > { %524 = vst.msk [vmem:[%s809_s26 + $0x70] sm:$0xff] %vm509_vm2, %v439_v4  ;;  %v495_v11 = vadd.f32 %v804_v18, %v494_v9  ;;  %v442_v12 = vadd.f32 %v676_v10, %v804_v18  ;;  %v692_v13 = vpop.f32.mrb[14].mxu1  ;;  %v433_v14 = vpop.f32.mrb[15].mxu0 }
 0x101   : > { %540 = vst.msk [vmem:[%s809_s26 + $0xf0] sm:$0xff] %vm509_vm2, %v503_v7  ;;  %522 = vst.msk [vmem:[%s809_s26 + $0x60] sm:$0xff] %vm509_vm2, %v431_v8  ;;  %v506_v15 = vadd.f32 %v692_v13, %v804_v18  ;;  %v434_v16 = vadd.f32 %v804_v18, %v433_v14  ;;  %v497_v17 = vpop.f32.mrb[15].mxu1 }
 0x102   : > { %538 = vst.msk [vmem:[%s809_s26 + $0xe0] sm:$0xff] %vm509_vm2, %v495_v11  ;;  %525 = vst.msk [vmem:[%s809_s26 + $0x78] sm:$0xff] %vm509_vm2, %v442_v12  ;;  %v498_v19 = vadd.f32 %v804_v18, %v497_v17 }
 0x103   : > { %541 = vst.msk [vmem:[%s809_s26 + $0xf8] sm:$0xff] %vm509_vm2, %v506_v15  ;;  %523 = vst.msk [vmem:[%s809_s26 + $0x68] sm:$0xff] %vm509_vm2, %v434_v16 }
 0x104   : > { %539 = vst.msk [vmem:[%s809_s26 + $0xe8] sm:$0xff] %vm509_vm2, %v498_v19 }
 0x105 PF: > { %s13_s12 = sadd.s32 1, %s727_s12  }
 0x106   : > { %p10_p4 = scmp.ge.s32.totalorder %s13_s12, 4  }
 0x108   :  { %12 = sbr.rel (!%p10_p4) target bundleno = 1 (0x1), region = 62 }

// kernel: resunet_forward.44
= control target key start
LH: loop header
LB: loop body
LE: loop exit
PB: predicated region body
PF: predicated region fallthrough
CT: control target
= control target key end

     0   :  { %s752_s12 = smov 0   ;;  %s913_s0 = inlined_call_operand.vmem [shape: bf16[512,16], index: 0, kind: input, shape index: {}]   ;;  %s914_s1 = inlined_call_operand.vmem [shape: bf16[16,8], index: 1, kind: input, shape index: {}]   ;;  %s915_s2 = inlined_call_operand.vmem [shape: f32[1,8], index: 2, kind: input, shape index: {}]   ;;  %s916_s3 = inlined_call_operand.vmem [shape: f32[512,8], index: 3, kind: output, shape index: {}]  }
   0x1 LB: > { %s601_s13 = sadd.s32 4294967295, %s730_s12   ;;  %p605_p0 = scmp.ge.s32.totalorder %s730_s12, 1  ;;  %s730_s12 = sphi %s752_s12, %s13_s12  }
   0x2   : > { %p138_p1 = scmp.lt.s32.totalorder %s730_s12, 3 }
   0x4   : > { %p139_p2 = pnand %p605_p0, %p138_p1 }
   0x5   : > { %v707_v0 = vld [vmem:[%s914_s1] sm:$0xff] (!%p139_p2)   ;;  %s606_s16 = sshll.u32 (!%p139_p2), %s601_s13, 5  ;;  %vm302_vm0 = vcmask (!%p139_p2), 130048   ;;  %vm512_vm1 = vcmask (!%p139_p2), 64512  }
   0x6   : > { %142 = sbr.rel (%p139_p2) target bundleno = 261 (0x105), region = 32  ;;  %p163_p3 = scmp.lt.s32.totalorder (!%p139_p2), %s606_s16, 63  ;;  %663 = vmatprep.subr.bf16.mxu0 (!%p139_p2), %v707_v0  ;;  %697 = vmatprep.subr.bf16.mxu1 (!%p139_p2), %v707_v0  ;;  %v807_v17 = vld [vmem:[%s915_s2] ss:$0 sm:$0xff] (!%p139_p2) }
   0x7   : > { %664 = vmatpush3.bf16.msra.mxu0 (!%p139_p2), %v707_v0  ;;  %698 = vmatpush3.bf16.msra.mxu1 (!%p139_p2), %v707_v0 }
   0xd   : > { %s918_s16 = smov (!%p163_p3, %s606_s16), 63 }
   0xe   : > { %s607_s17 = sshll.u32 %s918_s16, 2  ;;  %s609_s21 = sshll.u32 %s918_s16, 3 }
   0xf   : > { %s769_s20 = scalar_lea.vmem %s913_s0, %s607_s17  ;;  %s812_s26 = scalar_lea.vmem %s916_s3, %s609_s21 }
  0x10   : > { %v708_v1 = vld [vmem:[%s769_s20] sm:$0xff]   ;;  %v710_v3 = vld [vmem:[%s769_s20 + $0x8] sm:$0xff]   ;;  %v712_v5 = vld [vmem:[%s769_s20 + $0x10] sm:$0xff]  }
  0x11   : > { %v709_v2 = vld [vmem:[%s769_s20 + $0x40] sm:$0xff]   ;;  %665 = vmatprep.mubr.msk.bf16.mxu0 %vm302_vm0, %v708_v1  ;;  %v711_v4 = vld [vmem:[%s769_s20 + $0x48] sm:$0xff]   ;;  %v713_v6 = vld [vmem:[%s769_s20 + $0x50] sm:$0xff]  }
  0x12   : > { %681 = vmatprep.mubr.msk.bf16.mxu1 %vm302_vm0, %v709_v2  ;;  %666 = vmatmul.mubr.msk.bf16.vlgmr.msra.gmra.mrb[0].mxu0 %vm302_vm0, %v710_v3  ;;  %v714_v7 = vld [vmem:[%s769_s20 + $0x18] sm:$0xff]   ;;  %v716_v9 = vld [vmem:[%s769_s20 + $0x20] sm:$0xff]   ;;  %v718_v11 = vld [vmem:[%s769_s20 + $0x28] sm:$0xff]  }
  0x13   : > { %682 = vmatmul.mubr.msk.bf16.vlgmr.msra.gmra.mrb[0].mxu1 %vm302_vm0, %v711_v4  ;;  %669 = vmatprep.mubr.msk.bf16.mxu0 %vm302_vm0, %v712_v5  ;;  %v715_v8 = vld [vmem:[%s769_s20 + $0x58] sm:$0xff]   ;;  %v717_v10 = vld [vmem:[%s769_s20 + $0x60] sm:$0xff]   ;;  %v719_v12 = vld [vmem:[%s769_s20 + $0x68] sm:$0xff]  }
  0x14   : > { %685 = vmatprep.mubr.msk.bf16.mxu1 %vm302_vm0, %v713_v6  ;;  %v720_v13 = vld [vmem:[%s769_s20 + $0x30] sm:$0xff]   ;;  %v722_v15 = vld [vmem:[%s769_s20 + $0x38] sm:$0xff]  }
  0x15   : > { %v721_v14 = vld [vmem:[%s769_s20 + $0x70] sm:$0xff]   ;;  %v723_v16 = vld [vmem:[%s769_s20 + $0x78] sm:$0xff]  }
  0x1a   : > { %670 = vmatmul.mubr.msk.bf16.gmra.mrb[4].mxu0 %vm302_vm0, %v714_v7 }
  0x1b   : > { %686 = vmatmul.mubr.msk.bf16.gmra.mrb[4].mxu1 %vm302_vm0, %v715_v8  ;;  %673 = vmatprep.mubr.msk.bf16.mxu0 %vm302_vm0, %v716_v9 }
  0x1c   : > { %689 = vmatprep.mubr.msk.bf16.mxu1 %vm302_vm0, %v717_v10 }
  0x22   : > { %674 = vmatmul.mubr.msk.bf16.gmra.mrb[8].mxu0 %vm302_vm0, %v718_v11 }
  0x23   : > { %690 = vmatmul.mubr.msk.bf16.gmra.mrb[8].mxu1 %vm302_vm0, %v719_v12  ;;  %677 = vmatprep.mubr.msk.bf16.mxu0 %vm302_vm0, %v720_v13 }
  0x24   : > { %693 = vmatprep.mubr.msk.bf16.mxu1 %vm302_vm0, %v721_v14 }
  0x2a   : > { %678 = vmatmul.mubr.msk.bf16.gmra.mrb[12].mxu0 %vm302_vm0, %v722_v15 }
  0x2b   : > { %694 = vmatmul.mubr.msk.bf16.gmra.mrb[12].mxu1 %vm302_vm0, %v723_v16 }
  0xe5   : > { %v667_v18 = vpop.f32.mrb[0].mxu0 }
  0xe6   : > { %v394_v19 = vadd.f32 %v667_v18, %v807_v17  ;;  %v683_v20 = vpop.f32.mrb[0].mxu1  ;;  %v385_v21 = vpop.f32.mrb[1].mxu0 }
  0xe7   : > { %v458_v22 = vadd.f32 %v683_v20, %v807_v17  ;;  %v386_v23 = vadd.f32 %v807_v17, %v385_v21  ;;  %v449_v24 = vpop.f32.mrb[1].mxu1  ;;  %v668_v25 = vpop.f32.mrb[2].mxu0 }
  0xe8   : > { %515 = vst.msk [vmem:[%s812_s26 + $0x10] sm:$0xff] %vm512_vm1, %v394_v19  ;;  %v450_v26 = vadd.f32 %v807_v17, %v449_v24  ;;  %v397_v27 = vadd.f32 %v668_v25, %v807_v17  ;;  %v684_v28 = vpop.f32.mrb[2].mxu1  ;;  %v388_v29 = vpop.f32.mrb[3].mxu0 }
  0xe9   : > { %531 = vst.msk [vmem:[%s812_s26 + $0x90] sm:$0xff] %vm512_vm1, %v458_v22  ;;  %513 = vst.msk [vmem:[%s812_s26] sm:$0xff] %vm512_vm1, %v386_v23  ;;  %v461_v30 = vadd.f32 %v684_v28, %v807_v17  ;;  %v389_v31 = vadd.f32 %v807_v17, %v388_v29  ;;  %v452_v32 = vpop.f32.mrb[3].mxu1 }
  0xea   : > { %529 = vst.msk [vmem:[%s812_s26 + $0x80] sm:$0xff] %vm512_vm1, %v450_v26  ;;  %516 = vst.msk [vmem:[%s812_s26 + $0x18] sm:$0xff] %vm512_vm1, %v397_v27  ;;  %v453_v33 = vadd.f32 %v807_v17, %v452_v32 }
  0xeb   : > { %532 = vst.msk [vmem:[%s812_s26 + $0x98] sm:$0xff] %vm512_vm1, %v461_v30  ;;  %514 = vst.msk [vmem:[%s812_s26 + $0x8] sm:$0xff] %vm512_vm1, %v389_v31 }
  0xec   : > { %530 = vst.msk [vmem:[%s812_s26 + $0x88] sm:$0xff] %vm512_vm1, %v453_v33 }
  0xed   : > { %v671_v34 = vpop.f32.mrb[4].mxu0 }
  0xee   : > { %v410_v35 = vadd.f32 %v671_v34, %v807_v17  ;;  %v687_v36 = vpop.f32.mrb[4].mxu1  ;;  %v401_v37 = vpop.f32.mrb[5].mxu0 }
  0xef   : > { %v474_v38 = vadd.f32 %v687_v36, %v807_v17  ;;  %v402_v39 = vadd.f32 %v807_v17, %v401_v37  ;;  %v465_v40 = vpop.f32.mrb[5].mxu1  ;;  %v672_v41 = vpop.f32.mrb[6].mxu0 }
  0xf0   : > { %519 = vst.msk [vmem:[%s812_s26 + $0x30] sm:$0xff] %vm512_vm1, %v410_v35  ;;  %v466_v42 = vadd.f32 %v807_v17, %v465_v40  ;;  %v413_v43 = vadd.f32 %v672_v41, %v807_v17  ;;  %v688_v44 = vpop.f32.mrb[6].mxu1  ;;  %v404_v45 = vpop.f32.mrb[7].mxu0 }
  0xf1   : > { %535 = vst.msk [vmem:[%s812_s26 + $0xb0] sm:$0xff] %vm512_vm1, %v474_v38  ;;  %517 = vst.msk [vmem:[%s812_s26 + $0x20] sm:$0xff] %vm512_vm1, %v402_v39  ;;  %v477_v46 = vadd.f32 %v688_v44, %v807_v17  ;;  %v405_v47 = vadd.f32 %v807_v17, %v404_v45  ;;  %v468_v48 = vpop.f32.mrb[7].mxu1 }
  0xf2   : > { %533 = vst.msk [vmem:[%s812_s26 + $0xa0] sm:$0xff] %vm512_vm1, %v466_v42  ;;  %520 = vst.msk [vmem:[%s812_s26 + $0x38] sm:$0xff] %vm512_vm1, %v413_v43  ;;  %v469_v49 = vadd.f32 %v807_v17, %v468_v48 }
  0xf3   : > { %536 = vst.msk [vmem:[%s812_s26 + $0xb8] sm:$0xff] %vm512_vm1, %v477_v46  ;;  %518 = vst.msk [vmem:[%s812_s26 + $0x28] sm:$0xff] %vm512_vm1, %v405_v47 }
  0xf4   : > { %534 = vst.msk [vmem:[%s812_s26 + $0xa8] sm:$0xff] %vm512_vm1, %v469_v49 }
  0xf5   : > { %v675_v50 = vpop.f32.mrb[8].mxu0 }
  0xf6   : > { %v426_v51 = vadd.f32 %v675_v50, %v807_v17  ;;  %v691_v52 = vpop.f32.mrb[8].mxu1  ;;  %v417_v53 = vpop.f32.mrb[9].mxu0 }
  0xf7   : > { %v490_v54 = vadd.f32 %v691_v52, %v807_v17  ;;  %v418_v55 = vadd.f32 %v807_v17, %v417_v53  ;;  %v481_v56 = vpop.f32.mrb[9].mxu1  ;;  %v676_v57 = vpop.f32.mrb[10].mxu0 }
  0xf8   : > { %523 = vst.msk [vmem:[%s812_s26 + $0x50] sm:$0xff] %vm512_vm1, %v426_v51  ;;  %v482_v58 = vadd.f32 %v807_v17, %v481_v56  ;;  %v429_v59 = vadd.f32 %v676_v57, %v807_v17  ;;  %v692_v60 = vpop.f32.mrb[10].mxu1  ;;  %v420_v61 = vpop.f32.mrb[11].mxu0 }
  0xf9   : > { %539 = vst.msk [vmem:[%s812_s26 + $0xd0] sm:$0xff] %vm512_vm1, %v490_v54  ;;  %521 = vst.msk [vmem:[%s812_s26 + $0x40] sm:$0xff] %vm512_vm1, %v418_v55  ;;  %v493_v62 = vadd.f32 %v692_v60, %v807_v17  ;;  %v421_v63 = vadd.f32 %v807_v17, %v420_v61  ;;  %v484_v0 = vpop.f32.mrb[11].mxu1 }
  0xfa   : > { %537 = vst.msk [vmem:[%s812_s26 + $0xc0] sm:$0xff] %vm512_vm1, %v482_v58  ;;  %524 = vst.msk [vmem:[%s812_s26 + $0x58] sm:$0xff] %vm512_vm1, %v429_v59  ;;  %v485_v1 = vadd.f32 %v807_v17, %v484_v0 }
  0xfb   : > { %540 = vst.msk [vmem:[%s812_s26 + $0xd8] sm:$0xff] %vm512_vm1, %v493_v62  ;;  %522 = vst.msk [vmem:[%s812_s26 + $0x48] sm:$0xff] %vm512_vm1, %v421_v63 }
  0xfc   : > { %538 = vst.msk [vmem:[%s812_s26 + $0xc8] sm:$0xff] %vm512_vm1, %v485_v1 }
  0xfd   : > { %v679_v2 = vpop.f32.mrb[12].mxu0 }
  0xfe   : > { %v442_v3 = vadd.f32 %v679_v2, %v807_v17  ;;  %v695_v4 = vpop.f32.mrb[12].mxu1  ;;  %v433_v5 = vpop.f32.mrb[13].mxu0 }
  0xff   : > { %v506_v6 = vadd.f32 %v695_v4, %v807_v17  ;;  %v434_v7 = vadd.f32 %v807_v17, %v433_v5  ;;  %v497_v8 = vpop.f32.mrb[13].mxu1  ;;  %v680_v9 = vpop.f32.mrb[14].mxu0 }
 0x100   : > { %527 = vst.msk [vmem:[%s812_s26 + $0x70] sm:$0xff] %vm512_vm1, %v442_v3  ;;  %v498_v10 = vadd.f32 %v807_v17, %v497_v8  ;;  %v445_v11 = vadd.f32 %v680_v9, %v807_v17  ;;  %v696_v12 = vpop.f32.mrb[14].mxu1  ;;  %v436_v13 = vpop.f32.mrb[15].mxu0 }
 0x101   : > { %543 = vst.msk [vmem:[%s812_s26 + $0xf0] sm:$0xff] %vm512_vm1, %v506_v6  ;;  %525 = vst.msk [vmem:[%s812_s26 + $0x60] sm:$0xff] %vm512_vm1, %v434_v7  ;;  %v509_v14 = vadd.f32 %v696_v12, %v807_v17  ;;  %v437_v15 = vadd.f32 %v807_v17, %v436_v13  ;;  %v500_v16 = vpop.f32.mrb[15].mxu1 }
 0x102   : > { %541 = vst.msk [vmem:[%s812_s26 + $0xe0] sm:$0xff] %vm512_vm1, %v498_v10  ;;  %528 = vst.msk [vmem:[%s812_s26 + $0x78] sm:$0xff] %vm512_vm1, %v445_v11  ;;  %v501_v18 = vadd.f32 %v807_v17, %v500_v16 }
 0x103   : > { %544 = vst.msk [vmem:[%s812_s26 + $0xf8] sm:$0xff] %vm512_vm1, %v509_v14  ;;  %526 = vst.msk [vmem:[%s812_s26 + $0x68] sm:$0xff] %vm512_vm1, %v437_v15 }
 0x104   : > { %542 = vst.msk [vmem:[%s812_s26 + $0xe8] sm:$0xff] %vm512_vm1, %v501_v18 }
 0x105 PF: > { %s13_s12 = sadd.s32 1, %s730_s12  }
 0x106   : > { %p10_p4 = scmp.ge.s32.totalorder %s13_s12, 4  }
 0x108   :  { %12 = sbr.rel (!%p10_p4) target bundleno = 1 (0x1), region = 62 }

</bundles_post_ra>
